<compile_context>
chip_gen: v6e
topology: v6e:2x2x1
jax: 0.10.0
libtpu: 0.0.40
codegen_flags: <defaults>
</compile_context>

<pallas_src>
import jax
import jax.numpy as jnp
from jax import lax
from jax.experimental import pallas as pl
from jax.experimental.pallas import tpu as pltpu

# ----------------------------- small configuration ---------------------------
# (structurally identical to CapsuleNetwork defaults, just shrunk)
B = 2                        # batch
IN_CH = 2                    # in_channels (== decoder output_channels)
IMG_H = IMG_W = 20           # image_n_pix = 400
NUM_CLASSES = 3
NUM_DIMS = 2
NC = NUM_CLASSES * NUM_DIMS  # classifier capsules = num_classes * num_dims = 6
ENC_OUT = 16                 # Enc_out_channels
PRIM_OUT = 8                 # Prim_out_channels
PRIM_N_CAPS = 4              # Prim_n_capsules == Classifier_in_channels
CLS_OUT = 8                  # Classifier_out_channels
DEC_HID = 32                 # Decoder_hidden_dim
ROUTING_ITERS = 3
K1, S1 = 9, 1                # ConvLayer conv
K2, S2 = 9, 2                # PrimaryCaps convs

CONV_OH = (IMG_H - K1) // S1 + 1         # 12
PRIM_OH = (CONV_OH - K2) // S2 + 1       # 2
PRIM_NPIX = PRIM_OH * PRIM_OH            # 4  (PrimaryCaps_n_pix)
P = PRIM_OUT * PRIM_NPIX                 # 32 primary capsule units
NK = NC * CLS_OUT                        # 48 routed lanes (classifier capsule n, out dim o)
IMG_NPIX = IMG_H * IMG_W                 # 400
DEC_OUT = IMG_NPIX * IN_CH               # 800
DEC_OUT_PAD = 896                        # 7 * 128 -> lane-dense final store
EPS = 1e-12


# ------------------------------ Pallas kernels --------------------------------
def _conv_relu_kernel(p_ref, w_ref, b_ref, o_ref):
    # p_ref: (1, OHW, K*K*Cin)   w_ref: (K*K*Cin, Cout)   b_ref: (1, Cout)
    y = jnp.dot(p_ref[0], w_ref[...], preferred_element_type=jnp.float32)
    o_ref[0] = jnp.maximum(y + b_ref[...], 0.0)


def _capsnet_tail_kernel(p2_ref, wm2_ref, pb_ref, wcls_ref,
                         dw1_ref, db1_ref, dw2_ref, db2_ref, dw3_ref, db3_ref,
                         cls_ref, rec_ref):
    """One batch element: PrimaryCaps matmul -> squash -> x_hat -> dynamic routing ->
    capsule activation -> classification reduction -> decoder MLP. All in VMEM/vregs."""
    f32 = jnp.float32

    # ---------------- PrimaryCaps: 4 capsule convs fused into one matmul ----------------
    # y[pix, co*PRIM_N_CAPS + c] == capsule-c conv output channel co at pixel pix
    y = jnp.dot(p2_ref[0], wm2_ref[...], preferred_element_type=f32) + pb_ref[...]   # (4, 32)

    # 0/1 selector: row co keeps only its own PRIM_N_CAPS entries of a y-row.
    # (built with compares, no integer division -> safe vector lowering)
    col_i = lax.broadcasted_iota(jnp.int32, (PRIM_OUT, PRIM_OUT * PRIM_N_CAPS), 1)
    co_i = lax.broadcasted_iota(jnp.int32, (PRIM_OUT, PRIM_OUT * PRIM_N_CAPS), 0)
    lo = co_i * PRIM_N_CAPS
    comask = ((col_i >= lo) & (col_i < lo + PRIM_N_CAPS)).astype(f32)                # (8, 32)

    # x_hat (before the primary squash scale) and primary-capsule squared norms, assembled
    # per output pixel with tiny MXU matmuls -- keeps NK=48 on the lane axis and avoids any
    # lane<->sublane relayout (no in-kernel reshapes/transposes).
    xh_parts, sqn_parts = [], []
    for pix in range(PRIM_NPIX):
        ysel = comask * y[pix:pix + 1, :]                                            # (8, 32)
        xh_parts.append(jnp.dot(ysel, wcls_ref[pix], preferred_element_type=f32))    # (8, 48)
        sqn_parts.append(jnp.sum(ysel * ysel, axis=1, keepdims=True))                # (8, 1)
    xh_raw = jnp.concatenate(xh_parts, axis=0)                                       # (32, 48)
    sqn = jnp.concatenate(sqn_parts, axis=0)                                         # (32, 1)

    # PrimaryCaps squash folded in as a per-unit scale: sqrt(sqn) / (1 + sqn)
    scale = sqn * lax.rsqrt(sqn + EPS) * pl.reciprocal(1.0 + sqn, approx=True)       # (32, 1)
    xh = xh_raw * scale                                                              # (32, 48)

    # grouped-lane helpers: group of CLS_OUT lanes per classifier capsule n.
    k_i = lax.broadcasted_iota(jnp.int32, (NK, NC), 0)
    n_i = lax.broadcasted_iota(jnp.int32, (NK, NC), 1)
    G = ((k_i >= n_i * CLS_OUT) & (k_i < n_i * CLS_OUT + CLS_OUT)).astype(f32)       # (48, 6)
    k_t = lax.broadcasted_iota(jnp.int32, (NC, NK), 1)
    n_t = lax.broadcasted_iota(jnp.int32, (NC, NK), 0)
    GT = ((k_t >= n_t * CLS_OUT) & (k_t < n_t * CLS_OUT + CLS_OUT)).astype(f32)      # (6, 48)

    # ---------------- dynamic routing (3 iterations, all in vregs) ----------------
    # b_ij is constant along the output dim, so it is carried compactly as (P, NC).
    bij = jnp.zeros((P, NC), f32)
    v = jnp.zeros((1, NK), f32)
    for it in range(ROUTING_ITERS):
        bmax = jnp.max(bij, axis=0, keepdims=True)                                   # (1, 6)
        e = jnp.exp(bij - bmax)                                                      # (32, 6)
        c = e * pl.reciprocal(jnp.sum(e, axis=0, keepdims=True), approx=True)        # softmax over P
        c_wide = jnp.dot(c, GT, preferred_element_type=f32)                          # (32, 48)
        s = jnp.sum(c_wide * xh, axis=0, keepdims=True)                              # (1, 48)
        sqn_s = jnp.dot(s * s, G, preferred_element_type=f32)                        # (1, 6)
        scale_s = sqn_s * lax.rsqrt(sqn_s + EPS) * pl.reciprocal(1.0 + sqn_s, approx=True)
        v = jnp.dot(scale_s, GT, preferred_element_type=f32) * s                     # squash -> (1, 48)
        if it < ROUTING_ITERS - 1:
            bij = bij + jnp.dot(xh * v, G, preferred_element_type=f32)               # (32, 6)

    # capsule activation: leaky_relu(v, 0.05) - relu(v - 1) * 0.95
    act = jnp.where(v >= 0.0, v, 0.05 * v) - jnp.maximum(v - 1.0, 0.0) * 0.95        # (1, 48)

    # ---------------- classification head (fused reduction over 24-lane groups) ----------------
    kk = lax.broadcasted_iota(jnp.int32, (NK, NUM_DIMS), 0)
    dd = lax.broadcasted_iota(jnp.int32, (NK, NUM_DIMS), 1)
    dlo = dd * (NUM_CLASSES * CLS_OUT)
    G2 = ((kk >= dlo) & (kk < dlo + NUM_CLASSES * CLS_OUT)).astype(f32)              # (48, 2)
    cls_ref[0] = jnp.dot(act, G2, preferred_element_type=f32)                        # (1, 2)

    # ---------------- decoder MLP (fused; lane-dense padded output) ----------------
    h1 = jnp.maximum(jnp.dot(act, dw1_ref[...], preferred_element_type=f32) + db1_ref[...], 0.0)
    h2 = jnp.maximum(jnp.dot(h1, dw2_ref[...], preferred_element_type=f32) + db2_ref[...], 0.0)
    pre = jnp.dot(h2, dw3_ref[...], preferred_element_type=f32) + db3_ref[...]       # (1, 896)
    rec_ref[0] = pl.reciprocal(1.0 + jnp.exp(-pre))                                  # sigmoid


# --------------------------------- JAX glue ------------------------------------
def im2col_nhwc(x, kh, kw, stride):
    Bn, H, W_, C = x.shape
    oh = (H - kh) // stride + 1
    ow = (W_ - kw) // stride + 1
    cols = []
    for i in range(kh):
        for j in range(kw):
            cols.append(x[:, i:i + stride * oh:stride, j:j + stride * ow:stride, :])
    p = jnp.stack(cols, axis=3)                           # (B, oh, ow, kh*kw, C)
    return p.reshape(Bn, oh, ow, kh * kw * C), oh, ow


def conv_weight_to_mat(w):
    # torch conv weight (Cout, Cin, KH, KW) -> im2col matmul weight (KH*KW*Cin, Cout)
    cout, cin, kh, kw = w.shape
    return jnp.transpose(w, (2, 3, 1, 0)).reshape(kh * kw * cin, cout)


def capsule_network_forward(x_nchw, params):
    Bn = x_nchw.shape[0]
    f32 = jnp.float32
    x = jnp.transpose(x_nchw, (0, 2, 3, 1))               # NCHW -> NHWC

    # ---- kernel 1: ConvLayer conv(k=9, s=1) + ReLU (im2col + Pallas matmul) ----
    patches1, oh1, ow1 = im2col_nhwc(x, K1, K1, S1)
    p1 = patches1.reshape(Bn, oh1 * ow1, K1 * K1 * IN_CH)  # (B, 144, 162)
    w1 = conv_weight_to_mat(params["conv_w"])              # (162, 16)
    b1 = params["conv_b"].reshape(1, ENC_OUT)
    feat = pl.pallas_call(
        _conv_relu_kernel,
        out_shape=jax.ShapeDtypeStruct((Bn, oh1 * ow1, ENC_OUT), f32),
        grid=(Bn,),
        in_specs=[
            pl.BlockSpec((1, oh1 * ow1, K1 * K1 * IN_CH), lambda b: (b, 0, 0)),
            pl.BlockSpec((K1 * K1 * IN_CH, ENC_OUT), lambda b: (0, 0)),
            pl.BlockSpec((1, ENC_OUT), lambda b: (0, 0)),
        ],
        out_specs=pl.BlockSpec((1, oh1 * ow1, ENC_OUT), lambda b: (b, 0, 0)),
        compiler_params=pltpu.CompilerParams(dimension_semantics=("parallel",)),
    )(p1, w1, b1)

    # im2col for the stride-2 PrimaryCaps convs (pure XLA layout work, tiny here).
    # TODO(synk): at production image sizes fold this im2col into the kernel via overlapping
    #             BlockSpec windows to avoid the K^2 HBM inflation.
    feat4 = feat.reshape(Bn, oh1, ow1, ENC_OUT)
    patches2, oh2, ow2 = im2col_nhwc(feat4, K2, K2, S2)
    p2 = patches2.reshape(Bn, oh2 * ow2, K2 * K2 * ENC_OUT)   # (B, 4, 1296)

    # ---- parameter repacking (wrapper-side layout only, no math) ----
    # PrimaryCaps: 4 capsule convs as one matmul, columns ordered co*PRIM_N_CAPS + c.
    wm2 = jnp.stack([conv_weight_to_mat(params["prim_w"][c]) for c in range(PRIM_N_CAPS)], axis=0)
    wm2 = jnp.transpose(wm2, (1, 2, 0)).reshape(K2 * K2 * ENC_OUT, PRIM_OUT * PRIM_N_CAPS)
    pb = jnp.transpose(params["prim_b"]).reshape(1, PRIM_OUT * PRIM_N_CAPS)

    # Classifier W packed as (pix, co*PRIM_N_CAPS + c, n*CLS_OUT + o): torch p = co*n_pix + pix.
    W5 = params["cls_W"].reshape(NC, PRIM_OUT, PRIM_NPIX, PRIM_N_CAPS, CLS_OUT)
    wcls = jnp.transpose(W5, (2, 1, 3, 0, 4)).reshape(PRIM_NPIX, PRIM_OUT * PRIM_N_CAPS, NK)

    # Decoder weights; last layer padded 800 -> 896 (7*128) for unmasked lane-dense stores.
    db1 = params["dec_b1"].reshape(1, DEC_HID)
    db2 = params["dec_b2"].reshape(1, DEC_HID * 2)
    dw3p = jnp.pad(params["dec_w3"], ((0, 0), (0, DEC_OUT_PAD - DEC_OUT)))
    db3p = jnp.pad(params["dec_b3"], (0, DEC_OUT_PAD - DEC_OUT)).reshape(1, DEC_OUT_PAD)

    # ---- kernel 2: fully fused post-conv pipeline (routing + head + decoder) ----
    cls3, rec3 = pl.pallas_call(
        _capsnet_tail_kernel,
        out_shape=(jax.ShapeDtypeStruct((Bn, 1, NUM_DIMS), f32),
                   jax.ShapeDtypeStruct((Bn, 1, DEC_OUT_PAD), f32)),
        grid=(Bn,),
        in_specs=[
            pl.BlockSpec((1, PRIM_NPIX, K2 * K2 * ENC_OUT), lambda b: (b, 0, 0)),
            pl.BlockSpec((K2 * K2 * ENC_OUT, PRIM_OUT * PRIM_N_CAPS), lambda b: (0, 0)),
            pl.BlockSpec((1, PRIM_OUT * PRIM_N_CAPS), lambda b: (0, 0)),
            pl.BlockSpec((PRIM_NPIX, PRIM_OUT * PRIM_N_CAPS, NK), lambda b: (0, 0, 0)),
            pl.BlockSpec((NK, DEC_HID), lambda b: (0, 0)),
            pl.BlockSpec((1, DEC_HID), lambda b: (0, 0)),
            pl.BlockSpec((DEC_HID, DEC_HID * 2), lambda b: (0, 0)),
            pl.BlockSpec((1, DEC_HID * 2), lambda b: (0, 0)),
            pl.BlockSpec((DEC_HID * 2, DEC_OUT_PAD), lambda b: (0, 0)),
            pl.BlockSpec((1, DEC_OUT_PAD), lambda b: (0, 0)),
        ],
        out_specs=(pl.BlockSpec((1, 1, NUM_DIMS), lambda b: (b, 0, 0)),
                   pl.BlockSpec((1, 1, DEC_OUT_PAD), lambda b: (b, 0, 0))),
        compiler_params=pltpu.CompilerParams(dimension_semantics=("parallel",)),
    )(p2, wm2, pb, wcls, params["dec_w1"], db1, params["dec_w2"], db2, dw3p, db3p)

    classification = cls3.reshape(Bn, NUM_DIMS)                       # (B, num_dims)
    reconstructed = rec3.reshape(Bn, DEC_OUT_PAD)[:, :DEC_OUT].reshape(Bn, IN_CH, IMG_NPIX)
    return classification, reconstructed


def init_params(key):
    ks = jax.random.split(key, 12)
    n = jax.random.normal
    return {
        # ConvLayer
        "conv_w": 0.1 * n(ks[0], (ENC_OUT, IN_CH, K1, K1), jnp.float32),
        "conv_b": 0.1 * n(ks[1], (ENC_OUT,), jnp.float32),
        # PrimaryCaps (one conv per capsule)
        "prim_w": 0.05 * n(ks[2], (PRIM_N_CAPS, PRIM_OUT, ENC_OUT, K2, K2), jnp.float32),
        "prim_b": 0.05 * n(ks[3], (PRIM_N_CAPS, PRIM_OUT), jnp.float32),
        # ClassifierCaps W ~ torch.randn(num_classes*num_dims, P, Cin, Cout)
        "cls_W": n(ks[4], (NC, P, PRIM_N_CAPS, CLS_OUT), jnp.float32),
        # Decoder (stored already transposed: (in, out))
        "dec_w1": 0.1 * n(ks[5], (NC * CLS_OUT, DEC_HID), jnp.float32),
        "dec_b1": 0.1 * n(ks[6], (DEC_HID,), jnp.float32),
        "dec_w2": 0.1 * n(ks[7], (DEC_HID, DEC_HID * 2), jnp.float32),
        "dec_b2": 0.1 * n(ks[8], (DEC_HID * 2,), jnp.float32),
        "dec_w3": 0.1 * n(ks[9], (DEC_HID * 2, DEC_OUT), jnp.float32),
        "dec_b3": 0.1 * n(ks[10], (DEC_OUT,), jnp.float32),
    }


if __name__ == "__main__":
    key = jax.random.PRNGKey(0)
    k_x, k_p = jax.random.split(key)
    x = jax.random.normal(k_x, (B, IN_CH, IMG_H, IMG_W), jnp.float32)   # NCHW input
    params = init_params(k_p)

    fwd = jax.jit(capsule_network_forward)
    classification, reconstructed = fwd(x, params)
    jax.block_until_ready((classification, reconstructed))

    assert classification.shape == (B, NUM_DIMS)
    assert reconstructed.shape == (B, IN_CH, IMG_NPIX)
    assert bool(jnp.all(jnp.isfinite(classification)))
    assert bool(jnp.all(jnp.isfinite(reconstructed)))
    print("KERNEL_OK")
</pallas_src>

<mosaic_0001>
module attributes {stable_mosaic.version = 11 : i64} {
  func.func @_conv_relu_kernel(%arg0: i32, %arg1: memref<1x144x162xf32, #tpu.memory_space<vmem>>, %arg2: memref<162x16xf32, #tpu.memory_space<vmem>>, %arg3: memref<1x16xf32, #tpu.memory_space<vmem>>, %arg4: memref<1x144x16xf32, #tpu.memory_space<vmem>>) attributes {dimension_semantics = [#tpu.dimension_semantics<parallel>], iteration_bounds = array<i64: 2>, scalar_prefetch = 0 : i64, scratch_operands = 0 : i64, tpu.core_type = #tpu.core_type<tc>, window_params = [{transform_indices = @transform_0, window_bounds = array<i64: 1, 144, 162>}, {pipeline_mode = #tpu.pipeline_mode<synchronous>, transform_indices = @transform_1, window_bounds = array<i64: 162, 16>}, {pipeline_mode = #tpu.pipeline_mode<synchronous>, transform_indices = @transform_2, window_bounds = array<i64: 1, 16>}, {transform_indices = @transform_3, window_bounds = array<i64: 1, 144, 16>}]} {
    %c0 = arith.constant 0 : index
    %c0_0 = arith.constant 0 : index
    %c0_1 = arith.constant 0 : index
    %0 = vector.load %arg1[%c0, %c0_0, %c0_1] : memref<1x144x162xf32, #tpu.memory_space<vmem>>, vector<1x144x162xf32>
    %1 = vector.shape_cast %0 : vector<1x144x162xf32> to vector<144x162xf32>
    %c0_2 = arith.constant 0 : index
    %c0_3 = arith.constant 0 : index
    %2 = vector.load %arg2[%c0_2, %c0_3] : memref<162x16xf32, #tpu.memory_space<vmem>>, vector<162x16xf32>
    %cst = arith.constant dense<0.000000e+00> : vector<144x16xf32>
    %3 = tpu.matmul %1, %2, %cst {dimension_numbers = #tpu.dot_dimension_numbers<[1], [0], [0], [1], [0, 0, 1, 1], [], []>} : vector<144x162xf32>, vector<162x16xf32>, vector<144x16xf32> -> vector<144x16xf32>
    %c0_4 = arith.constant 0 : index
    %c0_5 = arith.constant 0 : index
    %4 = vector.load %arg3[%c0_4, %c0_5] : memref<1x16xf32, #tpu.memory_space<vmem>>, vector<1x16xf32>
    %5 = vector.broadcast %4 : vector<1x16xf32> to vector<144x16xf32>
    %6 = arith.addf %3, %5 : vector<144x16xf32>
    %cst_6 = arith.constant 0.000000e+00 : f32
    %7 = vector.broadcast %cst_6 : f32 to vector<144x16xf32>
    %8 = arith.maximumf %6, %7 : vector<144x16xf32>
    %c0_7 = arith.constant 0 : index
    %c0_8 = arith.constant 0 : index
    %c0_9 = arith.constant 0 : index
    %9 = vector.load %arg4[%c0_7, %c0_8, %c0_9] : memref<1x144x16xf32, #tpu.memory_space<vmem>>, vector<1x144x16xf32>
    %10 = vector.shape_cast %9 : vector<1x144x16xf32> to vector<144x16xf32>
    %11 = vector.shape_cast %8 : vector<144x16xf32> to vector<1x144x16xf32>
    tpu.vector_store %arg4[%c0_7, %c0_8, %c0_9], %11 {strides = array<i32>} : memref<1x144x16xf32, #tpu.memory_space<vmem>>, vector<1x144x16xf32>,
    return
  }
  func.func @transform_0(%arg0: i32) -> (i32, i32, i32) {
    %c0_i32 = arith.constant 0 : i32
    %c0_i32_0 = arith.constant 0 : i32
    %c0_i32_1 = arith.constant 0 : i32
    return %arg0, %c0_i32, %c0_i32_0 : i32, i32, i32
  }
  func.func @transform_1(%arg0: i32) -> (i32, i32) {
    %c0_i32 = arith.constant 0 : i32
    %c0_i32_0 = arith.constant 0 : i32
    %c0_i32_1 = arith.constant 0 : i32
    return %c0_i32, %c0_i32_0 : i32, i32
  }
  func.func @transform_2(%arg0: i32) -> (i32, i32) {
    %c0_i32 = arith.constant 0 : i32
    %c0_i32_0 = arith.constant 0 : i32
    %c0_i32_1 = arith.constant 0 : i32
    return %c0_i32, %c0_i32_0 : i32, i32
  }
  func.func @transform_3(%arg0: i32) -> (i32, i32, i32) {
    %c0_i32 = arith.constant 0 : i32
    %c0_i32_0 = arith.constant 0 : i32
    %c0_i32_1 = arith.constant 0 : i32
    return %arg0, %c0_i32, %c0_i32_0 : i32, i32, i32
  }
}

module attributes {stable_mosaic.version = 11 : i64} {
  func.func @_capsnet_tail_kernel(%arg0: i32, %arg1: memref<1x4x1296xf32, #tpu.memory_space<vmem>>, %arg2: memref<1296x32xf32, #tpu.memory_space<vmem>>, %arg3: memref<1x32xf32, #tpu.memory_space<vmem>>, %arg4: memref<4x32x48xf32, #tpu.memory_space<vmem>>, %arg5: memref<48x32xf32, #tpu.memory_space<vmem>>, %arg6: memref<1x32xf32, #tpu.memory_space<vmem>>, %arg7: memref<32x64xf32, #tpu.memory_space<vmem>>, %arg8: memref<1x64xf32, #tpu.memory_space<vmem>>, %arg9: memref<64x896xf32, #tpu.memory_space<vmem>>, %arg10: memref<1x896xf32, #tpu.memory_space<vmem>>, %arg11: memref<1x1x2xf32, #tpu.memory_space<vmem>>, %arg12: memref<1x1x896xf32, #tpu.memory_space<vmem>>) attributes {dimension_semantics = [#tpu.dimension_semantics<parallel>], iteration_bounds = array<i64: 2>, scalar_prefetch = 0 : i64, scratch_operands = 0 : i64, tpu.core_type = #tpu.core_type<tc>, window_params = [{transform_indices = @transform_0, window_bounds = array<i64: 1, 4, 1296>}, {pipeline_mode = #tpu.pipeline_mode<synchronous>, transform_indices = @transform_1, window_bounds = array<i64: 1296, 32>}, {pipeline_mode = #tpu.pipeline_mode<synchronous>, transform_indices = @transform_2, window_bounds = array<i64: 1, 32>}, {pipeline_mode = #tpu.pipeline_mode<synchronous>, transform_indices = @transform_3, window_bounds = array<i64: 4, 32, 48>}, {pipeline_mode = #tpu.pipeline_mode<synchronous>, transform_indices = @transform_4, window_bounds = array<i64: 48, 32>}, {pipeline_mode = #tpu.pipeline_mode<synchronous>, transform_indices = @transform_5, window_bounds = array<i64: 1, 32>}, {pipeline_mode = #tpu.pipeline_mode<synchronous>, transform_indices = @transform_6, window_bounds = array<i64: 32, 64>}, {pipeline_mode = #tpu.pipeline_mode<synchronous>, transform_indices = @transform_7, window_bounds = array<i64: 1, 64>}, {pipeline_mode = #tpu.pipeline_mode<synchronous>, transform_indices = @transform_8, window_bounds = array<i64: 64, 896>}, {pipeline_mode = #tpu.pipeline_mode<synchronous>, transform_indices = @transform_9, window_bounds = array<i64: 1, 896>}, {transform_indices = @transform_10, window_bounds = array<i64: 1, 1, 2>}, {transform_indices = @transform_11, window_bounds = array<i64: 1, 1, 896>}]} {
    %c0 = arith.constant 0 : index
    %c0_0 = arith.constant 0 : index
    %c0_1 = arith.constant 0 : index
    %0 = vector.load %arg1[%c0, %c0_0, %c0_1] : memref<1x4x1296xf32, #tpu.memory_space<vmem>>, vector<1x4x1296xf32>
    %1 = vector.shape_cast %0 : vector<1x4x1296xf32> to vector<4x1296xf32>
    %c0_2 = arith.constant 0 : index
    %c0_3 = arith.constant 0 : index
    %2 = vector.load %arg2[%c0_2, %c0_3] : memref<1296x32xf32, #tpu.memory_space<vmem>>, vector<1296x32xf32>
    %cst = arith.constant dense<0.000000e+00> : vector<4x32xf32>
    %3 = tpu.matmul %1, %2, %cst {dimension_numbers = #tpu.dot_dimension_numbers<[1], [0], [0], [1], [0, 0, 1, 1], [], []>} : vector<4x1296xf32>, vector<1296x32xf32>, vector<4x32xf32> -> vector<4x32xf32>
    %c0_4 = arith.constant 0 : index
    %c0_5 = arith.constant 0 : index
    %4 = vector.load %arg3[%c0_4, %c0_5] : memref<1x32xf32, #tpu.memory_space<vmem>>, vector<1x32xf32>
    %5 = vector.broadcast %4 : vector<1x32xf32> to vector<4x32xf32>
    %6 = arith.addf %3, %5 : vector<4x32xf32>
    %7 = tpu.iota {dimensions = array<i32: 1>} : vector<8x32xi32>
    %8 = tpu.iota {dimensions = array<i32: 0>} : vector<8x32xi32>
    %c4_i32 = arith.constant 4 : i32
    %9 = vector.broadcast %c4_i32 : i32 to vector<8x32xi32>
    %10 = arith.muli %8, %9 : vector<8x32xi32>
    %11 = arith.cmpi sge, %7, %10 : vector<8x32xi32>
    %c4_i32_6 = arith.constant 4 : i32
    %12 = vector.broadcast %c4_i32_6 : i32 to vector<8x32xi32>
    %13 = arith.addi %10, %12 : vector<8x32xi32>
    %14 = arith.cmpi slt, %7, %13 : vector<8x32xi32>
    %15 = arith.andi %11, %14 : vector<8x32xi1>
    %16 = arith.extui %15 : vector<8x32xi1> to vector<8x32xi32>
    %17 = arith.sitofp %16 : vector<8x32xi32> to vector<8x32xf32>
    %18 = vector.extract_strided_slice %6 {offsets = [0, 0], sizes = [1, 32], strides = [1, 1]} : vector<4x32xf32> to vector<1x32xf32>
    %19 = vector.broadcast %18 : vector<1x32xf32> to vector<8x32xf32>
    %20 = arith.mulf %17, %19 : vector<8x32xf32>
    %c0_7 = arith.constant 0 : index
    %c0_8 = arith.constant 0 : index
    %c0_9 = arith.constant 0 : index
    %21 = vector.load %arg4[%c0_7, %c0_8, %c0_9] : memref<4x32x48xf32, #tpu.memory_space<vmem>>, vector<1x32x48xf32>
    %22 = vector.shape_cast %21 : vector<1x32x48xf32> to vector<32x48xf32>
    %cst_10 = arith.constant dense<0.000000e+00> : vector<8x48xf32>
    %23 = tpu.matmul %20, %22, %cst_10 {dimension_numbers = #tpu.dot_dimension_numbers<[1], [0], [0], [1], [0, 0, 1, 1], [], []>} : vector<8x32xf32>, vector<32x48xf32>, vector<8x48xf32> -> vector<8x48xf32>
    %24 = arith.mulf %20, %20 : vector<8x32xf32>
    %cst_11 = arith.constant dense<0.000000e+00> : vector<8xf32>
    %25 = vector.multi_reduction <add>, %24, %cst_11 [1] : vector<8x32xf32> to vector<8xf32>
    %26 = vector.shape_cast %25 : vector<8xf32> to vector<8x1xf32>
    %27 = vector.extract_strided_slice %6 {offsets = [1, 0], sizes = [1, 32], strides = [1, 1]} : vector<4x32xf32> to vector<1x32xf32>
    %28 = vector.broadcast %27 : vector<1x32xf32> to vector<8x32xf32>
    %29 = arith.mulf %17, %28 : vector<8x32xf32>
    %c1 = arith.constant 1 : index
    %c0_12 = arith.constant 0 : index
    %c0_13 = arith.constant 0 : index
    %30 = vector.load %arg4[%c1, %c0_12, %c0_13] : memref<4x32x48xf32, #tpu.memory_space<vmem>>, vector<1x32x48xf32>
    %31 = vector.shape_cast %30 : vector<1x32x48xf32> to vector<32x48xf32>
    %cst_14 = arith.constant dense<0.000000e+00> : vector<8x48xf32>
    %32 = tpu.matmul %29, %31, %cst_14 {dimension_numbers = #tpu.dot_dimension_numbers<[1], [0], [0], [1], [0, 0, 1, 1], [], []>} : vector<8x32xf32>, vector<32x48xf32>, vector<8x48xf32> -> vector<8x48xf32>
    %33 = arith.mulf %29, %29 : vector<8x32xf32>
    %cst_15 = arith.constant dense<0.000000e+00> : vector<8xf32>
    %34 = vector.multi_reduction <add>, %33, %cst_15 [1] : vector<8x32xf32> to vector<8xf32>
    %35 = vector.shape_cast %34 : vector<8xf32> to vector<8x1xf32>
    %36 = vector.extract_strided_slice %6 {offsets = [2, 0], sizes = [1, 32], strides = [1, 1]} : vector<4x32xf32> to vector<1x32xf32>
    %37 = vector.broadcast %36 : vector<1x32xf32> to vector<8x32xf32>
    %38 = arith.mulf %17, %37 : vector<8x32xf32>
    %c2 = arith.constant 2 : index
    %c0_16 = arith.constant 0 : index
    %c0_17 = arith.constant 0 : index
    %39 = vector.load %arg4[%c2, %c0_16, %c0_17] : memref<4x32x48xf32, #tpu.memory_space<vmem>>, vector<1x32x48xf32>
    %40 = vector.shape_cast %39 : vector<1x32x48xf32> to vector<32x48xf32>
    %cst_18 = arith.constant dense<0.000000e+00> : vector<8x48xf32>
    %41 = tpu.matmul %38, %40, %cst_18 {dimension_numbers = #tpu.dot_dimension_numbers<[1], [0], [0], [1], [0, 0, 1, 1], [], []>} : vector<8x32xf32>, vector<32x48xf32>, vector<8x48xf32> -> vector<8x48xf32>
    %42 = arith.mulf %38, %38 : vector<8x32xf32>
    %cst_19 = arith.constant dense<0.000000e+00> : vector<8xf32>
    %43 = vector.multi_reduction <add>, %42, %cst_19 [1] : vector<8x32xf32> to vector<8xf32>
    %44 = vector.shape_cast %43 : vector<8xf32> to vector<8x1xf32>
    %45 = vector.extract_strided_slice %6 {offsets = [3, 0], sizes = [1, 32], strides = [1, 1]} : vector<4x32xf32> to vector<1x32xf32>
    %46 = vector.broadcast %45 : vector<1x32xf32> to vector<8x32xf32>
    %47 = arith.mulf %17, %46 : vector<8x32xf32>
    %c3 = arith.constant 3 : index
    %c0_20 = arith.constant 0 : index
    %c0_21 = arith.constant 0 : index
    %48 = vector.load %arg4[%c3, %c0_20, %c0_21] : memref<4x32x48xf32, #tpu.memory_space<vmem>>, vector<1x32x48xf32>
    %49 = vector.shape_cast %48 : vector<1x32x48xf32> to vector<32x48xf32>
    %cst_22 = arith.constant dense<0.000000e+00> : vector<8x48xf32>
    %50 = tpu.matmul %47, %49, %cst_22 {dimension_numbers = #tpu.dot_dimension_numbers<[1], [0], [0], [1], [0, 0, 1, 1], [], []>} : vector<8x32xf32>, vector<32x48xf32>, vector<8x48xf32> -> vector<8x48xf32>
    %51 = arith.mulf %47, %47 : vector<8x32xf32>
    %cst_23 = arith.constant dense<0.000000e+00> : vector<8xf32>
    %52 = vector.multi_reduction <add>, %51, %cst_23 [1] : vector<8x32xf32> to vector<8xf32>
    %53 = vector.shape_cast %52 : vector<8xf32> to vector<8x1xf32>
    %54 = tpu.concatenate %23, %32, %41, %50 in 0 : vector<8x48xf32>, vector<8x48xf32>, vector<8x48xf32>, vector<8x48xf32> -> vector<32x48xf32>
    %55 = tpu.concatenate %26, %35, %44, %53 in 0 : vector<8x1xf32>, vector<8x1xf32>, vector<8x1xf32>, vector<8x1xf32> -> vector<32x1xf32>
    %cst_24 = arith.constant 9.99999996E-13 : f32
    %56 = vector.broadcast %cst_24 : f32 to vector<32x1xf32>
    %57 = arith.addf %55, %56 : vector<32x1xf32>
    %58 = math.rsqrt %57 : vector<32x1xf32>
    %59 = arith.mulf %55, %58 : vector<32x1xf32>
    %cst_25 = arith.constant 1.000000e+00 : f32
    %60 = vector.broadcast %cst_25 : f32 to vector<32x1xf32>
    %61 = arith.addf %60, %55 : vector<32x1xf32>
    %62 = tpu.reciprocal %61 {approx = true} : vector<32x1xf32> -> vector<32x1xf32>
    %63 = arith.mulf %59, %62 : vector<32x1xf32>
    %64 = vector.broadcast %63 : vector<32x1xf32> to vector<32x48xf32>
    %65 = arith.mulf %54, %64 : vector<32x48xf32>
    %66 = tpu.iota {dimensions = array<i32: 0>} : vector<48x6xi32>
    %67 = tpu.iota {dimensions = array<i32: 1>} : vector<48x6xi32>
    %c8_i32 = arith.constant 8 : i32
    %68 = vector.broadcast %c8_i32 : i32 to vector<48x6xi32>
    %69 = arith.muli %67, %68 : vector<48x6xi32>
    %70 = arith.cmpi sge, %66, %69 : vector<48x6xi32>
    %c8_i32_26 = arith.constant 8 : i32
    %71 = vector.broadcast %c8_i32_26 : i32 to vector<48x6xi32>
    %72 = arith.muli %67, %71 : vector<48x6xi32>
    %c8_i32_27 = arith.constant 8 : i32
    %73 = vector.broadcast %c8_i32_27 : i32 to vector<48x6xi32>
    %74 = arith.addi %72, %73 : vector<48x6xi32>
    %75 = arith.cmpi slt, %66, %74 : vector<48x6xi32>
    %76 = arith.andi %70, %75 : vector<48x6xi1>
    %77 = arith.extui %76 : vector<48x6xi1> to vector<48x6xi32>
    %78 = arith.sitofp %77 : vector<48x6xi32> to vector<48x6xf32>
    %79 = tpu.iota {dimensions = array<i32: 1>} : vector<6x48xi32>
    %80 = tpu.iota {dimensions = array<i32: 0>} : vector<6x48xi32>
    %c8_i32_28 = arith.constant 8 : i32
    %81 = vector.broadcast %c8_i32_28 : i32 to vector<6x48xi32>
    %82 = arith.muli %80, %81 : vector<6x48xi32>
    %83 = arith.cmpi sge, %79, %82 : vector<6x48xi32>
    %c8_i32_29 = arith.constant 8 : i32
    %84 = vector.broadcast %c8_i32_29 : i32 to vector<6x48xi32>
    %85 = arith.muli %80, %84 : vector<6x48xi32>
    %c8_i32_30 = arith.constant 8 : i32
    %86 = vector.broadcast %c8_i32_30 : i32 to vector<6x48xi32>
    %87 = arith.addi %85, %86 : vector<6x48xi32>
    %88 = arith.cmpi slt, %79, %87 : vector<6x48xi32>
    %89 = arith.andi %83, %88 : vector<6x48xi1>
    %90 = arith.extui %89 : vector<6x48xi1> to vector<6x48xi32>
    %91 = arith.sitofp %90 : vector<6x48xi32> to vector<6x48xf32>
    %cst_31 = arith.constant 0.000000e+00 : f32
    %92 = vector.broadcast %cst_31 : f32 to vector<32x6xf32>
    %cst_32 = arith.constant dense<0xFF800000> : vector<6xf32>
    %93 = vector.multi_reduction <maximumf>, %92, %cst_32 [0] : vector<32x6xf32> to vector<6xf32>
    %94 = vector.shape_cast %93 : vector<6xf32> to vector<1x6xf32>
    %95 = vector.broadcast %94 : vector<1x6xf32> to vector<32x6xf32>
    %96 = arith.subf %92, %95 : vector<32x6xf32>
    %97 = math.exp %96 : vector<32x6xf32>
    %cst_33 = arith.constant dense<0.000000e+00> : vector<6xf32>
    %98 = vector.multi_reduction <add>, %97, %cst_33 [0] : vector<32x6xf32> to vector<6xf32>
    %99 = vector.shape_cast %98 : vector<6xf32> to vector<1x6xf32>
    %100 = tpu.reciprocal %99 {approx = true} : vector<1x6xf32> -> vector<1x6xf32>
    %101 = vector.broadcast %100 : vector<1x6xf32> to vector<32x6xf32>
    %102 = arith.mulf %97, %101 : vector<32x6xf32>
    %cst_34 = arith.constant dense<0.000000e+00> : vector<32x48xf32>
    %103 = tpu.matmul %102, %91, %cst_34 {dimension_numbers = #tpu.dot_dimension_numbers<[1], [0], [0], [1], [0, 0, 1, 1], [], []>} : vector<32x6xf32>, vector<6x48xf32>, vector<32x48xf32> -> vector<32x48xf32>
    %104 = arith.mulf %103, %65 : vector<32x48xf32>
    %cst_35 = arith.constant dense<0.000000e+00> : vector<48xf32>
    %105 = vector.multi_reduction <add>, %104, %cst_35 [0] : vector<32x48xf32> to vector<48xf32>
    %106 = vector.shape_cast %105 : vector<48xf32> to vector<1x48xf32>
    %107 = arith.mulf %106, %106 : vector<1x48xf32>
    %cst_36 = arith.constant dense<0.000000e+00> : vector<1x6xf32>
    %108 = tpu.matmul %107, %78, %cst_36 {dimension_numbers = #tpu.dot_dimension_numbers<[1], [0], [0], [1], [0, 0, 1, 1], [], []>} : vector<1x48xf32>, vector<48x6xf32>, vector<1x6xf32> -> vector<1x6xf32>
    %cst_37 = arith.constant 9.99999996E-13 : f32
    %109 = vector.broadcast %cst_37 : f32 to vector<1x6xf32>
    %110 = arith.addf %108, %109 : vector<1x6xf32>
    %111 = math.rsqrt %110 : vector<1x6xf32>
    %112 = arith.mulf %108, %111 : vector<1x6xf32>
    %cst_38 = arith.constant 1.000000e+00 : f32
    %113 = vector.broadcast %cst_38 : f32 to vector<1x6xf32>
    %114 = arith.addf %113, %108 : vector<1x6xf32>
    %115 = tpu.reciprocal %114 {approx = true} : vector<1x6xf32> -> vector<1x6xf32>
    %116 = arith.mulf %112, %115 : vector<1x6xf32>
    %cst_39 = arith.constant dense<0.000000e+00> : vector<1x48xf32>
    %117 = tpu.matmul %116, %91, %cst_39 {dimension_numbers = #tpu.dot_dimension_numbers<[1], [0], [0], [1], [0, 0, 1, 1], [], []>} : vector<1x6xf32>, vector<6x48xf32>, vector<1x48xf32> -> vector<1x48xf32>
    %118 = arith.mulf %117, %106 : vector<1x48xf32>
    %119 = vector.broadcast %118 : vector<1x48xf32> to vector<32x48xf32>
    %120 = arith.mulf %65, %119 : vector<32x48xf32>
    %cst_40 = arith.constant dense<0.000000e+00> : vector<32x6xf32>
    %121 = tpu.matmul %120, %78, %cst_40 {dimension_numbers = #tpu.dot_dimension_numbers<[1], [0], [0], [1], [0, 0, 1, 1], [], []>} : vector<32x48xf32>, vector<48x6xf32>, vector<32x6xf32> -> vector<32x6xf32>
    %122 = arith.addf %92, %121 : vector<32x6xf32>
    %cst_41 = arith.constant dense<0xFF800000> : vector<6xf32>
    %123 = vector.multi_reduction <maximumf>, %122, %cst_41 [0] : vector<32x6xf32> to vector<6xf32>
    %124 = vector.shape_cast %123 : vector<6xf32> to vector<1x6xf32>
    %125 = vector.broadcast %124 : vector<1x6xf32> to vector<32x6xf32>
    %126 = arith.subf %122, %125 : vector<32x6xf32>
    %127 = math.exp %126 : vector<32x6xf32>
    %cst_42 = arith.constant dense<0.000000e+00> : vector<6xf32>
    %128 = vector.multi_reduction <add>, %127, %cst_42 [0] : vector<32x6xf32> to vector<6xf32>
    %129 = vector.shape_cast %128 : vector<6xf32> to vector<1x6xf32>
    %130 = tpu.reciprocal %129 {approx = true} : vector<1x6xf32> -> vector<1x6xf32>
    %131 = vector.broadcast %130 : vector<1x6xf32> to vector<32x6xf32>
    %132 = arith.mulf %127, %131 : vector<32x6xf32>
    %cst_43 = arith.constant dense<0.000000e+00> : vector<32x48xf32>
    %133 = tpu.matmul %132, %91, %cst_43 {dimension_numbers = #tpu.dot_dimension_numbers<[1], [0], [0], [1], [0, 0, 1, 1], [], []>} : vector<32x6xf32>, vector<6x48xf32>, vector<32x48xf32> -> vector<32x48xf32>
    %134 = arith.mulf %133, %65 : vector<32x48xf32>
    %cst_44 = arith.constant dense<0.000000e+00> : vector<48xf32>
    %135 = vector.multi_reduction <add>, %134, %cst_44 [0] : vector<32x48xf32> to vector<48xf32>
    %136 = vector.shape_cast %135 : vector<48xf32> to vector<1x48xf32>
    %137 = arith.mulf %136, %136 : vector<1x48xf32>
    %cst_45 = arith.constant dense<0.000000e+00> : vector<1x6xf32>
    %138 = tpu.matmul %137, %78, %cst_45 {dimension_numbers = #tpu.dot_dimension_numbers<[1], [0], [0], [1], [0, 0, 1, 1], [], []>} : vector<1x48xf32>, vector<48x6xf32>, vector<1x6xf32> -> vector<1x6xf32>
    %cst_46 = arith.constant 9.99999996E-13 : f32
    %139 = vector.broadcast %cst_46 : f32 to vector<1x6xf32>
    %140 = arith.addf %138, %139 : vector<1x6xf32>
    %141 = math.rsqrt %140 : vector<1x6xf32>
    %142 = arith.mulf %138, %141 : vector<1x6xf32>
    %cst_47 = arith.constant 1.000000e+00 : f32
    %143 = vector.broadcast %cst_47 : f32 to vector<1x6xf32>
    %144 = arith.addf %143, %138 : vector<1x6xf32>
    %145 = tpu.reciprocal %144 {approx = true} : vector<1x6xf32> -> vector<1x6xf32>
    %146 = arith.mulf %142, %145 : vector<1x6xf32>
    %cst_48 = arith.constant dense<0.000000e+00> : vector<1x48xf32>
    %147 = tpu.matmul %146, %91, %cst_48 {dimension_numbers = #tpu.dot_dimension_numbers<[1], [0], [0], [1], [0, 0, 1, 1], [], []>} : vector<1x6xf32>, vector<6x48xf32>, vector<1x48xf32> -> vector<1x48xf32>
    %148 = arith.mulf %147, %136 : vector<1x48xf32>
    %149 = vector.broadcast %148 : vector<1x48xf32> to vector<32x48xf32>
    %150 = arith.mulf %65, %149 : vector<32x48xf32>
    %cst_49 = arith.constant dense<0.000000e+00> : vector<32x6xf32>
    %151 = tpu.matmul %150, %78, %cst_49 {dimension_numbers = #tpu.dot_dimension_numbers<[1], [0], [0], [1], [0, 0, 1, 1], [], []>} : vector<32x48xf32>, vector<48x6xf32>, vector<32x6xf32> -> vector<32x6xf32>
    %152 = arith.addf %122, %151 : vector<32x6xf32>
    %cst_50 = arith.constant dense<0xFF800000> : vector<6xf32>
    %153 = vector.multi_reduction <maximumf>, %152, %cst_50 [0] : vector<32x6xf32> to vector<6xf32>
    %154 = vector.shape_cast %153 : vector<6xf32> to vector<1x6xf32>
    %155 = vector.broadcast %154 : vector<1x6xf32> to vector<32x6xf32>
    %156 = arith.subf %152, %155 : vector<32x6xf32>
    %157 = math.exp %156 : vector<32x6xf32>
    %cst_51 = arith.constant dense<0.000000e+00> : vector<6xf32>
    %158 = vector.multi_reduction <add>, %157, %cst_51 [0] : vector<32x6xf32> to vector<6xf32>
    %159 = vector.shape_cast %158 : vector<6xf32> to vector<1x6xf32>
    %160 = tpu.reciprocal %159 {approx = true} : vector<1x6xf32> -> vector<1x6xf32>
    %161 = vector.broadcast %160 : vector<1x6xf32> to vector<32x6xf32>
    %162 = arith.mulf %157, %161 : vector<32x6xf32>
    %cst_52 = arith.constant dense<0.000000e+00> : vector<32x48xf32>
    %163 = tpu.matmul %162, %91, %cst_52 {dimension_numbers = #tpu.dot_dimension_numbers<[1], [0], [0], [1], [0, 0, 1, 1], [], []>} : vector<32x6xf32>, vector<6x48xf32>, vector<32x48xf32> -> vector<32x48xf32>
    %164 = arith.mulf %163, %65 : vector<32x48xf32>
    %cst_53 = arith.constant dense<0.000000e+00> : vector<48xf32>
    %165 = vector.multi_reduction <add>, %164, %cst_53 [0] : vector<32x48xf32> to vector<48xf32>
    %166 = vector.shape_cast %165 : vector<48xf32> to vector<1x48xf32>
    %167 = arith.mulf %166, %166 : vector<1x48xf32>
    %cst_54 = arith.constant dense<0.000000e+00> : vector<1x6xf32>
    %168 = tpu.matmul %167, %78, %cst_54 {dimension_numbers = #tpu.dot_dimension_numbers<[1], [0], [0], [1], [0, 0, 1, 1], [], []>} : vector<1x48xf32>, vector<48x6xf32>, vector<1x6xf32> -> vector<1x6xf32>
    %cst_55 = arith.constant 9.99999996E-13 : f32
    %169 = vector.broadcast %cst_55 : f32 to vector<1x6xf32>
    %170 = arith.addf %168, %169 : vector<1x6xf32>
    %171 = math.rsqrt %170 : vector<1x6xf32>
    %172 = arith.mulf %168, %171 : vector<1x6xf32>
    %cst_56 = arith.constant 1.000000e+00 : f32
    %173 = vector.broadcast %cst_56 : f32 to vector<1x6xf32>
    %174 = arith.addf %173, %168 : vector<1x6xf32>
    %175 = tpu.reciprocal %174 {approx = true} : vector<1x6xf32> -> vector<1x6xf32>
    %176 = arith.mulf %172, %175 : vector<1x6xf32>
    %cst_57 = arith.constant dense<0.000000e+00> : vector<1x48xf32>
    %177 = tpu.matmul %176, %91, %cst_57 {dimension_numbers = #tpu.dot_dimension_numbers<[1], [0], [0], [1], [0, 0, 1, 1], [], []>} : vector<1x6xf32>, vector<6x48xf32>, vector<1x48xf32> -> vector<1x48xf32>
    %178 = arith.mulf %177, %166 : vector<1x48xf32>
    %cst_58 = arith.constant 0.000000e+00 : f32
    %179 = vector.broadcast %cst_58 : f32 to vector<1x48xf32>
    %180 = arith.cmpf oge, %178, %179 : vector<1x48xf32>
    %cst_59 = arith.constant 5.000000e-02 : f32
    %181 = vector.broadcast %cst_59 : f32 to vector<1x48xf32>
    %182 = arith.mulf %181, %178 : vector<1x48xf32>
    %183 = arith.select %180, %178, %182 : vector<1x48xi1>, vector<1x48xf32>
    %cst_60 = arith.constant 1.000000e+00 : f32
    %184 = vector.broadcast %cst_60 : f32 to vector<1x48xf32>
    %185 = arith.subf %178, %184 : vector<1x48xf32>
    %cst_61 = arith.constant 0.000000e+00 : f32
    %186 = vector.broadcast %cst_61 : f32 to vector<1x48xf32>
    %187 = arith.maximumf %185, %186 : vector<1x48xf32>
    %cst_62 = arith.constant 0.949999988 : f32
    %188 = vector.broadcast %cst_62 : f32 to vector<1x48xf32>
    %189 = arith.mulf %187, %188 : vector<1x48xf32>
    %190 = arith.subf %183, %189 : vector<1x48xf32>
    %191 = tpu.iota {dimensions = array<i32: 0>} : vector<48x2xi32>
    %192 = tpu.iota {dimensions = array<i32: 1>} : vector<48x2xi32>
    %c24_i32 = arith.constant 24 : i32
    %193 = vector.broadcast %c24_i32 : i32 to vector<48x2xi32>
    %194 = arith.muli %192, %193 : vector<48x2xi32>
    %195 = arith.cmpi sge, %191, %194 : vector<48x2xi32>
    %c24_i32_63 = arith.constant 24 : i32
    %196 = vector.broadcast %c24_i32_63 : i32 to vector<48x2xi32>
    %197 = arith.addi %194, %196 : vector<48x2xi32>
    %198 = arith.cmpi slt, %191, %197 : vector<48x2xi32>
    %199 = arith.andi %195, %198 : vector<48x2xi1>
    %200 = arith.extui %199 : vector<48x2xi1> to vector<48x2xi32>
    %201 = arith.sitofp %200 : vector<48x2xi32> to vector<48x2xf32>
    %cst_64 = arith.constant dense<0.000000e+00> : vector<1x2xf32>
    %202 = tpu.matmul %190, %201, %cst_64 {dimension_numbers = #tpu.dot_dimension_numbers<[1], [0], [0], [1], [0, 0, 1, 1], [], []>} : vector<1x48xf32>, vector<48x2xf32>, vector<1x2xf32> -> vector<1x2xf32>
    %c0_65 = arith.constant 0 : index
    %c0_66 = arith.constant 0 : index
    %c0_67 = arith.constant 0 : index
    %203 = vector.load %arg11[%c0_65, %c0_66, %c0_67] : memref<1x1x2xf32, #tpu.memory_space<vmem>>, vector<1x1x2xf32>
    %204 = vector.shape_cast %203 : vector<1x1x2xf32> to vector<1x2xf32>
    %205 = vector.shape_cast %202 : vector<1x2xf32> to vector<1x1x2xf32>
    tpu.vector_store %arg11[%c0_65, %c0_66, %c0_67], %205 {strides = array<i32>} : memref<1x1x2xf32, #tpu.memory_space<vmem>>, vector<1x1x2xf32>,
    %c0_68 = arith.constant 0 : index
    %c0_69 = arith.constant 0 : index
    %206 = vector.load %arg5[%c0_68, %c0_69] : memref<48x32xf32, #tpu.memory_space<vmem>>, vector<48x32xf32>
    %cst_70 = arith.constant dense<0.000000e+00> : vector<1x32xf32>
    %207 = tpu.matmul %190, %206, %cst_70 {dimension_numbers = #tpu.dot_dimension_numbers<[1], [0], [0], [1], [0, 0, 1, 1], [], []>} : vector<1x48xf32>, vector<48x32xf32>, vector<1x32xf32> -> vector<1x32xf32>
    %c0_71 = arith.constant 0 : index
    %c0_72 = arith.constant 0 : index
    %208 = vector.load %arg6[%c0_71, %c0_72] : memref<1x32xf32, #tpu.memory_space<vmem>>, vector<1x32xf32>
    %209 = arith.addf %207, %208 : vector<1x32xf32>
    %cst_73 = arith.constant 0.000000e+00 : f32
    %210 = vector.broadcast %cst_73 : f32 to vector<1x32xf32>
    %211 = arith.maximumf %209, %210 : vector<1x32xf32>
    %c0_74 = arith.constant 0 : index
    %c0_75 = arith.constant 0 : index
    %212 = vector.load %arg7[%c0_74, %c0_75] : memref<32x64xf32, #tpu.memory_space<vmem>>, vector<32x64xf32>
    %cst_76 = arith.constant dense<0.000000e+00> : vector<1x64xf32>
    %213 = tpu.matmul %211, %212, %cst_76 {dimension_numbers = #tpu.dot_dimension_numbers<[1], [0], [0], [1], [0, 0, 1, 1], [], []>} : vector<1x32xf32>, vector<32x64xf32>, vector<1x64xf32> -> vector<1x64xf32>
    %c0_77 = arith.constant 0 : index
    %c0_78 = arith.constant 0 : index
    %214 = vector.load %arg8[%c0_77, %c0_78] : memref<1x64xf32, #tpu.memory_space<vmem>>, vector<1x64xf32>
    %215 = arith.addf %213, %214 : vector<1x64xf32>
    %cst_79 = arith.constant 0.000000e+00 : f32
    %216 = vector.broadcast %cst_79 : f32 to vector<1x64xf32>
    %217 = arith.maximumf %215, %216 : vector<1x64xf32>
    %c0_80 = arith.constant 0 : index
    %c0_81 = arith.constant 0 : index
    %218 = vector.load %arg9[%c0_80, %c0_81] : memref<64x896xf32, #tpu.memory_space<vmem>>, vector<64x896xf32>
    %cst_82 = arith.constant dense<0.000000e+00> : vector<1x896xf32>
    %219 = tpu.matmul %217, %218, %cst_82 {dimension_numbers = #tpu.dot_dimension_numbers<[1], [0], [0], [1], [0, 0, 1, 1], [], []>} : vector<1x64xf32>, vector<64x896xf32>, vector<1x896xf32> -> vector<1x896xf32>
    %c0_83 = arith.constant 0 : index
    %c0_84 = arith.constant 0 : index
    %220 = vector.load %arg10[%c0_83, %c0_84] : memref<1x896xf32, #tpu.memory_space<vmem>>, vector<1x896xf32>
    %221 = arith.addf %219, %220 : vector<1x896xf32>
    %cst_85 = arith.constant 0.000000e+00 : f32
    %222 = vector.broadcast %cst_85 : f32 to vector<1x896xf32>
    %223 = arith.subf %222, %221 : vector<1x896xf32>
    %224 = math.exp %223 : vector<1x896xf32>
    %cst_86 = arith.constant 1.000000e+00 : f32
    %225 = vector.broadcast %cst_86 : f32 to vector<1x896xf32>
    %226 = arith.addf %225, %224 : vector<1x896xf32>
    %227 = tpu.reciprocal %226 : vector<1x896xf32> -> vector<1x896xf32>
    %c0_87 = arith.constant 0 : index
    %c0_88 = arith.constant 0 : index
    %c0_89 = arith.constant 0 : index
    %228 = vector.load %arg12[%c0_87, %c0_88, %c0_89] : memref<1x1x896xf32, #tpu.memory_space<vmem>>, vector<1x1x896xf32>
    %229 = vector.shape_cast %228 : vector<1x1x896xf32> to vector<1x896xf32>
    %230 = vector.shape_cast %227 : vector<1x896xf32> to vector<1x1x896xf32>
    tpu.vector_store %arg12[%c0_87, %c0_88, %c0_89], %230 {strides = array<i32>} : memref<1x1x896xf32, #tpu.memory_space<vmem>>, vector<1x1x896xf32>,
    return
  }
  func.func @transform_0(%arg0: i32) -> (i32, i32, i32) {
    %c0_i32 = arith.constant 0 : i32
    %c0_i32_0 = arith.constant 0 : i32
    %c0_i32_1 = arith.constant 0 : i32
    return %arg0, %c0_i32, %c0_i32_0 : i32, i32, i32
  }
  func.func @transform_1(%arg0: i32) -> (i32, i32) {
    %c0_i32 = arith.constant 0 : i32
    %c0_i32_0 = arith.constant 0 : i32
    %c0_i32_1 = arith.constant 0 : i32
    return %c0_i32, %c0_i32_0 : i32, i32
  }
  func.func @transform_2(%arg0: i32) -> (i32, i32) {
    %c0_i32 = arith.constant 0 : i32
    %c0_i32_0 = arith.constant 0 : i32
    %c0_i32_1 = arith.constant 0 : i32
    return %c0_i32, %c0_i32_0 : i32, i32
  }
  func.func @transform_3(%arg0: i32) -> (i32, i32, i32) {
    %c0_i32 = arith.constant 0 : i32
    %c0_i32_0 = arith.constant 0 : i32
    %c0_i32_1 = arith.constant 0 : i32
    %c0_i32_2 = arith.constant 0 : i32
    return %c0_i32, %c0_i32_0, %c0_i32_1 : i32, i32, i32
  }
  func.func @transform_4(%arg0: i32) -> (i32, i32) {
    %c0_i32 = arith.constant 0 : i32
    %c0_i32_0 = arith.constant 0 : i32
    %c0_i32_1 = arith.constant 0 : i32
    return %c0_i32, %c0_i32_0 : i32, i32
  }
  func.func @transform_5(%arg0: i32) -> (i32, i32) {
    %c0_i32 = arith.constant 0 : i32
    %c0_i32_0 = arith.constant 0 : i32
    %c0_i32_1 = arith.constant 0 : i32
    return %c0_i32, %c0_i32_0 : i32, i32
  }
  func.func @transform_6(%arg0: i32) -> (i32, i32) {
    %c0_i32 = arith.constant 0 : i32
    %c0_i32_0 = arith.constant 0 : i32
    %c0_i32_1 = arith.constant 0 : i32
    return %c0_i32, %c0_i32_0 : i32, i32
  }
  func.func @transform_7(%arg0: i32) -> (i32, i32) {
    %c0_i32 = arith.constant 0 : i32
    %c0_i32_0 = arith.constant 0 : i32
    %c0_i32_1 = arith.constant 0 : i32
    return %c0_i32, %c0_i32_0 : i32, i32
  }
  func.func @transform_8(%arg0: i32) -> (i32, i32) {
    %c0_i32 = arith.constant 0 : i32
    %c0_i32_0 = arith.constant 0 : i32
    %c0_i32_1 = arith.constant 0 : i32
    return %c0_i32, %c0_i32_0 : i32, i32
  }
  func.func @transform_9(%arg0: i32) -> (i32, i32) {
    %c0_i32 = arith.constant 0 : i32
    %c0_i32_0 = arith.constant 0 : i32
    %c0_i32_1 = arith.constant 0 : i32
    return %c0_i32, %c0_i32_0 : i32, i32
  }
  func.func @transform_10(%arg0: i32) -> (i32, i32, i32) {
    %c0_i32 = arith.constant 0 : i32
    %c0_i32_0 = arith.constant 0 : i32
    %c0_i32_1 = arith.constant 0 : i32
    return %arg0, %c0_i32, %c0_i32_0 : i32, i32, i32
  }
  func.func @transform_11(%arg0: i32) -> (i32, i32, i32) {
    %c0_i32 = arith.constant 0 : i32
    %c0_i32_0 = arith.constant 0 : i32
    %c0_i32_1 = arith.constant 0 : i32
    return %arg0, %c0_i32, %c0_i32_0 : i32, i32, i32
  }
}

</mosaic_0001>

<bundles_post_ra>
// kernel: capsule_network_forward.2
= control target key start
LH: loop header
LB: loop body
LE: loop exit
PB: predicated region body
PF: predicated region fallthrough
CT: control target
= control target key end

     0   :  { %s652_s12 = smov 0   ;;  %s899_s0 = inlined_call_operand.vmem [shape: f32[2,144,162], index: 0, kind: input, shape index: {}]   ;;  %s900_s1 = inlined_call_operand.vmem [shape: f32[162,16], index: 1, kind: input, shape index: {}]   ;;  %s901_s2 = inlined_call_operand.vmem [shape: f32[1,16], index: 2, kind: input, shape index: {}]   ;;  %s902_s3 = inlined_call_operand.vmem [shape: f32[2,144,16], index: 3, kind: output, shape index: {}]  }
   0x1 LB: > { %s541_s13 = sadd.s32 4294967295, %s629_s12   ;;  %p545_p0 = scmp.ge.s32.totalorder %s629_s12, 1  ;;  %s629_s12 = sphi %s652_s12, %s13_s12  }
   0x2   : > { %p137_p1 = scmp.lt.s32.totalorder %s629_s12, 3 }
   0x4   : > { %p138_p2 = pnand %p545_p0, %p137_p1 }
   0x5   : > { %p161_p3 = scmp.lt.s32.totalorder (!%p138_p2), %s541_s13, 1 }
   0x6   : > { %141 = sbr.rel (%p138_p2) target bundleno = 285 (0x11d), region = 32 }
   0xb   : > { %v222_v0 = vld [vmem:[%s900_s1 + $0x78] sm:$0xff]  ;;  %v631_v1 = vmov 0.0   ;;  %v221_v2 = vld [vmem:[%s900_s1 + $0x70] sm:$0xff]  ;;  %v220_v3 = vld [vmem:[%s900_s1 + $0x68] sm:$0xff]  ;;  %s904_s13 = smov (!%p161_p3, %s541_s13), 1  ;;  %vm290_vm0 = vcmask 1041408  }
   0xc   : > { %294 = vmatprep.subr.mxu0 %v631_v1  ;;  %570 = vmatprep.subr.mxu1 %v631_v1  ;;  %v219_v4 = vld [vmem:[%s900_s1 + $0x60] sm:$0xff]  ;;  %v218_v5 = vld [vmem:[%s900_s1 + $0x58] sm:$0xff]  ;;  %v217_v6 = vld [vmem:[%s900_s1 + $0x50] sm:$0xff]  ;;  %s612_s25 = smul.u32 288, %s904_s13  ;;  %vm235_vm1 = vcmask 277504   ;;  %vm467_vm2 = vcmask 130048  }
   0xd   : > { %295 = vmatpush1.msra.mxu0 %v222_v0  ;;  %591 = vmatpush1.msra.mxu1 %v222_v0  ;;  %v216_v7 = vld [vmem:[%s900_s1 + $0x48] sm:$0xff]  ;;  %v215_v8 = vld [vmem:[%s900_s1 + $0x40] sm:$0xff]  ;;  %v214_v9 = vld [vmem:[%s900_s1 + $0x38] sm:$0xff]  ;;  %s613_s8 = smul.u32 144, %s904_s13 }
   0xe   : > { %296 = vmatprep.subr.mxu0 %v631_v1  ;;  %571 = vmatprep.subr.mxu1 %v631_v1  ;;  %v213_v10 = vld [vmem:[%s900_s1 + $0x30] sm:$0xff]  ;;  %v212_v11 = vld [vmem:[%s900_s1 + $0x28] sm:$0xff]  ;;  %v211_v12 = vld [vmem:[%s900_s1 + $0x20] sm:$0xff]  ;;  %s768_s5 = scalar_lea.vmem %s899_s0, %s612_s25 }
   0xf   : > { %297 = vmatpush1.msra.mxu0 %v221_v2  ;;  %592 = vmatpush1.msra.mxu1 %v221_v2  ;;  %v210_v13 = vld [vmem:[%s900_s1 + $0x18] sm:$0xff]  ;;  %v209_v14 = vld [vmem:[%s900_s1 + $0x10] sm:$0xff]  ;;  %v208_v15 = vld [vmem:[%s900_s1 + $0x8] sm:$0xff]  ;;  %s842_s15 = scalar_lea.vmem %s902_s3, %s613_s8 }
  0x10   : > { %298 = vmatprep.subr.mxu0 %v631_v1  ;;  %572 = vmatprep.subr.mxu1 %v631_v1  ;;  %v207_v16 = vld [vmem:[%s900_s1] sm:$0xff]  ;;  %v226_v18 = vld [vmem:[%s900_s1 + $0x98] sm:$0xff]  ;;  %v225_v19 = vld [vmem:[%s900_s1 + $0x90] sm:$0xff] }
  0x11   : > { %299 = vmatpush1.msra.mxu0 %v220_v3  ;;  %593 = vmatpush1.msra.mxu1 %v220_v3  ;;  %v227_v17 = vld [vmem:[%s900_s1 + $0xa0] sm:$0x3]  ;;  %v224_v20 = vld [vmem:[%s900_s1 + $0x88] sm:$0xff]  ;;  %v190_v23 = vld [vmem:[%s768_s5 + $0x98] sm:$0xff] }
  0x12   : > { %300 = vmatprep.subr.mxu0 %v631_v1  ;;  %573 = vmatprep.subr.mxu1 %v631_v1  ;;  %v223_v21 = vld [vmem:[%s900_s1 + $0x80] sm:$0xff]  ;;  %v172_v22 = vld [vmem:[%s768_s5 + $0x8] sm:$0xff]  ;;  %v189_v25 = vld [vmem:[%s768_s5 + $0x90] sm:$0xff] }
  0x13   : > { %301 = vmatpush1.msra.mxu0 %v219_v4  ;;  %594 = vmatpush1.msra.mxu1 %v219_v4  ;;  %v171_v24 = vld [vmem:[%s768_s5] sm:$0xff]  ;;  %v174_v26 = vld [vmem:[%s768_s5 + $0x18] sm:$0xff]  ;;  %v192_v27 = vld [vmem:[%s768_s5 + $0xa8] sm:$0xff] }
  0x14   : > { %302 = vmatprep.subr.mxu0 %v631_v1  ;;  %574 = vmatprep.subr.mxu1 %v631_v1  ;;  %v173_v28 = vld [vmem:[%s768_s5 + $0x10] sm:$0xff]  ;;  %v191_v29 = vld [vmem:[%s768_s5 + $0xa0] sm:$0xff]  ;;  %v176_v30 = vld [vmem:[%s768_s5 + $0x28] sm:$0xff] }
  0x15   : > { %303 = vmatpush1.msra.mxu0 %v218_v5  ;;  %595 = vmatpush1.msra.mxu1 %v218_v5  ;;  %v194_v31 = vld [vmem:[%s768_s5 + $0xb8] sm:$0xff]  ;;  %v175_v32 = vld [vmem:[%s768_s5 + $0x20] sm:$0xff]  ;;  %v193_v33 = vld [vmem:[%s768_s5 + $0xb0] sm:$0xff] }
  0x16   : > { %304 = vmatprep.subr.mxu0 %v631_v1  ;;  %575 = vmatprep.subr.mxu1 %v631_v1  ;;  %v178_v34 = vld [vmem:[%s768_s5 + $0x38] sm:$0xff]  ;;  %v196_v35 = vld [vmem:[%s768_s5 + $0xc8] sm:$0xff]  ;;  %v177_v36 = vld [vmem:[%s768_s5 + $0x30] sm:$0xff] }
  0x17   : > { %305 = vmatpush1.msra.mxu0 %v217_v6  ;;  %596 = vmatpush1.msra.mxu1 %v217_v6  ;;  %v195_v37 = vld [vmem:[%s768_s5 + $0xc0] sm:$0xff]  ;;  %v180_v38 = vld [vmem:[%s768_s5 + $0x48] sm:$0xff]  ;;  %v198_v39 = vld [vmem:[%s768_s5 + $0xd8] sm:$0xff] }
  0x18   : > { %306 = vmatprep.subr.mxu0 %v631_v1  ;;  %576 = vmatprep.subr.mxu1 %v631_v1  ;;  %v179_v40 = vld [vmem:[%s768_s5 + $0x40] sm:$0xff]  ;;  %v197_v41 = vld [vmem:[%s768_s5 + $0xd0] sm:$0xff]  ;;  %v182_v42 = vld [vmem:[%s768_s5 + $0x58] sm:$0xff] }
  0x19   : > { %307 = vmatpush1.msra.mxu0 %v216_v7  ;;  %597 = vmatpush1.msra.mxu1 %v216_v7  ;;  %v200_v43 = vld [vmem:[%s768_s5 + $0xe8] sm:$0xff]  ;;  %v181_v44 = vld [vmem:[%s768_s5 + $0x50] sm:$0xff]  ;;  %v199_v45 = vld [vmem:[%s768_s5 + $0xe0] sm:$0xff] }
  0x1a   : > { %308 = vmatprep.subr.mxu0 %v631_v1  ;;  %577 = vmatprep.subr.mxu1 %v631_v1  ;;  %v184_v46 = vld [vmem:[%s768_s5 + $0x68] sm:$0xff]  ;;  %v202_v47 = vld [vmem:[%s768_s5 + $0xf8] sm:$0xff]  ;;  %v183_v48 = vld [vmem:[%s768_s5 + $0x60] sm:$0xff] }
  0x1b   : > { %309 = vmatpush1.msra.mxu0 %v215_v8  ;;  %598 = vmatpush1.msra.mxu1 %v215_v8  ;;  %v201_v49 = vld [vmem:[%s768_s5 + $0xf0] sm:$0xff]  ;;  %v186_v50 = vld [vmem:[%s768_s5 + $0x78] sm:$0xff]  ;;  %v204_v51 = vld [vmem:[%s768_s5 + $0x108] sm:$0xff] }
  0x1c   : > { %310 = vmatprep.subr.mxu0 %v631_v1  ;;  %578 = vmatprep.subr.mxu1 %v631_v1  ;;  %v185_v52 = vld [vmem:[%s768_s5 + $0x70] sm:$0xff]  ;;  %v203_v53 = vld [vmem:[%s768_s5 + $0x100] sm:$0xff]  ;;  %v188_v54 = vld [vmem:[%s768_s5 + $0x88] sm:$0xff] }
  0x1d   : > { %311 = vmatpush1.msra.mxu0 %v214_v9  ;;  %599 = vmatpush1.msra.mxu1 %v214_v9  ;;  %v206_v55 = vld [vmem:[%s768_s5 + $0x118] sm:$0xff]  ;;  %v187_v56 = vld [vmem:[%s768_s5 + $0x80] sm:$0xff]  ;;  %v205_v57 = vld [vmem:[%s768_s5 + $0x110] sm:$0xff] }
  0x1e   : > { %312 = vmatprep.subr.mxu0 %v631_v1  ;;  %579 = vmatprep.subr.mxu1 %v631_v1  ;;  %v835_v58 = vld [vmem:[%s901_s2] ss:$0 sm:$0xff] }
  0x1f   : > { %313 = vmatpush1.msra.mxu0 %v213_v10  ;;  %600 = vmatpush1.msra.mxu1 %v213_v10 }
  0x20   : > { %314 = vmatprep.subr.mxu0 %v631_v1  ;;  %580 = vmatprep.subr.mxu1 %v631_v1 }
  0x21   : > { %315 = vmatpush1.msra.mxu0 %v212_v11  ;;  %601 = vmatpush1.msra.mxu1 %v212_v11 }
  0x22   : > { %316 = vmatprep.subr.mxu0 %v631_v1  ;;  %581 = vmatprep.subr.mxu1 %v631_v1 }
  0x23   : > { %317 = vmatpush1.msra.mxu0 %v211_v12  ;;  %602 = vmatpush1.msra.mxu1 %v211_v12 }
  0x24   : > { %318 = vmatprep.subr.mxu0 %v631_v1  ;;  %582 = vmatprep.subr.mxu1 %v631_v1 }
  0x25   : > { %319 = vmatpush1.msra.mxu0 %v210_v13  ;;  %603 = vmatpush1.msra.mxu1 %v210_v13 }
  0x26   : > { %320 = vmatprep.subr.mxu0 %v631_v1  ;;  %583 = vmatprep.subr.mxu1 %v631_v1 }
  0x27   : > { %321 = vmatpush1.msra.mxu0 %v209_v14  ;;  %604 = vmatpush1.msra.mxu1 %v209_v14 }
  0x28   : > { %322 = vmatprep.subr.mxu0 %v631_v1  ;;  %584 = vmatprep.subr.mxu1 %v631_v1 }
  0x29   : > { %323 = vmatpush1.msra.mxu0 %v208_v15  ;;  %605 = vmatpush1.msra.mxu1 %v208_v15 }
  0x2a   : > { %324 = vmatprep.subr.mxu0 %v631_v1  ;;  %585 = vmatprep.subr.mxu1 %v631_v1 }
  0x2b   : > { %325 = vmatpush1.msra.mxu0 %v207_v16  ;;  %606 = vmatpush1.msra.mxu1 %v207_v16 }
  0x2c   : > { %348 = vmatprep.subr.mxu0 %v631_v1  ;;  %586 = vmatprep.subr.mxu1 %v631_v1 }
  0x2d   : > { %549 = vmatpush2.msk.msra.mxu0 %vm290_vm0, %v227_v17  ;;  %607 = vmatpush2.msk.msra.mxu1 %vm290_vm0, %v227_v17 }
  0x2e   : > { %350 = vmatprep.subr.mxu0 %v631_v1  ;;  %587 = vmatprep.subr.mxu1 %v631_v1 }
  0x2f   : > { %351 = vmatpush2.msra.mxu0 %v226_v18  ;;  %608 = vmatpush2.msra.mxu1 %v226_v18 }
  0x30   : > { %352 = vmatprep.subr.mxu0 %v631_v1  ;;  %588 = vmatprep.subr.mxu1 %v631_v1 }
  0x31   : > { %353 = vmatpush2.msra.mxu0 %v225_v19  ;;  %609 = vmatpush2.msra.mxu1 %v225_v19 }
  0x32   : > { %354 = vmatprep.subr.mxu0 %v631_v1  ;;  %589 = vmatprep.subr.mxu1 %v631_v1 }
  0x33   : > { %355 = vmatpush2.msra.mxu0 %v224_v20  ;;  %610 = vmatpush2.msra.mxu1 %v224_v20 }
  0x34   : > { %356 = vmatprep.subr.mxu0 %v631_v1  ;;  %590 = vmatprep.subr.mxu1 %v631_v1 }
  0x35   : > { %357 = vmatpush2.msra.mxu0 %v223_v21  ;;  %611 = vmatpush2.msra.mxu1 %v223_v21 }
  0x36   : > { %550 = vmatprep.mubr.msk.f32.mxu0 %vm235_vm1, %v172_v22  ;;  %559 = vmatprep.mubr.msk.f32.mxu1 %vm235_vm1, %v190_v23 }
  0x37   : > { %359 = vmatmul.mubr.f32.vlgmr.msra.gmra.mxu0 %v171_v24  ;;  %404 = vmatmul.mubr.f32.vlgmr.msra.gmra.mxu1 %v189_v25 }
  0x38   : > { %551 = vmatprep.mubr.msk.f32.mxu0 %vm235_vm1, %v174_v26  ;;  %560 = vmatprep.mubr.msk.f32.mxu1 %vm235_vm1, %v192_v27 }
  0x3b   : > { %364 = vmatmul.mubr.f32.gmra.mxu0 %v173_v28  ;;  %409 = vmatmul.mubr.f32.gmra.mxu1 %v191_v29 }
  0x3c   : > { %552 = vmatprep.mubr.msk.f32.mxu0 %vm235_vm1, %v176_v30  ;;  %561 = vmatprep.mubr.msk.f32.mxu1 %vm235_vm1, %v194_v31 }
  0x3f   : > { %369 = vmatmul.mubr.f32.gmra.mxu0 %v175_v32  ;;  %414 = vmatmul.mubr.f32.gmra.mxu1 %v193_v33 }
  0x40   : > { %553 = vmatprep.mubr.msk.f32.mxu0 %vm235_vm1, %v178_v34  ;;  %562 = vmatprep.mubr.msk.f32.mxu1 %vm235_vm1, %v196_v35 }
  0x43   : > { %374 = vmatmul.mubr.f32.gmra.mxu0 %v177_v36  ;;  %419 = vmatmul.mubr.f32.gmra.mxu1 %v195_v37 }
  0x44   : > { %554 = vmatprep.mubr.msk.f32.mxu0 %vm235_vm1, %v180_v38  ;;  %563 = vmatprep.mubr.msk.f32.mxu1 %vm235_vm1, %v198_v39 }
  0x47   : > { %379 = vmatmul.mubr.f32.gmra.mxu0 %v179_v40  ;;  %424 = vmatmul.mubr.f32.gmra.mxu1 %v197_v41 }
  0x48   : > { %555 = vmatprep.mubr.msk.f32.mxu0 %vm235_vm1, %v182_v42  ;;  %564 = vmatprep.mubr.msk.f32.mxu1 %vm235_vm1, %v200_v43 }
  0x4b   : > { %384 = vmatmul.mubr.f32.gmra.mxu0 %v181_v44  ;;  %429 = vmatmul.mubr.f32.gmra.mxu1 %v199_v45 }
  0x4c   : > { %556 = vmatprep.mubr.msk.f32.mxu0 %vm235_vm1, %v184_v46  ;;  %565 = vmatprep.mubr.msk.f32.mxu1 %vm235_vm1, %v202_v47 }
  0x4f   : > { %389 = vmatmul.mubr.f32.gmra.mxu0 %v183_v48  ;;  %434 = vmatmul.mubr.f32.gmra.mxu1 %v201_v49 }
  0x50   : > { %557 = vmatprep.mubr.msk.f32.mxu0 %vm235_vm1, %v186_v50  ;;  %566 = vmatprep.mubr.msk.f32.mxu1 %vm235_vm1, %v204_v51 }
  0x53   : > { %394 = vmatmul.mubr.f32.gmra.mxu0 %v185_v52  ;;  %439 = vmatmul.mubr.f32.gmra.mxu1 %v203_v53 }
  0x54   : > { %558 = vmatprep.mubr.msk.f32.mxu0 %vm235_vm1, %v188_v54  ;;  %567 = vmatprep.mubr.msk.f32.mxu1 %vm235_vm1, %v206_v55 }
  0x57   : > { %399 = vmatmul.mubr.f32.gmra.mxu0 %v187_v56  ;;  %444 = vmatmul.mubr.f32.gmra.mxu1 %v205_v57 }
  0xf7   : > { %v360_v59 = vpop.f32.mrf.mxu0  ;;  %v405_v60 = vpop.f32.mrf.mxu1 }
  0xf8   : > { %v361_v61 = vadd.f32 %v835_v58, %v360_v59  ;;  %v406_v62 = vadd.f32 %v835_v58, %v405_v60 }
  0xf9   : > { %v362_v63 = vpop.f32.mrf.mxu0  ;;  %v407_v0 = vpop.f32.mrf.mxu1 }
  0xfa   : > { %v449_v1 = vmax.f32 %v361_v61, 0.0  ;;  %v458_v2 = vmax.f32 %v406_v62, 0.0 }
  0xfb   : > { %v365_v3 = vpop.f32.mrf.mxu0  ;;  %v410_v4 = vpop.f32.mrf.mxu1 }
  0xfc   : > { %468 = vst.msk [vmem:[%s842_s15] sm:$0xff] %vm467_vm2, %v449_v1  ;;  %477 = vst.msk [vmem:[%s842_s15 + $0x48] sm:$0xff] %vm467_vm2, %v458_v2  ;;  %v366_v5 = vadd.f32 %v835_v58, %v365_v3  ;;  %v411_v6 = vadd.f32 %v835_v58, %v410_v4 }
  0xfd   : > { %v367_v7 = vpop.f32.mrf.mxu0  ;;  %v412_v8 = vpop.f32.mrf.mxu1 }
  0xfe   : > { %v450_v9 = vmax.f32 %v366_v5, 0.0  ;;  %v459_v10 = vmax.f32 %v411_v6, 0.0 }
  0xff   : > { %v370_v11 = vpop.f32.mrf.mxu0  ;;  %v415_v12 = vpop.f32.mrf.mxu1 }
 0x100   : > { %469 = vst.msk [vmem:[%s842_s15 + $0x8] sm:$0xff] %vm467_vm2, %v450_v9  ;;  %478 = vst.msk [vmem:[%s842_s15 + $0x50] sm:$0xff] %vm467_vm2, %v459_v10  ;;  %v371_v13 = vadd.f32 %v835_v58, %v370_v11  ;;  %v416_v14 = vadd.f32 %v835_v58, %v415_v12 }
 0x101   : > { %v372_v15 = vpop.f32.mrf.mxu0  ;;  %v417_v16 = vpop.f32.mrf.mxu1 }
 0x102   : > { %v451_v17 = vmax.f32 %v371_v13, 0.0  ;;  %v460_v18 = vmax.f32 %v416_v14, 0.0 }
 0x103   : > { %v375_v19 = vpop.f32.mrf.mxu0  ;;  %v420_v20 = vpop.f32.mrf.mxu1 }
 0x104   : > { %470 = vst.msk [vmem:[%s842_s15 + $0x10] sm:$0xff] %vm467_vm2, %v451_v17  ;;  %479 = vst.msk [vmem:[%s842_s15 + $0x58] sm:$0xff] %vm467_vm2, %v460_v18  ;;  %v376_v21 = vadd.f32 %v835_v58, %v375_v19  ;;  %v421_v22 = vadd.f32 %v835_v58, %v420_v20 }
 0x105   : > { %v377_v23 = vpop.f32.mrf.mxu0  ;;  %v422_v24 = vpop.f32.mrf.mxu1 }
 0x106   : > { %v452_v25 = vmax.f32 %v376_v21, 0.0  ;;  %v461_v26 = vmax.f32 %v421_v22, 0.0 }
 0x107   : > { %v380_v27 = vpop.f32.mrf.mxu0  ;;  %v425_v28 = vpop.f32.mrf.mxu1 }
 0x108   : > { %471 = vst.msk [vmem:[%s842_s15 + $0x18] sm:$0xff] %vm467_vm2, %v452_v25  ;;  %480 = vst.msk [vmem:[%s842_s15 + $0x60] sm:$0xff] %vm467_vm2, %v461_v26  ;;  %v381_v29 = vadd.f32 %v835_v58, %v380_v27  ;;  %v426_v30 = vadd.f32 %v835_v58, %v425_v28 }
 0x109   : > { %v382_v31 = vpop.f32.mrf.mxu0  ;;  %v427_v32 = vpop.f32.mrf.mxu1 }
 0x10a   : > { %v453_v33 = vmax.f32 %v381_v29, 0.0  ;;  %v462_v34 = vmax.f32 %v426_v30, 0.0 }
 0x10b   : > { %v385_v35 = vpop.f32.mrf.mxu0  ;;  %v430_v36 = vpop.f32.mrf.mxu1 }
 0x10c   : > { %472 = vst.msk [vmem:[%s842_s15 + $0x20] sm:$0xff] %vm467_vm2, %v453_v33  ;;  %481 = vst.msk [vmem:[%s842_s15 + $0x68] sm:$0xff] %vm467_vm2, %v462_v34  ;;  %v386_v37 = vadd.f32 %v835_v58, %v385_v35  ;;  %v431_v38 = vadd.f32 %v835_v58, %v430_v36 }
 0x10d   : > { %v387_v39 = vpop.f32.mrf.mxu0  ;;  %v432_v40 = vpop.f32.mrf.mxu1 }
 0x10e   : > { %v454_v41 = vmax.f32 %v386_v37, 0.0  ;;  %v463_v42 = vmax.f32 %v431_v38, 0.0 }
 0x10f   : > { %v390_v43 = vpop.f32.mrf.mxu0  ;;  %v435_v44 = vpop.f32.mrf.mxu1 }
 0x110   : > { %473 = vst.msk [vmem:[%s842_s15 + $0x28] sm:$0xff] %vm467_vm2, %v454_v41  ;;  %482 = vst.msk [vmem:[%s842_s15 + $0x70] sm:$0xff] %vm467_vm2, %v463_v42  ;;  %v391_v45 = vadd.f32 %v835_v58, %v390_v43  ;;  %v436_v46 = vadd.f32 %v835_v58, %v435_v44 }
 0x111   : > { %v392_v47 = vpop.f32.mrf.mxu0  ;;  %v437_v48 = vpop.f32.mrf.mxu1 }
 0x112   : > { %v455_v49 = vmax.f32 %v391_v45, 0.0  ;;  %v464_v50 = vmax.f32 %v436_v46, 0.0 }
 0x113   : > { %v395_v51 = vpop.f32.mrf.mxu0  ;;  %v440_v52 = vpop.f32.mrf.mxu1 }
 0x114   : > { %474 = vst.msk [vmem:[%s842_s15 + $0x30] sm:$0xff] %vm467_vm2, %v455_v49  ;;  %483 = vst.msk [vmem:[%s842_s15 + $0x78] sm:$0xff] %vm467_vm2, %v464_v50  ;;  %v396_v53 = vadd.f32 %v835_v58, %v395_v51  ;;  %v441_v54 = vadd.f32 %v835_v58, %v440_v52 }
 0x115   : > { %v397_v55 = vpop.f32.mrf.mxu0  ;;  %v442_v56 = vpop.f32.mrf.mxu1 }
 0x116   : > { %v456_v57 = vmax.f32 %v396_v53, 0.0  ;;  %v465_v59 = vmax.f32 %v441_v54, 0.0 }
 0x117   : > { %v400_v60 = vpop.f32.mrf.mxu0  ;;  %v445_v61 = vpop.f32.mrf.mxu1 }
 0x118   : > { %475 = vst.msk [vmem:[%s842_s15 + $0x38] sm:$0xff] %vm467_vm2, %v456_v57  ;;  %484 = vst.msk [vmem:[%s842_s15 + $0x80] sm:$0xff] %vm467_vm2, %v465_v59  ;;  %v401_v62 = vadd.f32 %v835_v58, %v400_v60  ;;  %v446_v63 = vadd.f32 %v835_v58, %v445_v61 }
 0x119   : > { %v402_v0 = vpop.f32.mrf.mxu0  ;;  %v447_v1 = vpop.f32.mrf.mxu1 }
 0x11a   : > { %v457_v2 = vmax.f32 %v401_v62, 0.0  ;;  %v466_v3 = vmax.f32 %v446_v63, 0.0 }
 0x11c   : > { %476 = vst.msk [vmem:[%s842_s15 + $0x40] sm:$0xff] %vm467_vm2, %v457_v2  ;;  %485 = vst.msk [vmem:[%s842_s15 + $0x88] sm:$0xff] %vm467_vm2, %v466_v3 }
 0x11d PF: > { %s13_s12 = sadd.s32 1, %s629_s12  }
 0x11e   : > { %p10_p4 = scmp.ge.s32.totalorder %s13_s12, 4  }
 0x120   :  { %12 = sbr.rel (!%p10_p4) target bundleno = 1 (0x1), region = 62 }

// kernel: capsule_network_forward.3
= control target key start
LH: loop header
LB: loop body
LE: loop exit
PB: predicated region body
PF: predicated region fallthrough
CT: control target
= control target key end

     0   :  { %17 = vsyncpa [#allocation3], 0  ;;  %s5639_s0 = inlined_call_operand.vmem [shape: f32[2,4,1296], index: 0, kind: input, shape index: {}]   ;;  %s5640_s1 = inlined_call_operand.vmem [shape: f32[1296,32], index: 1, kind: input, shape index: {}]   ;;  %s5641_s2 = inlined_call_operand.vmem [shape: f32[1,32], index: 2, kind: input, shape index: {}]   ;;  %s5642_s3 = inlined_call_operand.vmem [shape: f32[4,32,48], index: 3, kind: input, shape index: {}]   ;;  %s5643_s4 = inlined_call_operand.vmem [shape: f32[48,32], index: 4, kind: input, shape index: {}]   ;;  %s5644_s5 = inlined_call_operand.vmem [shape: f32[1,32], index: 5, kind: input, shape index: {}]   ;;  %s5645_s6 = inlined_call_operand.vmem [shape: f32[32,64], index: 6, kind: input, shape index: {}]   ;;  %s5646_s7 = inlined_call_operand.vmem [shape: f32[1,64], index: 7, kind: input, shape index: {}]   ;;  %s5647_s8 = inlined_call_operand.vmem [shape: f32[64,896], index: 8, kind: input, shape index: {}]   ;;  %s5648_s9 = inlined_call_operand.vmem [shape: f32[1,896], index: 9, kind: input, shape index: {}]   ;;  %s5649_s10 = inlined_call_operand.hbm [shape: f32[2,1,2], index: 10, kind: output, shape index: {0}]   ;;  %s5650_s11 = inlined_call_operand.vmem [shape: f32[2,1,896], index: 11, kind: output, shape index: {1}]  }
   0x1   :  { %19 = vsyncpa [#allocation3 + $0x1], 0  ;;  %s4302_s17 = smov 0   ;;  %s4304_s18 = smov 0  }
   0x2   :  { %s4306_s19 = smov 0   ;;  %s4308_s20 = smov 0  }
   0x3 LB: > { %5654 = sst [smem:[#allocation5_spill]] %s4229_s19  ;;  %s4323_s21 = sadd.s32 4294967295, %s4233_s20   ;;  %s4233_s20 = sphi %s4308_s20, %s5671_s20   ;;  %s4229_s19 = sphi %s4306_s19, %s5673_s19   ;;  %s4225_s18 = sphi %s4304_s18, %s5675_s18   ;;  %s4221_s17 = sphi %s4302_s17, %s5674_s17  }
   0x4   : > { %s3408_s22 = sadd.s32 4294967294, %s4233_s20   ;;  %s4327_s23 = sadd.s32 1, %s4233_s20  }
   0x5   : > { %5655 = sst [smem:[#allocation6_spill]] %s4327_s23  ;;  %s247_s24 = sadd.s32 1, %s4229_s19 }
   0x6   : > { %s244_s25 = ssub.s32 %s4233_s20, %s4327_s23  ;;  %p257_p0 = scmp.ne.s32.totalorder %s4229_s19, %s4225_s18 }
   0x7   : > { %p245_p1 = scmp.eq.s32.totalorder %s244_s25, 0  ;;  %p258_p2 = scmp.eq.s32.totalorder %s4323_s21, 1 }
   0x8   : > { %p263_p3 = scmp.ne.s32.totalorder %s4225_s18, %s4221_s17  ;;  %p264_p4 = scmp.eq.s32.totalorder %s3408_s22, 1 }
   0x9   : > { %s4338_s26 = scalar_select %p245_p1, %s4229_s19, %s247_s24  }
   0xa   : > { %p4340_p5 = por %p258_p2, %p257_p0  ;;  %p4344_p6 = por %p264_p4, %p263_p3 }
   0xb   : > { %5656 = sst [smem:[#allocation7_spill]] %s4338_s26  ;;  %p3411_p7 = scmp.ge.s32.totalorder %s4233_s20, 1 }
   0xc   : > { %p343_p8 = scmp.lt.s32.totalorder %s4233_s20, 3 }
   0xe   : > { %p344_p9 = pnand %p3411_p7, %p343_p8 }
   0xf   : > { %p386_p10 = scmp.lt.s32.totalorder (!%p344_p9), %s4323_s21, 1  ;;  %s378_s15 = sand.u32 (!%p344_p9), 1, %s4225_s18  }
  0x10   : > { %347 = sbr.rel (%p344_p9) target bundleno = 3525 (0xdc5), region = 60  ;;  %s5432_s24 = scalar_lea.vmem (!%p344_p9), [#allocation2], %s378_s15 }
  0x11   : > { %s3521_s16 = sshll.u32 (!%p344_p9), %s4323_s21, 4  ;;  %s3310_s29 = scalar_lea.sflag (!%p344_p9), [#allocation3], %s378_s15 }
  0x12   : > { %s3324_s25 = scalar_lea.hbm (!%p344_p9), %s5649_s10, %s3521_s16  ;;  %s4240_s19 = smov (!%p344_p9), [#allocation2]  }
  0x13   : > { %s4177_s12 = sshll.u32 (!%p344_p9), %s4240_s19, 4  ;;  %s4178_s12 = int_to_ptr.vmem [resolvable:$false] %s4177_s12 }
  0x14   : > { %s4179_s14 = scalar_lea.vmem (!%p344_p9), %s4178_s12, 32 }
  0x15   : > { %v432_v0 = vld [vmem:[%s5640_s1 + $0xf8] sm:$0xff]  ;;  %v431_v2 = vld [vmem:[%s5640_s1 + $0xf0] sm:$0xff]  ;;  %v430_v6 = vld [vmem:[%s5640_s1 + $0xe8] sm:$0xff]  ;;  %s4447_s22 = scalar_select %p386_p10, %s4323_s21, 1  ;;  %vm586_vm0 = vcmask 130048   ;;  %vm4236_vm1 = vmmov 0  }
  0x16   : > { %v416_v1 = vld [vmem:[%s5640_s1 + $0x78] sm:$0xff]  ;;  %3524 = vmatprep.subr.mxu0 %v432_v0  ;;  %v415_v4 = vld [vmem:[%s5640_s1 + $0x70] sm:$0xff]  ;;  %v414_v8 = vld [vmem:[%s5640_s1 + $0x68] sm:$0xff]  ;;  %vm1461_vm2 = vcmask 48128   ;;  %vm1465_vm5 = vcmask 1045504   ;;  %vm1029_vm10 = vcmask 261120  }
  0x17   : > { %v464_v3 = vld [vmem:[%s5640_s1 + $0x1f8] sm:$0xff]  ;;  %3525 = vmatpush3.msra.mxu0 %v416_v1  ;;  %v463_v7 = vld [vmem:[%s5640_s1 + $0x1f0] sm:$0xff]  ;;  %v462_v10 = vld [vmem:[%s5640_s1 + $0x1e8] sm:$0xff]  ;;  %s4043_s13 = smul.u32 44, %s4447_s22 }
  0x18   : > { %v448_v5 = vld [vmem:[%s5640_s1 + $0x178] sm:$0xff]  ;;  %3559 = vmatprep.subr.mxu1 %v464_v3  ;;  %3526 = vmatprep.subr.mxu0 %v431_v2  ;;  %v447_v9 = vld [vmem:[%s5640_s1 + $0x170] sm:$0xff]  ;;  %v429_v11 = vld [vmem:[%s5640_s1 + $0xe0] sm:$0xff] }
  0x19   : > { %3560 = vmatpush3.msra.mxu1 %v448_v5  ;;  %3527 = vmatpush3.msra.mxu0 %v415_v4  ;;  %v446_v12 = vld [vmem:[%s5640_s1 + $0x168] sm:$0xff]  ;;  %v413_v13 = vld [vmem:[%s5640_s1 + $0x60] sm:$0xff]  ;;  %v428_v15 = vld [vmem:[%s5640_s1 + $0xd8] sm:$0xff]  ;;  %s4501_s23 = scalar_lea.vmem %s5639_s0, %s4043_s13 }
  0x1a   : > { %3561 = vmatprep.subr.mxu1 %v463_v7  ;;  %3528 = vmatprep.subr.mxu0 %v430_v6  ;;  %v461_v14 = vld [vmem:[%s5640_s1 + $0x1e0] sm:$0xff]  ;;  %v412_v17 = vld [vmem:[%s5640_s1 + $0x58] sm:$0xff]  ;;  %v427_v19 = vld [vmem:[%s5640_s1 + $0xd0] sm:$0xff] }
  0x1b   : > { %3562 = vmatpush3.msra.mxu1 %v447_v9  ;;  %3529 = vmatpush3.msra.mxu0 %v414_v8  ;;  %v445_v16 = vld [vmem:[%s5640_s1 + $0x160] sm:$0xff]  ;;  %v460_v18 = vld [vmem:[%s5640_s1 + $0x1d8] sm:$0xff]  ;;  %v411_v21 = vld [vmem:[%s5640_s1 + $0x50] sm:$0xff] }
  0x1c   : > { %3563 = vmatprep.subr.mxu1 %v462_v10  ;;  %3530 = vmatprep.subr.mxu0 %v429_v11  ;;  %v444_v20 = vld [vmem:[%s5640_s1 + $0x158] sm:$0xff]  ;;  %v459_v22 = vld [vmem:[%s5640_s1 + $0x1d0] sm:$0xff]  ;;  %v426_v23 = vld [vmem:[%s5640_s1 + $0xc8] sm:$0xff] }
  0x1d   : > { %3564 = vmatpush3.msra.mxu1 %v446_v12  ;;  %3531 = vmatpush3.msra.mxu0 %v413_v13  ;;  %v443_v24 = vld [vmem:[%s5640_s1 + $0x150] sm:$0xff]  ;;  %v410_v25 = vld [vmem:[%s5640_s1 + $0x48] sm:$0xff]  ;;  %v425_v27 = vld [vmem:[%s5640_s1 + $0xc0] sm:$0xff] }
  0x1e   : > { %3565 = vmatprep.subr.mxu1 %v461_v14  ;;  %3532 = vmatprep.subr.mxu0 %v428_v15  ;;  %v458_v26 = vld [vmem:[%s5640_s1 + $0x1c8] sm:$0xff]  ;;  %v409_v29 = vld [vmem:[%s5640_s1 + $0x40] sm:$0xff]  ;;  %v424_v31 = vld [vmem:[%s5640_s1 + $0xb8] sm:$0xff] }
  0x1f   : > { %3566 = vmatpush3.msra.mxu1 %v445_v16  ;;  %3533 = vmatpush3.msra.mxu0 %v412_v17  ;;  %v442_v28 = vld [vmem:[%s5640_s1 + $0x148] sm:$0xff]  ;;  %v457_v30 = vld [vmem:[%s5640_s1 + $0x1c0] sm:$0xff]  ;;  %v408_v33 = vld [vmem:[%s5640_s1 + $0x38] sm:$0xff] }
  0x20   : > { %3567 = vmatprep.subr.mxu1 %v460_v18  ;;  %3534 = vmatprep.subr.mxu0 %v427_v19  ;;  %v441_v32 = vld [vmem:[%s5640_s1 + $0x140] sm:$0xff]  ;;  %v456_v34 = vld [vmem:[%s5640_s1 + $0x1b8] sm:$0xff]  ;;  %v423_v35 = vld [vmem:[%s5640_s1 + $0xb0] sm:$0xff] }
  0x21   : > { %3568 = vmatpush3.msra.mxu1 %v444_v20  ;;  %3535 = vmatpush3.msra.mxu0 %v411_v21  ;;  %v440_v36 = vld [vmem:[%s5640_s1 + $0x138] sm:$0xff]  ;;  %v407_v37 = vld [vmem:[%s5640_s1 + $0x30] sm:$0xff]  ;;  %v422_v39 = vld [vmem:[%s5640_s1 + $0xa8] sm:$0xff] }
  0x22   : > { %3569 = vmatprep.subr.mxu1 %v459_v22  ;;  %3536 = vmatprep.subr.mxu0 %v426_v23  ;;  %v455_v38 = vld [vmem:[%s5640_s1 + $0x1b0] sm:$0xff]  ;;  %v406_v41 = vld [vmem:[%s5640_s1 + $0x28] sm:$0xff]  ;;  %v421_v43 = vld [vmem:[%s5640_s1 + $0xa0] sm:$0xff] }
  0x23   : > { %3570 = vmatpush3.msra.mxu1 %v443_v24  ;;  %3537 = vmatpush3.msra.mxu0 %v410_v25  ;;  %v439_v40 = vld [vmem:[%s5640_s1 + $0x130] sm:$0xff]  ;;  %v454_v42 = vld [vmem:[%s5640_s1 + $0x1a8] sm:$0xff]  ;;  %v405_v45 = vld [vmem:[%s5640_s1 + $0x20] sm:$0xff] }
  0x24   : > { %3571 = vmatprep.subr.mxu1 %v458_v26  ;;  %3538 = vmatprep.subr.mxu0 %v425_v27  ;;  %v438_v44 = vld [vmem:[%s5640_s1 + $0x128] sm:$0xff]  ;;  %v453_v46 = vld [vmem:[%s5640_s1 + $0x1a0] sm:$0xff]  ;;  %v420_v47 = vld [vmem:[%s5640_s1 + $0x98] sm:$0xff] }
  0x25   : > { %3572 = vmatpush3.msra.mxu1 %v442_v28  ;;  %3539 = vmatpush3.msra.mxu0 %v409_v29  ;;  %v437_v48 = vld [vmem:[%s5640_s1 + $0x120] sm:$0xff]  ;;  %v404_v49 = vld [vmem:[%s5640_s1 + $0x18] sm:$0xff]  ;;  %v419_v51 = vld [vmem:[%s5640_s1 + $0x90] sm:$0xff] }
  0x26   : > { %3573 = vmatprep.subr.mxu1 %v457_v30  ;;  %3540 = vmatprep.subr.mxu0 %v424_v31  ;;  %v452_v50 = vld [vmem:[%s5640_s1 + $0x198] sm:$0xff]  ;;  %v395_v53 = vld [vmem:[%s4501_s23] sm:$0xff]  ;;  %v403_v54 = vld [vmem:[%s5640_s1 + $0x10] sm:$0xff] }
  0x27   : > { %3574 = vmatpush3.msra.mxu1 %v441_v32  ;;  %3541 = vmatpush3.msra.mxu0 %v408_v33  ;;  %v436_v52 = vld [vmem:[%s5640_s1 + $0x118] sm:$0xff]  ;;  %v451_v55 = vld [vmem:[%s5640_s1 + $0x190] sm:$0xff]  ;;  %v418_v56 = vld [vmem:[%s5640_s1 + $0x88] sm:$0xff]  ;;  %v576_v60 = vcombine.high %v395_v53, %v395_v53 }
  0x28   : > { %3575 = vmatprep.subr.mxu1 %v456_v34  ;;  %3542 = vmatprep.subr.mxu0 %v423_v35  ;;  %v435_v57 = vld [vmem:[%s5640_s1 + $0x110] sm:$0xff]  ;;  %v402_v58 = vld [vmem:[%s5640_s1 + $0x8] sm:$0xff]  ;;  %v417_v61 = vld [vmem:[%s5640_s1 + $0x80] sm:$0xff] }
  0x29   : > { %3576 = vmatpush3.msra.mxu1 %v440_v36  ;;  %3543 = vmatpush3.msra.mxu0 %v407_v37  ;;  %v450_v59 = vld [vmem:[%s5640_s1 + $0x188] sm:$0xff]  ;;  %v401_v63 = vld [vmem:[%s5640_s1] sm:$0xff]  ;;  %v496_v2 = vld [vmem:[%s5640_s1 + $0x2f8] sm:$0xff] }
  0x2a   : > { %3577 = vmatprep.subr.mxu1 %v455_v38  ;;  %3544 = vmatprep.subr.mxu0 %v422_v39  ;;  %v396_v62 = vld [vmem:[%s4501_s23 + $0x8] sm:$0xff]  ;;  %v449_v1 = vld [vmem:[%s5640_s1 + $0x180] sm:$0xff]  ;;  %v480_v5 = vld [vmem:[%s5640_s1 + $0x278] sm:$0xff] }
  0x2b   : > { %3578 = vmatpush3.msra.mxu1 %v439_v40  ;;  %3545 = vmatpush3.msra.mxu0 %v406_v41  ;;  %v434_v0 = vld [vmem:[%s5640_s1 + $0x108] sm:$0xff]  ;;  %v433_v3 = vld [vmem:[%s5640_s1 + $0x100] sm:$0xff]  ;;  %v577_v4 = vcombine.high %v396_v62, %v396_v62  ;;  %v495_v6 = vld [vmem:[%s5640_s1 + $0x2f0] sm:$0xff] }
  0x2c   : > { %3579 = vmatprep.subr.mxu1 %v454_v42  ;;  %3546 = vmatprep.subr.mxu0 %v421_v43  ;;  %v528_v7 = vld [vmem:[%s5640_s1 + $0x3f8] sm:$0xff]  ;;  %v479_v8 = vld [vmem:[%s5640_s1 + $0x270] sm:$0xff]  ;;  %v494_v10 = vld [vmem:[%s5640_s1 + $0x2e8] sm:$0xff] }
  0x2d   : > { %3580 = vmatpush3.msra.mxu1 %v438_v44  ;;  %3547 = vmatpush3.msra.mxu0 %v405_v45  ;;  %v512_v9 = vld [vmem:[%s5640_s1 + $0x378] sm:$0xff]  ;;  %v527_v11 = vld [vmem:[%s5640_s1 + $0x3f0] sm:$0xff]  ;;  %v478_v12 = vld [vmem:[%s5640_s1 + $0x268] sm:$0xff] }
  0x2e   : > { %3581 = vmatprep.subr.mxu1 %v453_v46  ;;  %3548 = vmatprep.subr.mxu0 %v420_v47  ;;  %v511_v13 = vld [vmem:[%s5640_s1 + $0x370] sm:$0xff]  ;;  %v493_v14 = vld [vmem:[%s5640_s1 + $0x2e0] sm:$0xff]  ;;  %v526_v15 = vld [vmem:[%s5640_s1 + $0x3e8] sm:$0xff] }
  0x2f   : > { %3582 = vmatpush3.msra.mxu1 %v437_v48  ;;  %3549 = vmatpush3.msra.mxu0 %v404_v49  ;;  %v477_v16 = vld [vmem:[%s5640_s1 + $0x260] sm:$0xff]  ;;  %v510_v17 = vld [vmem:[%s5640_s1 + $0x368] sm:$0xff]  ;;  %v492_v18 = vld [vmem:[%s5640_s1 + $0x2d8] sm:$0xff] }
  0x30   : > { %3583 = vmatprep.subr.mxu1 %v452_v50  ;;  %3550 = vmatprep.subr.mxu0 %v419_v51  ;;  %v525_v19 = vld [vmem:[%s5640_s1 + $0x3e0] sm:$0xff]  ;;  %v476_v20 = vld [vmem:[%s5640_s1 + $0x258] sm:$0xff]  ;;  %v491_v22 = vld [vmem:[%s5640_s1 + $0x2d0] sm:$0xff] }
  0x31   : > { %3584 = vmatpush3.msra.mxu1 %v436_v52  ;;  %3551 = vmatpush3.msra.mxu0 %v403_v54  ;;  %v509_v21 = vld [vmem:[%s5640_s1 + $0x360] sm:$0xff]  ;;  %v524_v23 = vld [vmem:[%s5640_s1 + $0x3d8] sm:$0xff]  ;;  %v475_v24 = vld [vmem:[%s5640_s1 + $0x250] sm:$0xff] }
  0x32   : > { %3585 = vmatprep.subr.mxu1 %v451_v55  ;;  %3552 = vmatprep.subr.mxu0 %v418_v56  ;;  %v508_v25 = vld [vmem:[%s5640_s1 + $0x358] sm:$0xff]  ;;  %v490_v26 = vld [vmem:[%s5640_s1 + $0x2c8] sm:$0xff]  ;;  %v523_v27 = vld [vmem:[%s5640_s1 + $0x3d0] sm:$0xff] }
  0x33   : > { %3586 = vmatpush3.msra.mxu1 %v435_v57  ;;  %3553 = vmatpush3.msra.mxu0 %v402_v58  ;;  %v474_v28 = vld [vmem:[%s5640_s1 + $0x248] sm:$0xff]  ;;  %v507_v29 = vld [vmem:[%s5640_s1 + $0x350] sm:$0xff]  ;;  %v489_v30 = vld [vmem:[%s5640_s1 + $0x2c0] sm:$0xff] }
  0x34   : > { %3587 = vmatprep.subr.mxu1 %v450_v59  ;;  %3554 = vmatprep.subr.mxu0 %v417_v61  ;;  %v522_v31 = vld [vmem:[%s5640_s1 + $0x3c8] sm:$0xff]  ;;  %v473_v32 = vld [vmem:[%s5640_s1 + $0x240] sm:$0xff]  ;;  %v488_v34 = vld [vmem:[%s5640_s1 + $0x2b8] sm:$0xff] }
  0x35   : > { %653 = vmatprep.mubr.f32.mxu0 %v576_v60  ;;  %3555 = vmatpush3.msra.mxu0 %v401_v63  ;;  %v506_v33 = vld [vmem:[%s5640_s1 + $0x348] sm:$0xff]  ;;  %v521_v35 = vld [vmem:[%s5640_s1 + $0x3c0] sm:$0xff]  ;;  %v472_v36 = vld [vmem:[%s5640_s1 + $0x238] sm:$0xff] }
  0x36   : > { %3588 = vmatpush3.msra.mxu1 %v434_v0  ;;  %654 = vmatmul.mubr.f32.vlgmr.msra.gmra.mxu0 %v395_v53  ;;  %v505_v37 = vld [vmem:[%s5640_s1 + $0x340] sm:$0xff]  ;;  %v487_v38 = vld [vmem:[%s5640_s1 + $0x2b0] sm:$0xff]  ;;  %v520_v39 = vld [vmem:[%s5640_s1 + $0x3b8] sm:$0xff] }
  0x37   : > { %3589 = vmatprep.subr.mxu1 %v449_v1  ;;  %3594 = vmatprep.subr.mxu0 %v496_v2  ;;  %v471_v40 = vld [vmem:[%s5640_s1 + $0x230] sm:$0xff]  ;;  %v504_v41 = vld [vmem:[%s5640_s1 + $0x338] sm:$0xff]  ;;  %v486_v42 = vld [vmem:[%s5640_s1 + $0x2a8] sm:$0xff] }
  0x38   : > { %3590 = vmatpush3.msra.mxu1 %v433_v3  ;;  %723 = vmatprep.mubr.f32.mxu1 %v577_v4  ;;  %v519_v43 = vld [vmem:[%s5640_s1 + $0x3b0] sm:$0xff]  ;;  %v470_v44 = vld [vmem:[%s5640_s1 + $0x228] sm:$0xff]  ;;  %v485_v46 = vld [vmem:[%s5640_s1 + $0x2a0] sm:$0xff] }
  0x39   : > { %3595 = vmatpush3.msra.mxu0 %v480_v5  ;;  %724 = vmatmul.mubr.f32.vlgmr.msra.gmra.mxu1 %v396_v62  ;;  %v503_v45 = vld [vmem:[%s5640_s1 + $0x330] sm:$0xff]  ;;  %v518_v47 = vld [vmem:[%s5640_s1 + $0x3a8] sm:$0xff]  ;;  %v469_v48 = vld [vmem:[%s5640_s1 + $0x220] sm:$0xff] }
  0x3a   : > { %3596 = vmatprep.subr.mxu0 %v495_v6  ;;  %3629 = vmatprep.subr.mxu1 %v528_v7  ;;  %v502_v49 = vld [vmem:[%s5640_s1 + $0x328] sm:$0xff]  ;;  %v484_v50 = vld [vmem:[%s5640_s1 + $0x298] sm:$0xff]  ;;  %v517_v51 = vld [vmem:[%s5640_s1 + $0x3a0] sm:$0xff] }
  0x3b   : > { %3597 = vmatpush3.msra.mxu0 %v479_v8  ;;  %3630 = vmatpush3.msra.mxu1 %v512_v9  ;;  %v468_v52 = vld [vmem:[%s5640_s1 + $0x218] sm:$0xff]  ;;  %v501_v53 = vld [vmem:[%s5640_s1 + $0x320] sm:$0xff]  ;;  %v483_v54 = vld [vmem:[%s5640_s1 + $0x290] sm:$0xff] }
  0x3c   : > { %3598 = vmatprep.subr.mxu0 %v494_v10  ;;  %3631 = vmatprep.subr.mxu1 %v527_v11  ;;  %v516_v55 = vld [vmem:[%s5640_s1 + $0x398] sm:$0xff]  ;;  %v467_v56 = vld [vmem:[%s5640_s1 + $0x210] sm:$0xff]  ;;  %v482_v58 = vld [vmem:[%s5640_s1 + $0x288] sm:$0xff] }
  0x3d   : > { %3599 = vmatpush3.msra.mxu0 %v478_v12  ;;  %3632 = vmatpush3.msra.mxu1 %v511_v13  ;;  %v500_v57 = vld [vmem:[%s5640_s1 + $0x318] sm:$0xff]  ;;  %v397_v59 = vld [vmem:[%s4501_s23 + $0x10] sm:$0xff]  ;;  %v466_v61 = vld [vmem:[%s5640_s1 + $0x208] sm:$0xff] }
  0x3e   : > { %3600 = vmatprep.subr.mxu0 %v493_v14  ;;  %3633 = vmatprep.subr.mxu1 %v526_v15  ;;  %v515_v60 = vld [vmem:[%s5640_s1 + $0x390] sm:$0xff]  ;;  %v481_v63 = vld [vmem:[%s5640_s1 + $0x280] sm:$0xff]  ;;  %v514_v0 = vld [vmem:[%s5640_s1 + $0x388] sm:$0xff]  ;;  %v578_v2 = vcombine.high %v397_v59, %v397_v59 }
  0x3f   : > { %3601 = vmatpush3.msra.mxu0 %v477_v16  ;;  %3634 = vmatpush3.msra.mxu1 %v510_v17  ;;  %v499_v62 = vld [vmem:[%s5640_s1 + $0x310] sm:$0xff]  ;;  %v465_v1 = vld [vmem:[%s5640_s1 + $0x200] sm:$0xff]  ;;  %v398_v3 = vld [vmem:[%s4501_s23 + $0x18] sm:$0xff] }
  0x40   : > { %3602 = vmatprep.subr.mxu0 %v492_v18  ;;  %3635 = vmatprep.subr.mxu1 %v525_v19  ;;  %v498_v4 = vld [vmem:[%s5640_s1 + $0x308] sm:$0xff]  ;;  %v513_v5 = vld [vmem:[%s5640_s1 + $0x380] sm:$0xff]  ;;  %v560_v7 = vld [vmem:[%s5640_s1 + $0x4f8] sm:$0xff]  ;;  %v579_v9 = vcombine.high %v398_v3, %v398_v3  ;;  %v4235_v19 = vmov 0.0  }
  0x41   : > { %3603 = vmatpush3.msra.mxu0 %v476_v20  ;;  %3636 = vmatpush3.msra.mxu1 %v509_v21  ;;  %v4748_v6 = vld [vmem:[%s4501_s23 + $0x20] sm:$0xff]  ;;  %v544_v10 = vld [vmem:[%s5640_s1 + $0x478] sm:$0xff]  ;;  %v559_v11 = vld [vmem:[%s5640_s1 + $0x4f0] sm:$0xff] }
  0x42   : > { %3604 = vmatprep.subr.mxu0 %v491_v22  ;;  %3637 = vmatprep.subr.mxu1 %v524_v23  ;;  %v497_v8 = vld [vmem:[%s5640_s1 + $0x300] sm:$0xff]  ;;  %v580_v12 = vcombine.high %v4748_v6, %v4748_v6  ;;  %v543_v13 = vld [vmem:[%s5640_s1 + $0x470] sm:$0xff]  ;;  %v558_v14 = vld [vmem:[%s5640_s1 + $0x4e8] sm:$0xff] }
  0x43   : > { %3605 = vmatpush3.msra.mxu0 %v475_v24  ;;  %3638 = vmatpush3.msra.mxu1 %v508_v25  ;;  %v542_v15 = vld [vmem:[%s5640_s1 + $0x468] sm:$0xff]  ;;  %v557_v17 = vld [vmem:[%s5640_s1 + $0x4e0] sm:$0xff]  ;;  %v556_v21 = vld [vmem:[%s5640_s1 + $0x4d8] sm:$0xff] }
  0x44   : > { %3606 = vmatprep.subr.mxu0 %v490_v26  ;;  %3639 = vmatprep.subr.mxu1 %v523_v27  ;;  %v562_v16 = vld [vmem:[%s5640_s1 + $0x508] sm:$0xff]  ;;  %v541_v18 = vld [vmem:[%s5640_s1 + $0x460] sm:$0xff]  ;;  %v540_v22 = vld [vmem:[%s5640_s1 + $0x458] sm:$0xff] }
  0x45   : > { %3607 = vmatpush3.msra.mxu0 %v474_v28  ;;  %3640 = vmatpush3.msra.mxu1 %v507_v29  ;;  %v561_v20 = vld [vmem:[%s5640_s1 + $0x500] sm:$0xff]  ;;  %v400_v23 = vld [vmem:[%s4501_s23 + $0x28] sm:$0xf]  ;;  %v555_v24 = vld [vmem:[%s5640_s1 + $0x4d0] sm:$0xff]  ;;  %s3326_s23 = sshll.u32 %s5432_s24, 4  ;;  %s3327_s23 = int_to_ptr.vmem [resolvable:$true] %s3326_s23 }
  0x46   : > { %3608 = vmatprep.subr.mxu0 %v489_v30  ;;  %3641 = vmatprep.subr.mxu1 %v522_v31  ;;  %v539_v25 = vld [vmem:[%s5640_s1 + $0x450] sm:$0xff]  ;;  %v554_v26 = vld [vmem:[%s5640_s1 + $0x4c8] sm:$0xff]  ;;  %v553_v28 = vld [vmem:[%s5640_s1 + $0x4c0] sm:$0xff]  ;;  %s4173_s30 = scalar_lea.vmem %s3327_s23, 16  ;;  %p4180_p0 = scmp.lt.s32.totalorder %s3327_s23, %s4178_s12 }
  0x47   : > { %3609 = vmatpush3.msra.mxu0 %v473_v32  ;;  %3642 = vmatpush3.msra.mxu1 %v506_v33  ;;  %v538_v27 = vld [vmem:[%s5640_s1 + $0x448] sm:$0xff]  ;;  %v537_v29 = vld [vmem:[%s5640_s1 + $0x440] sm:$0xff]  ;;  %v552_v30 = vld [vmem:[%s5640_s1 + $0x4b8] sm:$0xff]  ;;  %p4174_p11 = scmp.ne.s32.totalorder %s3327_s23, %s4173_s30  ;;  %p4181_p1 = scmp.lt.s32.totalorder %s4179_s14, %s4173_s30 }
  0x48   : > { %3610 = vmatprep.subr.mxu0 %v488_v34  ;;  %3643 = vmatprep.subr.mxu1 %v521_v35  ;;  %v536_v31 = vld [vmem:[%s5640_s1 + $0x438] sm:$0xff]  ;;  %v551_v32 = vld [vmem:[%s5640_s1 + $0x4b0] sm:$0xff]  ;;  %v550_v34 = vld [vmem:[%s5640_s1 + $0x4a8] sm:$0xff] }
  0x49   : > { %3611 = vmatpush3.msra.mxu0 %v472_v36  ;;  %3644 = vmatpush3.msra.mxu1 %v505_v37  ;;  %v535_v33 = vld [vmem:[%s5640_s1 + $0x430] sm:$0xff]  ;;  %v534_v35 = vld [vmem:[%s5640_s1 + $0x428] sm:$0xff]  ;;  %v549_v36 = vld [vmem:[%s5640_s1 + $0x4a0] sm:$0xff]  ;;  %p4175_p12 = pnand %p4174_p11, %p4340_p5  ;;  %p4182_p2 = por %p4181_p1, %p4180_p0 }
  0x4a   : > { %3612 = vmatprep.subr.mxu0 %v487_v38  ;;  %3645 = vmatprep.subr.mxu1 %v520_v39  ;;  %v533_v37 = vld [vmem:[%s5640_s1 + $0x420] sm:$0xff]  ;;  %v548_v38 = vld [vmem:[%s5640_s1 + $0x498] sm:$0xff] }
  0x4b   : > { %3613 = vmatpush3.msra.mxu0 %v471_v40  ;;  %3646 = vmatpush3.msra.mxu1 %v504_v41  ;;  %v532_v39 = vld [vmem:[%s5640_s1 + $0x418] sm:$0xff]  ;;  %v547_v40 = vld [vmem:[%s5640_s1 + $0x490] sm:$0xff]  ;;  %p4176_p13 = pneg %p4175_p12 }
  0x4c   : > { %3614 = vmatprep.subr.mxu0 %v486_v42  ;;  %3647 = vmatprep.subr.mxu1 %v519_v43  ;;  %v531_v41 = vld [vmem:[%s5640_s1 + $0x410] sm:$0xff]  ;;  %v546_v42 = vld [vmem:[%s5640_s1 + $0x488] sm:$0xff] }
  0x4d   : > { %3615 = vmatpush3.msra.mxu0 %v470_v44  ;;  %3648 = vmatpush3.msra.mxu1 %v503_v45  ;;  %v530_v43 = vld [vmem:[%s5640_s1 + $0x408] sm:$0xff]  ;;  %v545_v44 = vld [vmem:[%s5640_s1 + $0x480] sm:$0xff]  ;;  %p4183_p3 = pnand %p4182_p2, %p4176_p13 }
  0x4e   : > { %3616 = vmatprep.subr.mxu0 %v485_v46  ;;  %3649 = vmatprep.subr.mxu1 %v518_v47  ;;  %v529_v45 = vld [vmem:[%s5640_s1 + $0x400] sm:$0xff]  ;;  %v1028_v46 = vld [vmem:[%s5642_s3 + $0x18] sm:$0xff]  ;;  %v1027_v47 = vld [vmem:[%s5642_s3 + $0x10] sm:$0xff] }
  0x4f   : > { %3617 = vmatpush3.msra.mxu0 %v469_v48  ;;  %3650 = vmatpush3.msra.mxu1 %v502_v49  ;;  %v1026_v48 = vld [vmem:[%s5642_s3 + $0x8] sm:$0xff]  ;;  %v1025_v49 = vld [vmem:[%s5642_s3] sm:$0xff] }
  0x50   : > { %3618 = vmatprep.subr.mxu0 %v484_v50  ;;  %3651 = vmatprep.subr.mxu1 %v517_v51  ;;  %v1009_v50 = vlaneseq }
  0x51   : > { %3619 = vmatpush3.msra.mxu0 %v468_v52  ;;  %3652 = vmatpush3.msra.mxu1 %v501_v53 }
  0x52   : > { %3620 = vmatprep.subr.mxu0 %v483_v54  ;;  %3653 = vmatprep.subr.mxu1 %v516_v55  ;;  %v4883_v51 = vshrl.u32 %v1009_v50, 7  ;;  %v4886_v52 = vand.u32 127, %v1009_v50  ;;  %v4237_v54 = vmov 0.03125  }
  0x53   : > { %3621 = vmatpush3.msra.mxu0 %v467_v56  ;;  %3654 = vmatpush3.msra.mxu1 %v500_v57 }
  0x54   : > { %3622 = vmatprep.subr.mxu0 %v482_v58  ;;  %3655 = vmatprep.subr.mxu1 %v515_v60  ;;  %v1453_v53 = vmul.u32 8, %v4883_v51 }
  0x55   : > { %3623 = vmatpush3.msra.mxu0 %v466_v61  ;;  %3656 = vmatpush3.msra.mxu1 %v499_v62 }
  0x56   : > { %3624 = vmatprep.subr.mxu0 %v481_v63  ;;  %3657 = vmatprep.subr.mxu1 %v514_v0  ;;  %vm1454_vm3 = vcmp.ge.s32.totalorder %v4886_v52, %v1453_v53  ;;  %v1455_v55 = vadd.s32 8, %v1453_v53  ;;  %v3429_v53 = vld [vmem:[%s5642_s3 + $0x70] sm:$0xff] }
  0x57   : > { %3625 = vmatpush3.msra.mxu0 %v465_v1  ;;  %793 = vmatprep.mubr.f32.mxu0 %v578_v2 }
  0x58   : > { %3658 = vmatpush3.msra.mxu1 %v498_v4  ;;  %794 = vmatmul.mubr.f32.vlgmr.msra.gmra.mxu0 %v397_v59  ;;  %vm1456_vm4 = vcmp.lt.s32.totalorder %v4886_v52, %v1455_v55  ;;  %v3427_v55 = vld [vmem:[%s5642_s3 + $0x60] sm:$0xff] }
  0x59   : > { %3659 = vmatprep.subr.mxu1 %v513_v5  ;;  %3664 = vmatprep.subr.mxu0 %v560_v7  ;;  %vm1457_vm6 = vmand %vm1454_vm3, %vm1456_vm4  ;;  %v1013_v7 = vmul.u32 4, %v4883_v51 }
  0x5a   : > { %3660 = vmatpush3.msra.mxu1 %v497_v8  ;;  %863 = vmatprep.mubr.f32.mxu1 %v579_v9  ;;  %v4893_v56 = vsel %vm1457_vm6, 1.0, %v4235_v19 }
  0x5b   : > { %3665 = vmatpush3.msra.mxu0 %v544_v10  ;;  %864 = vmatmul.mubr.f32.vlgmr.msra.gmra.mxu1 %v398_v3  ;;  %v3413_v3 = vld [vmem:[%s5641_s2] ss:$0 sm:$0xff]  ;;  %v1015_v10 = vadd.s32 4, %v1013_v7  ;;  %vm1014_vm7 = vcmp.ge.s32.totalorder %v4886_v52, %v1013_v7 }
  0x5c   : > { %3666 = vmatprep.subr.mxu0 %v559_v11  ;;  %933 = vmatprep.mubr.f32.mxu0 %v580_v12 }
  0x5d   : > { %3667 = vmatpush3.msra.mxu0 %v543_v13  ;;  %3812 = vmatprep.subr.mxu1 %v4235_v19  ;;  %vm1016_vm8 = vcmp.lt.s32.totalorder %v4886_v52, %v1015_v10 }
  0x5e   : > { %3668 = vmatprep.subr.mxu0 %v558_v14  ;;  %3813 = vmatpush3.msra.mxu1 %v562_v16  ;;  %vm1017_vm9 = vmand %vm1014_vm7, %vm1016_vm8 }
  0x5f   : > { %3669 = vmatpush3.msra.mxu0 %v542_v15  ;;  %3814 = vmatprep.subr.mxu1 %v4235_v19 }
  0x60   : > { %3670 = vmatprep.subr.mxu0 %v557_v17  ;;  %3815 = vmatpush3.msra.mxu1 %v561_v20  ;;  %v4912_v17 = vsub.s32 0, %v4883_v51  ;;  %v1196_v20 = vsub.s32 2, %v4883_v51 }
  0x61   : > { %3671 = vmatpush3.msra.mxu0 %v541_v18  ;;  %3816 = vmatprep.mubr.msk.f32.mxu1 %vm4236_vm1, %v4235_v19 }
  0x62   : > { %3672 = vmatprep.subr.mxu0 %v556_v21  ;;  %3817 = vmatmul.mubr.msk.f32.vlgmr.msra.gmra.mxu1 %vm586_vm0, %v400_v23  ;;  %v1283_v21 = vsub.s32 3, %v4883_v51 }
  0x63   : > { %3673 = vmatpush3.msra.mxu0 %v540_v22  ;;  %3819 = vmatprep.subr.mxu1 %v4235_v19  ;;  %v1109_v22 = vsub.s32 1, %v4883_v51 }
  0x64   : > { %3674 = vmatprep.subr.mxu0 %v555_v24  ;;  %3827 = vmatprep.mubr.msk.f32.mxu1 %vm4236_vm1, %v4235_v19  ;;  %v3415_v24 = vsel %vm1017_vm9, 1.0, %v4235_v19 }
  0x65   : > { %3675 = vmatpush3.msra.mxu0 %v539_v25  ;;  %3820 = vmatpush3.msra.mxu1 %v1028_v46  ;;  %v3424_v46 = vld [vmem:[%s5642_s3 + $0x50] sm:$0xff] }
  0x66   : > { %3676 = vmatprep.subr.mxu0 %v554_v26  ;;  %3821 = vmatprep.subr.mxu1 %v4235_v19 }
  0x67   : > { %3677 = vmatpush3.msra.mxu0 %v538_v27  ;;  %3822 = vmatpush3.msra.mxu1 %v1027_v47  ;;  %v3423_v47 = vld [vmem:[%s5642_s3 + $0x48] sm:$0xff] }
  0x68   : > { %3678 = vmatprep.subr.mxu0 %v553_v28  ;;  %3823 = vmatprep.subr.mxu1 %v4235_v19 }
  0x69   : > { %3679 = vmatpush3.msra.mxu0 %v537_v29  ;;  %3824 = vmatpush3.msra.mxu1 %v1026_v48  ;;  %v3422_v48 = vld [vmem:[%s5642_s3 + $0x40] sm:$0xff] }
  0x6a   : > { %3680 = vmatprep.subr.mxu0 %v552_v30  ;;  %3825 = vmatprep.subr.mxu1 %v4235_v19  ;;  %v3420_v30 = vld [vmem:[%s5642_s3 + $0x38] sm:$0xff] }
  0x6b   : > { %3681 = vmatpush3.msra.mxu0 %v536_v31  ;;  %3826 = vmatpush3.msra.mxu1 %v1025_v49  ;;  %v3430_v49 = vld [vmem:[%s5642_s3 + $0x78] sm:$0xff] }
  0x6c   : > { %3682 = vmatprep.subr.mxu0 %v551_v32  ;;  %3830 = vmatprep.subr.mxu1 %v4235_v19 }
  0x6d   : > { %3683 = vmatpush3.msra.mxu0 %v535_v33 }
  0x6e   : > { %3684 = vmatprep.subr.mxu0 %v550_v34  ;;  %v3419_v34 = vld [vmem:[%s5642_s3 + $0x30] sm:$0xff] }
  0x6f   : > { %3685 = vmatpush3.msra.mxu0 %v534_v35 }
  0x70   : > { %3686 = vmatprep.subr.mxu0 %v549_v36 }
  0x71   : > { %3687 = vmatpush3.msra.mxu0 %v533_v37 }
  0x72   : > { %3688 = vmatprep.subr.mxu0 %v548_v38 }
  0x73   : > { %3689 = vmatpush3.msra.mxu0 %v532_v39  ;;  %v3418_v39 = vld [vmem:[%s5642_s3 + $0x28] sm:$0xff] }
  0x74   : > { %3690 = vmatprep.subr.mxu0 %v547_v40 }
  0x75   : > { %3691 = vmatpush3.msra.mxu0 %v531_v41 }
  0x76   : > { %3692 = vmatprep.subr.mxu0 %v546_v42  ;;  %v3417_v42 = vld [vmem:[%s5642_s3 + $0x20] sm:$0xff] }
  0x77   : > { %3693 = vmatpush3.msra.mxu0 %v530_v43 }
  0x78   : > { %3694 = vmatprep.subr.mxu0 %v545_v44 }
  0x79   : > { %3695 = vmatpush3.msra.mxu0 %v529_v45  ;;  %v3425_v45 = vld [vmem:[%s5642_s3 + $0x58] sm:$0xff] }
  0x7a   : > { %934 = vmatmul.mubr.f32.vlgmr.msra.gmra.mxu0 %v4748_v6  ;;  %3863 = vmatprep.subr.msk.mxu0 %vm1465_vm5, %v4893_v56 }
  0x7b   : > { %3865 = vmatprep.mubr.msk.f32.mxu0 %vm1461_vm2, %v4237_v54  ;;  %3864 = vmatpush3.msk.msra.mxu0 %vm1465_vm5, %v4893_v56 }
  0x7c   : > { %3871 = vmatprep.subr.mxu0 %v4235_v19 }
  0x7e   : > { %3866 = vmatmul.mubr.msk.f32.vlgmr.msra.gmra.mxu0 %vm1461_vm2, %v4237_v54 }
  0x7f   : > { %3868 = vmatprep.mubr.msk.f32.mxu0 %vm1461_vm2, %v4237_v54 }
  0x82   : > { %3869 = vmatmul.mubr.msk.f32.gmra.mxu0 %vm1461_vm2, %v4237_v54  ;;  %v3428_v54 = vld [vmem:[%s5642_s3 + $0x68] sm:$0xff] }
  0x83   : > { %3883 = vmatprep.mubr.msk.f32.mxu0 %vm4236_vm1, %v4235_v19 }
  0xf6   : > { %v3556_v63 = vpop.f32.mrf.mxu0 }
  0xf8   : > { %v3557_v0 = vpop.f32.mrf.mxu0 }
  0xf9   : > { %v3591_v57 = vpop.f32.mrf.mxu1  ;;  %v3558_v2 = vadd.f32 %v3557_v0, %v3556_v63 }
  0xfb   : > { %v3592_v58 = vpop.f32.mrf.mxu1  ;;  %v656_v5 = vadd.f32 %v3558_v2, %v3413_v3 }
  0xfc   : > { %v3593_v6 = vadd.f32 %v3592_v58, %v3591_v57  ;;  %v4238_v57 = vmov 0  }
  0xfd   : > { %4090 = vset.pattern.permute.xlu0 %v4238_v57  ;;  %4091 = vset.pattern.permute.xlu1 %v4238_v57 }
  0xfe   : > { %v726_v9 = vadd.f32 %v3593_v6, %v656_v5 }
 0x118   : > { %v3626_v1 = vpop.f32.mrf.mxu0 }
 0x11a   : > { %v3627_v4 = vpop.f32.mrf.mxu0 }
 0x11b   : > { %v3661_v59 = vpop.f32.mrf.mxu1  ;;  %v3628_v8 = vadd.f32 %v3627_v4, %v3626_v1 }
 0x11d   : > { %v3662_v60 = vpop.f32.mrf.mxu1  ;;  %v796_v11 = vadd.f32 %v3628_v8, %v726_v9 }
 0x11e   : > { %v3663_v12 = vadd.f32 %v3662_v60, %v3661_v59 }
 0x120   : > { %v866_v15 = vadd.f32 %v3663_v12, %v796_v11 }
 0x122   : > { %v1005_v61 = vpop.f32.mrf.mxu1 }
 0x124   : > { %v3818_v62 = vpop.f32.mrf.mxu1 }
 0x13a   : > { %v3696_v13 = vpop.f32.mrf.mxu0 }
 0x13c   : > { %v3697_v14 = vpop.f32.mrf.mxu0 }
 0x13d   : > { %v3698_v16 = vadd.f32 %v3697_v14, %v3696_v13 }
 0x13f   : > { %v936_v18 = vadd.f32 %v3698_v16, %v866_v15 }
 0x141   : > { %v1006_v23 = vadd.f32 %v1005_v61, %v936_v18 }
 0x143   : > { %v1023_v25 = vrot.slane %v1006_v23, %v4912_v17  ;;  %v1197_v26 = vrot.slane %v1006_v23, %v1196_v20  ;;  %v1284_v27 = vrot.slane %v1006_v23, %v1283_v21  ;;  %v1110_v28 = vrot.slane %v1006_v23, %v1109_v22 }
 0x145   : > { %v1024_v29 = vmul.f32 %v3415_v24, %v1023_v25  ;;  %v1198_v31 = vmul.f32 %v3415_v24, %v1197_v26  ;;  %v1285_v32 = vmul.f32 %v3415_v24, %v1284_v27  ;;  %v1111_v33 = vmul.f32 %v3415_v24, %v1110_v28 }
 0x146   : > { %v1421_v27 = vmul.u32 8, %v4886_v52  ;;  %v4993_v28 = vadd.s32 40, %v4883_v51 }
 0x147   : > { %3828 = vmatmul.mubr.msk.f32.vlgmr.msra.gmra.mxu1 %vm1029_vm10, %v1024_v29  ;;  %v1277_v35 = vmul.f32 %v1198_v31, %v1198_v31  ;;  %v1103_v36 = vmul.f32 %v1024_v29, %v1024_v29  ;;  %v1364_v40 = vmul.f32 %v1285_v32, %v1285_v32  ;;  %v1190_v41 = vmul.f32 %v1111_v33, %v1111_v33 }
 0x148   : > { %3831 = vmatpush3.msra.mxu1 %v3420_v30  ;;  %3838 = vmatprep.mubr.msk.f32.mxu1 %vm4236_vm1, %v4235_v19  ;;  %v1428_v29 = vadd.s32 8, %v1421_v27  ;;  %vm1427_vm11 = vcmp.ge.s32.totalorder %v4993_v28, %v1421_v27  ;;  %v4998_v30 = vadd.s32 32, %v4883_v51  ;;  %vm1422_vm7 = vcmp.ge.s32.totalorder %v4883_v51, %v1421_v27 }
 0x149   : > { %3832 = vmatprep.subr.mxu1 %v4235_v19  ;;  %v1278_v37 = vsel %vm1029_vm10, %v1277_v35, 0.0  ;;  %v1104_v38 = vsel %vm1029_vm10, %v1103_v36, 0.0  ;;  %v1365_v43 = vsel %vm1029_vm10, %v1364_v40, 0.0  ;;  %v1191_v44 = vsel %vm1029_vm10, %v1190_v41, 0.0 }
 0x14a   : > { %3833 = vmatpush3.msra.mxu1 %v3419_v34  ;;  %1279 = vadd.xlane.f32.xlu1 %v1278_v37  ;;  %vm1434_vm12 = vcmp.lt.s32.totalorder %v4993_v28, %v1428_v29  ;;  %vm1426_vm14 = vcmp.ge.s32.totalorder %v4998_v30, %v1421_v27  ;;  %vm1433_vm15 = vcmp.lt.s32.totalorder %v4998_v30, %v1428_v29  ;;  %v5026_v35 = vadd.s32 16, %v4883_v51 }
 0x14b   : > { %1105 = vadd.xlane.f32.xlu0 %v1104_v38  ;;  %3834 = vmatprep.subr.mxu1 %v4235_v19  ;;  %vm5000_vm13 = vmand %vm1427_vm11, %vm1434_vm12  ;;  %v5029_v36 = vadd.s32 8, %v4883_v51  ;;  %vm1429_vm8 = vcmp.lt.s32.totalorder %v4883_v51, %v1428_v29 }
 0x14c   : > { %3835 = vmatpush3.msra.mxu1 %v3418_v39  ;;  %vm5016_vm0 = vmand %vm1426_vm14, %vm1433_vm15  ;;  %vm1424_vm9 = vcmp.ge.s32.totalorder %v5026_v35, %v1421_v27  ;;  %vm1431_vm11 = vcmp.lt.s32.totalorder %v5026_v35, %v1428_v29 }
 0x14d   : > { %3836 = vmatprep.subr.mxu1 %v4235_v19  ;;  %vm1423_vm12 = vcmp.ge.s32.totalorder %v5029_v36, %v1421_v27  ;;  %vm1430_vm14 = vcmp.lt.s32.totalorder %v5029_v36, %v1428_v29  ;;  %vm5046_vm15 = vmand %vm1424_vm9, %vm1431_vm11 }
 0x14e   : > { %3837 = vmatpush3.msra.mxu1 %v3417_v42  ;;  %1366 = vadd.xlane.f32.xlu1 %v1365_v43 }
 0x14f   : > { %1192 = vadd.xlane.f32.xlu0 %v1191_v44  ;;  %3839 = vmatmul.mubr.msk.f32.vlgmr.msra.gmra.mxu1 %vm1029_vm10, %v1111_v33  ;;  %v5010_v33 = vadd.s32 24, %v4883_v51 }
 0x150   : > { %3841 = vmatprep.subr.mxu1 %v4235_v19  ;;  %3849 = vmatprep.mubr.msk.f32.mxu1 %vm4236_vm1, %v4235_v19 }
 0x151   : > { %3842 = vmatpush3.msra.mxu1 %v3425_v45  ;;  %vm1425_vm3 = vcmp.ge.s32.totalorder %v5010_v33, %v1421_v27  ;;  %vm1432_vm4 = vcmp.lt.s32.totalorder %v5010_v33, %v1428_v29 }
 0x152   : > { %3843 = vmatprep.subr.mxu1 %v4235_v19  ;;  %vm5032_vm6 = vmand %vm1425_vm3, %vm1432_vm4 }
 0x153   : > { %3844 = vmatpush3.msra.mxu1 %v3424_v46  ;;  %vm5053_vm3 = vmand %vm1423_vm12, %vm1430_vm14 }
 0x154   : > { %3845 = vmatprep.subr.mxu1 %v4235_v19  ;;  %vm5058_vm4 = vmand %vm1422_vm7, %vm1429_vm8  ;;  %vm1558_vm7 = vcmask 392192  }
 0x155   : > { %3846 = vmatpush3.msra.mxu1 %v3423_v47 }
 0x156   : > { %3847 = vmatprep.subr.mxu1 %v4235_v19 }
 0x157   : > { %3848 = vmatpush3.msra.mxu1 %v3422_v48 }
 0x158   : > { %3850 = vmatmul.mubr.msk.f32.vlgmr.msra.gmra.mxu1 %vm1029_vm10, %v1198_v31  ;;  %3852 = vmatprep.subr.mxu1 %v4235_v19 }
 0x159   : > { %3853 = vmatpush3.msra.mxu1 %v3430_v49  ;;  %3860 = vmatprep.mubr.msk.f32.mxu1 %vm4236_vm1, %v4235_v19  ;;  %v3867_v49 = vpop.f32.mrf.mxu0 }
 0x15a   : > { %3854 = vmatprep.subr.mxu1 %v4235_v19 }
 0x15b   : > { %3855 = vmatpush3.msra.mxu1 %v3429_v53 }
 0x15c   : > { %3856 = vmatprep.subr.mxu1 %v4235_v19 }
 0x15d   : > { %3857 = vmatpush3.msra.mxu1 %v3428_v54  ;;  %v1535_v54 = vpop.f32.mrf.mxu0 }
 0x15e   : > { %3858 = vmatprep.subr.mxu1 %v4235_v19 }
 0x15f   : > { %3859 = vmatpush3.msra.mxu1 %v3427_v55  ;;  %v3870_v57 = vpop.f32.mrf.mxu0 }
 0x160   : > { %3861 = vmatmul.mubr.msk.f32.vlgmr.msra.gmra.mxu1 %vm1029_vm10, %v1285_v32  ;;  %3886 = vmatprep.subr.mxu1 %v4235_v19  ;;  %v4239_v32 = vmov 1.0  }
 0x161   : > { %3887 = vmatpush3.msk.msra.mxu1 %vm1465_vm5, %v4893_v56  ;;  %3888 = vmatprep.mubr.msk.f32.mxu1 %vm4236_vm1, %v4235_v19 }
 0x162   : > { %3872 = vmatpush3.msk.msra.mxu0 %vm5000_vm13, %v4239_v32  ;;  %3891 = vmatprep.subr.msk.mxu1 %vm5000_vm13, %v4239_v32 }
 0x163   : > { %3873 = vmatprep.subr.mxu0 %v4235_v19 }
 0x164   : > { %3874 = vmatpush3.msk.msra.mxu0 %vm5016_vm0, %v4239_v32 }
 0x165   : > { %3875 = vmatprep.subr.mxu0 %v4235_v19 }
 0x166   : > { %3876 = vmatpush3.msk.msra.mxu0 %vm5032_vm6, %v4239_v32 }
 0x167   : > { %3877 = vmatprep.subr.mxu0 %v4235_v19 }
 0x168   : > { %3878 = vmatpush3.msk.msra.mxu0 %vm5046_vm15, %v4239_v32 }
 0x169   : > { %3879 = vmatprep.subr.mxu0 %v4235_v19 }
 0x16a   : > { %3880 = vmatpush3.msk.msra.mxu0 %vm5053_vm3, %v4239_v32 }
 0x16b   : > { %3881 = vmatprep.subr.mxu0 %v4235_v19 }
 0x16c   : > { %3882 = vmatpush3.msk.msra.mxu0 %vm5058_vm4, %v4239_v32 }
 0x16d   : > { %3909 = vmatprep.subr.msk.mxu0 %vm1465_vm5, %v4893_v56 }
 0x1d3   : > { %v1280_v58 = vpop.xlane.xlu1 %1279 }
 0x1d4   : > { %v1106_v59 = vpop.xlane.xlu0 %1105  ;;  %v1370_v62 = vadd.f32 1e-12, %v1280_v58  ;;  %v1382_v4 = vadd.f32 1.0, %v1280_v58 }
 0x1d5   : > { %v1368_v60 = vadd.f32 1e-12, %v1106_v59  ;;  %v1380_v61 = vadd.f32 1.0, %v1106_v59 }
 0x1d7   : > { %4097 = vrsqrt.f32 %v1368_v60  ;;  %v1367_v0 = vpop.xlane.xlu1 %1366 }
 0x1d8   : > { %v1193_v63 = vpop.xlane.xlu0 %1192  ;;  %4099 = vrcp.f32 %v1380_v61  ;;  %v1371_v3 = vadd.f32 1e-12, %v1367_v0  ;;  %v1383_v5 = vadd.f32 1.0, %v1367_v0 }
 0x1d9   : > { %v1369_v1 = vadd.f32 1e-12, %v1193_v63  ;;  %v1381_v2 = vadd.f32 1.0, %v1193_v63  ;;  %4101 = vrsqrt.f32 %v1370_v62  ;;  %v1545_v62 = vpop.f32.mrf.mxu0 }
 0x1db   : > { %4103 = vrsqrt.f32 %v1369_v1 }
 0x1dc   : > { %4105 = vrcp.f32 %v1381_v2 }
 0x1dd   : > { %4107 = vrsqrt.f32 %v1371_v3 }
 0x1de   : > { %4109 = vrcp.f32 %v1382_v4 }
 0x1df   : > { %4111 = vrcp.f32 %v1383_v5 }
 0x1e4   : > { %v4098_v6 = vpop.eup %4097 }
 0x1e5   : > { %v1376_v7 = vmul.f32 %v4098_v6, %v1106_v59  ;;  %v4100_v8 = vpop.eup %4099 }
 0x1e6   : > { %v4102_v9 = vpop.eup %4101 }
 0x1e7   : > { %v1388_v10 = vmul.f32 %v4100_v8, %v1376_v7  ;;  %v1378_v14 = vmul.f32 %v4102_v9, %v1280_v58 }
 0x1e8   : > { %v4104_v11 = vpop.eup %4103 }
 0x1e9   : > { %v1377_v12 = vmul.f32 %v4104_v11, %v1193_v63  ;;  %1394 = vperm.xlu0 %4090, %v1388_v10   ;;  %v4106_v13 = vpop.eup %4105 }
 0x1ea   : > { %v4108_v16 = vpop.eup %4107 }
 0x1eb   : > { %v1389_v15 = vmul.f32 %v4106_v13, %v1377_v12  ;;  %v4110_v18 = vpop.eup %4109  ;;  %v1379_v23 = vmul.f32 %v4108_v16, %v1367_v0 }
 0x1ec   : > { %v1390_v24 = vmul.f32 %v4110_v18, %v1378_v14  ;;  %v4112_v25 = vpop.eup %4111 }
 0x1ed   : > { %1399 = vperm.xlu1 %4091, %v1389_v15   ;;  %v1391_v26 = vmul.f32 %v4112_v25, %v1379_v23 }
 0x1f1   : > { %1404 = vperm.xlu1 %4091, %v1390_v24  }
 0x1f5   : > { %1409 = vperm.xlu1 %4091, %v1391_v26  }
 0x207   : > { %v1099_v41 = vpop.f32.mrf.mxu1 }
 0x209   : > { %v3829_v42 = vpop.f32.mrf.mxu1 }
 0x20f   : > { %v1186_v43 = vpop.f32.mrf.mxu1 }
 0x211   : > { %v3840_v44 = vpop.f32.mrf.mxu1 }
 0x218   : > { %v1273_v45 = vpop.f32.mrf.mxu1 }
 0x21a   : > { %v3851_v46 = vpop.f32.mrf.mxu1 }
 0x220   : > { %v1360_v47 = vpop.f32.mrf.mxu1 }
 0x222   : > { %v3862_v48 = vpop.f32.mrf.mxu1 }
 0x264   : > { %v1395_v53 = vpop.permute.xlu0 %1394 }
 0x265   : > { %v5071_v58 = vmul.f32 %v1395_v53, %v1099_v41 }
 0x267   : > { %v1554_v63 = vmul.f32 %v1535_v54, %v5071_v58 }
 0x268   : > { %v1400_v55 = vpop.permute.xlu1 %1399 }
 0x269   : > { %v5073_v59 = vmul.f32 %v1400_v55, %v1186_v43  ;;  %v1559_v4 = vsel %vm1558_vm7, %v1554_v63, 0.0 }
 0x26b   : > { %v1555_v60 = vmul.f32 %v3867_v49, %v5073_v59 }
 0x26c   : > { %v1405_v61 = vpop.permute.xlu1 %1404 }
 0x26d   : > { %v5077_v0 = vmul.f32 %v1405_v61, %v1273_v45  ;;  %v1560_v2 = vsel %vm1558_vm7, %v1555_v60, 0.0 }
 0x26e   : > { %v1561_v7 = vadd.f32 %v1560_v2, %v1559_v4 }
 0x26f   : > { %v1556_v1 = vmul.f32 %v1545_v62, %v5077_v0 }
 0x270   : > { %v1410_v3 = vpop.permute.xlu1 %1409 }
 0x271   : > { %v1562_v5 = vsel %vm1558_vm7, %v1556_v1, 0.0  ;;  %v5083_v6 = vmul.f32 %v1410_v3, %v1360_v47 }
 0x272   : > { %v1563_v9 = vadd.f32 %v1562_v5, %v1561_v7 }
 0x273   : > { %v1557_v8 = vmul.f32 %v3870_v57, %v5083_v6 }
 0x275   : > { %v1564_v10 = vsel %vm1558_vm7, %v1557_v8, 0.0 }
 0x276   : > { %v1565_v11 = vadd.f32 %v1564_v10, %v1563_v9 }
 0x278   : > { %v1566_v12 = vrot.slane %v1565_v11, 4 }
 0x27a   : > { %v1567_v13 = vadd.f32 %v1566_v12, %v1565_v11 }
 0x27c   : > { %v1568_v14 = vrot.slane %v1567_v13, 2 }
 0x27e   : > { %v1569_v15 = vadd.f32 %v1568_v14, %v1567_v13 }
 0x280   : > { %v1570_v16 = vrot.slane %v1569_v15, 1 }
 0x282   : > { %v1571_v18 = vadd.f32 %v1570_v16, %v1569_v15 }
 0x284   : > { %v1572_v23 = vmul.f32 %v1571_v18, %v1571_v18 }
 0x286   : > { %3884 = vmatmul.mubr.msk.f32.vlgmr.msra.gmra.mxu0 %vm1558_vm7, %v1572_v23 }
 0x287   : > { %3910 = vmatpush3.msk.msra.mxu0 %vm1465_vm5, %v4893_v56 }
 0x288   : > { %3917 = vmatprep.subr.mxu0 %v4235_v19 }
 0x346   : > { %v1642_v24 = vpop.f32.mrf.mxu0 }
 0x347   : > { %v1646_v25 = vadd.f32 1e-12, %v1642_v24  ;;  %v1649_v26 = vadd.f32 1.0, %v1642_v24 }
 0x348   : > { %v3885_v27 = vpop.f32.mrf.mxu0 }
 0x349   : > { %4113 = vrsqrt.f32 %v1646_v25 }
 0x34a   : > { %4115 = vrcp.f32 %v1649_v26 }
 0x356   : > { %v4114_v29 = vpop.eup %4113 }
 0x357   : > { %v1648_v41 = vmul.f32 %v4114_v29, %v1642_v24  ;;  %v4116_v42 = vpop.eup %4115 }
 0x359   : > { %v1651_v43 = vmul.f32 %v4116_v42, %v1648_v41 }
 0x35b   : > { %3889 = vmatmul.mubr.msk.f32.vlgmr.msra.gmra.mxu1 %vm1461_vm2, %v1651_v43 }
 0x35c   : > { %3892 = vmatpush3.msk.msra.mxu1 %vm5000_vm13, %v4239_v32 }
 0x35d   : > { %3893 = vmatprep.subr.msk.mxu1 %vm5016_vm0, %v4239_v32 }
 0x35e   : > { %3894 = vmatpush3.msk.msra.mxu1 %vm5016_vm0, %v4239_v32 }
 0x35f   : > { %3895 = vmatprep.subr.msk.mxu1 %vm5032_vm6, %v4239_v32 }
 0x360   : > { %3896 = vmatpush3.msk.msra.mxu1 %vm5032_vm6, %v4239_v32 }
 0x361   : > { %3897 = vmatprep.subr.msk.mxu1 %vm5046_vm15, %v4239_v32 }
 0x362   : > { %3898 = vmatpush3.msk.msra.mxu1 %vm5046_vm15, %v4239_v32 }
 0x363   : > { %3899 = vmatprep.subr.msk.mxu1 %vm5053_vm3, %v4239_v32 }
 0x364   : > { %3900 = vmatpush3.msk.msra.mxu1 %vm5053_vm3, %v4239_v32 }
 0x365   : > { %3901 = vmatprep.subr.msk.mxu1 %vm5058_vm4, %v4239_v32 }
 0x366   : > { %3902 = vmatpush3.msk.msra.mxu1 %vm5058_vm4, %v4239_v32 }
 0x367   : > { %3932 = vmatprep.subr.mxu1 %v4235_v19 }
 0x41b   : > { %v1721_v44 = vpop.f32.mrf.mxu1 }
 0x41c   : > { %v1725_v45 = vmul.f32 %v1721_v44, %v1571_v18 }
 0x41d   : > { %v3890_v46 = vpop.f32.mrf.mxu1 }
 0x41e   : > { %v1729_v47 = vrot.slane %v1725_v45, %v4912_v17 }
 0x420   : > { %v1731_v48 = vmul.f32 %v1729_v47, %v5073_v59  ;;  %v1730_v49 = vmul.f32 %v1729_v47, %v5071_v58  ;;  %v1732_v53 = vmul.f32 %v1729_v47, %v5077_v0  ;;  %v1733_v54 = vmul.f32 %v1729_v47, %v5083_v6 }
 0x422   : > { %3903 = vmatprep.mubr.msk.f32.mxu1 %vm1558_vm7, %v1730_v49 }
 0x423   : > { %3904 = vmatmul.mubr.msk.f32.vlgmr.msra.gmra.mxu1 %vm1558_vm7, %v1731_v48 }
 0x424   : > { %3906 = vmatprep.mubr.msk.f32.mxu1 %vm1558_vm7, %v1732_v53  ;;  %3933 = vmatpush3.msk.msra.mxu1 %vm1465_vm5, %v4893_v56 }
 0x425   : > { %3937 = vmatprep.subr.msk.mxu1 %vm5000_vm13, %v4239_v32 }
 0x427   : > { %3907 = vmatmul.mubr.msk.f32.gmra.mxu1 %vm1558_vm7, %v1733_v54 }
 0x428   : > { %3934 = vmatprep.mubr.msk.f32.mxu1 %vm4236_vm1, %v4235_v19 }
 0x4e3   : > { %v5142_v55 = vpop.f32.mrf.mxu1 }
 0x4e4   : > { %v1832_v63 = vsel %vm1461_vm2, %v5142_v55, -inf }
 0x4e5   : > { %v5144_v57 = vpop.f32.mrf.mxu1 }
 0x4e6   : > { %v1831_v61 = vsel %vm1461_vm2, %v5144_v57, -inf }
 0x4e7   : > { %v5146_v60 = vpop.f32.mrf.mxu1  ;;  %v1835_v3 = vmax.f32 %v1831_v61, %v1832_v63 }
 0x4e8   : > { %v1834_v1 = vsel %vm1461_vm2, %v5146_v60, -inf }
 0x4e9   : > { %v5150_v62 = vpop.f32.mrf.mxu1 }
 0x4ea   : > { %v1833_v2 = vsel %vm1461_vm2, %v5150_v62, -inf }
 0x4eb   : > { %v1836_v4 = vmax.f32 %v1833_v2, %v1834_v1 }
 0x4ed   : > { %v1837_v5 = vmax.f32 %v1835_v3, %v1836_v4 }
 0x4ef   : > { %v1838_v7 = vrot.slane %v1837_v5, 4 }
 0x4f1   : > { %v1839_v8 = vmax.f32 %v1837_v5, %v1838_v7 }
 0x4f3   : > { %v1840_v9 = vrot.slane %v1839_v8, 2 }
 0x4f5   : > { %v1841_v10 = vmax.f32 %v1839_v8, %v1840_v9 }
 0x4f7   : > { %v1842_v11 = vrot.slane %v1841_v10, 1 }
 0x4f9   : > { %v1843_v12 = vmax.f32 %v1841_v10, %v1842_v11 }
 0x4fb   : > { %v1844_v13 = vsub.f32 %v5144_v57, %v1843_v12  ;;  %v1845_v14 = vsub.f32 %v5142_v55, %v1843_v12  ;;  %v1846_v15 = vsub.f32 %v5150_v62, %v1843_v12  ;;  %v1847_v16 = vsub.f32 %v5146_v60, %v1843_v12 }
 0x4fd   : > { %v1848_v18 = vmul.f32 1.442695, %v1844_v13  ;;  %v1850_v23 = vmul.f32 1.442695, %v1845_v14  ;;  %v1852_v24 = vmul.f32 1.442695, %v1846_v15 }
 0x4fe   : > { %v1854_v25 = vmul.f32 1.442695, %v1847_v16 }
 0x4ff   : > { %4117 = vpow2.f32 %v1848_v18 }
 0x500   : > { %4119 = vpow2.f32 %v1850_v23 }
 0x501   : > { %4121 = vpow2.f32 %v1852_v24 }
 0x502   : > { %4123 = vpow2.f32 %v1854_v25 }
 0x50c   : > { %v4118_v26 = vpop.eup %4117 }
 0x50d   : > { %v4120_v27 = vpop.eup %4119  ;;  %v1856_v29 = vsel %vm1461_vm2, %v4118_v26, 0.0 }
 0x50e   : > { %v4122_v41 = vpop.eup %4121  ;;  %v1857_v42 = vsel %vm1461_vm2, %v4120_v27, 0.0 }
 0x50f   : > { %v4124_v43 = vpop.eup %4123  ;;  %v1858_v44 = vadd.f32 %v1857_v42, %v1856_v29  ;;  %v1859_v45 = vsel %vm1461_vm2, %v4122_v41, 0.0 }
 0x510   : > { %v1861_v47 = vsel %vm1461_vm2, %v4124_v43, 0.0 }
 0x511   : > { %v1860_v46 = vadd.f32 %v1859_v45, %v1858_v44 }
 0x513   : > { %v1862_v48 = vadd.f32 %v1861_v47, %v1860_v46 }
 0x515   : > { %v1863_v49 = vrot.slane %v1862_v48, 4 }
 0x517   : > { %v1864_v53 = vadd.f32 %v1863_v49, %v1862_v48 }
 0x519   : > { %v1865_v54 = vrot.slane %v1864_v53, 2 }
 0x51b   : > { %v1866_v61 = vadd.f32 %v1865_v54, %v1864_v53 }
 0x51d   : > { %v1867_v63 = vrot.slane %v1866_v61, 1 }
 0x51f   : > { %v1868_v1 = vadd.f32 %v1867_v63, %v1866_v61 }
 0x521   : > { %4125 = vrcp.f32 %v1868_v1 }
 0x52e   : > { %v4126_v2 = vpop.eup %4125 }
 0x52f   : > { %v1870_v3 = vmul.f32 %v4126_v2, %v4118_v26  ;;  %v1871_v4 = vmul.f32 %v4126_v2, %v4120_v27  ;;  %v1872_v5 = vmul.f32 %v4126_v2, %v4122_v41  ;;  %v1873_v7 = vmul.f32 %v4126_v2, %v4124_v43 }
 0x531   : > { %3911 = vmatprep.mubr.msk.f32.mxu0 %vm1461_vm2, %v1870_v3 }
 0x532   : > { %3912 = vmatmul.mubr.msk.f32.vlgmr.msra.gmra.mxu0 %vm1461_vm2, %v1871_v4 }
 0x533   : > { %3914 = vmatprep.mubr.msk.f32.mxu0 %vm1461_vm2, %v1872_v5  ;;  %3918 = vmatpush3.msk.msra.mxu0 %vm5000_vm13, %v4239_v32 }
 0x534   : > { %3919 = vmatprep.subr.mxu0 %v4235_v19 }
 0x535   : > { %3920 = vmatpush3.msk.msra.mxu0 %vm5016_vm0, %v4239_v32 }
 0x536   : > { %3915 = vmatmul.mubr.msk.f32.gmra.mxu0 %vm1461_vm2, %v1873_v7  ;;  %3921 = vmatprep.subr.mxu0 %v4235_v19 }
 0x537   : > { %3922 = vmatpush3.msk.msra.mxu0 %vm5032_vm6, %v4239_v32  ;;  %3929 = vmatprep.mubr.msk.f32.mxu0 %vm4236_vm1, %v4235_v19 }
 0x538   : > { %3923 = vmatprep.subr.mxu0 %v4235_v19 }
 0x539   : > { %3924 = vmatpush3.msk.msra.mxu0 %vm5046_vm15, %v4239_v32 }
 0x53a   : > { %3925 = vmatprep.subr.mxu0 %v4235_v19 }
 0x53b   : > { %3926 = vmatpush3.msk.msra.mxu0 %vm5053_vm3, %v4239_v32 }
 0x53c   : > { %3927 = vmatprep.subr.mxu0 %v4235_v19 }
 0x53d   : > { %3928 = vmatpush3.msk.msra.mxu0 %vm5058_vm4, %v4239_v32 }
 0x53e   : > { %3955 = vmatprep.subr.msk.mxu0 %vm1465_vm5, %v4893_v56 }
 0x5f2   : > { %v3913_v8 = vpop.f32.mrf.mxu0 }
 0x5f3   : > { %v1972_v10 = vmul.f32 %v3913_v8, %v5073_v59 }
 0x5f4   : > { %v1952_v9 = vpop.f32.mrf.mxu0 }
 0x5f5   : > { %v1971_v11 = vmul.f32 %v1952_v9, %v5071_v58  ;;  %v1976_v15 = vsel %vm1558_vm7, %v1972_v10, 0.0 }
 0x5f6   : > { %v3916_v12 = vpop.f32.mrf.mxu0 }
 0x5f7   : > { %v1975_v13 = vsel %vm1558_vm7, %v1971_v11, 0.0  ;;  %v1974_v16 = vmul.f32 %v3916_v12, %v5083_v6 }
 0x5f8   : > { %v1962_v14 = vpop.f32.mrf.mxu0  ;;  %v1977_v23 = vadd.f32 %v1976_v15, %v1975_v13 }
 0x5f9   : > { %v1973_v18 = vmul.f32 %v1962_v14, %v5077_v0  ;;  %v1980_v26 = vsel %vm1558_vm7, %v1974_v16, 0.0 }
 0x5fb   : > { %v1978_v24 = vsel %vm1558_vm7, %v1973_v18, 0.0 }
 0x5fc   : > { %v1979_v25 = vadd.f32 %v1978_v24, %v1977_v23 }
 0x5fe   : > { %v1981_v27 = vadd.f32 %v1980_v26, %v1979_v25 }
 0x600   : > { %v1982_v29 = vrot.slane %v1981_v27, 4 }
 0x602   : > { %v1983_v41 = vadd.f32 %v1982_v29, %v1981_v27 }
 0x604   : > { %v1984_v42 = vrot.slane %v1983_v41, 2 }
 0x606   : > { %v1985_v43 = vadd.f32 %v1984_v42, %v1983_v41 }
 0x608   : > { %v1986_v44 = vrot.slane %v1985_v43, 1 }
 0x60a   : > { %v1987_v45 = vadd.f32 %v1986_v44, %v1985_v43 }
 0x60c   : > { %v1988_v46 = vmul.f32 %v1987_v45, %v1987_v45 }
 0x60e   : > { %3930 = vmatmul.mubr.msk.f32.vlgmr.msra.gmra.mxu0 %vm1558_vm7, %v1988_v46 }
 0x60f   : > { %3956 = vmatpush3.msk.msra.mxu0 %vm1465_vm5, %v4893_v56 }
 0x610   : > { %3963 = vmatprep.subr.mxu0 %v4235_v19 }
 0x6ce   : > { %v2058_v47 = vpop.f32.mrf.mxu0 }
 0x6cf   : > { %v2062_v48 = vadd.f32 1e-12, %v2058_v47  ;;  %v2065_v49 = vadd.f32 1.0, %v2058_v47 }
 0x6d0   : > { %v3931_v53 = vpop.f32.mrf.mxu0 }
 0x6d1   : > { %4127 = vrsqrt.f32 %v2062_v48 }
 0x6d2   : > { %4129 = vrcp.f32 %v2065_v49 }
 0x6de   : > { %v4128_v54 = vpop.eup %4127 }
 0x6df   : > { %v2064_v61 = vmul.f32 %v4128_v54, %v2058_v47  ;;  %v4130_v63 = vpop.eup %4129 }
 0x6e1   : > { %v2067_v1 = vmul.f32 %v4130_v63, %v2064_v61 }
 0x6e3   : > { %3935 = vmatmul.mubr.msk.f32.vlgmr.msra.gmra.mxu1 %vm1461_vm2, %v2067_v1 }
 0x6e4   : > { %3938 = vmatpush3.msk.msra.mxu1 %vm5000_vm13, %v4239_v32 }
 0x6e5   : > { %3939 = vmatprep.subr.msk.mxu1 %vm5016_vm0, %v4239_v32 }
 0x6e6   : > { %3940 = vmatpush3.msk.msra.mxu1 %vm5016_vm0, %v4239_v32 }
 0x6e7   : > { %3941 = vmatprep.subr.msk.mxu1 %vm5032_vm6, %v4239_v32 }
 0x6e8   : > { %3942 = vmatpush3.msk.msra.mxu1 %vm5032_vm6, %v4239_v32 }
 0x6e9   : > { %3943 = vmatprep.subr.msk.mxu1 %vm5046_vm15, %v4239_v32 }
 0x6ea   : > { %3944 = vmatpush3.msk.msra.mxu1 %vm5046_vm15, %v4239_v32 }
 0x6eb   : > { %3945 = vmatprep.subr.msk.mxu1 %vm5053_vm3, %v4239_v32 }
 0x6ec   : > { %3946 = vmatpush3.msk.msra.mxu1 %vm5053_vm3, %v4239_v32 }
 0x6ed   : > { %3947 = vmatprep.subr.msk.mxu1 %vm5058_vm4, %v4239_v32 }
 0x6ee   : > { %3948 = vmatpush3.msk.msra.mxu1 %vm5058_vm4, %v4239_v32 }
 0x6ef   : > { %3978 = vmatprep.subr.mxu1 %v4235_v19 }
 0x7a3   : > { %v2137_v2 = vpop.f32.mrf.mxu1 }
 0x7a4   : > { %v2141_v3 = vmul.f32 %v2137_v2, %v1987_v45 }
 0x7a5   : > { %v3936_v4 = vpop.f32.mrf.mxu1 }
 0x7a6   : > { %v2145_v5 = vrot.slane %v2141_v3, %v4912_v17 }
 0x7a8   : > { %v2147_v7 = vmul.f32 %v2145_v5, %v5073_v59  ;;  %v2146_v8 = vmul.f32 %v2145_v5, %v5071_v58  ;;  %v2148_v9 = vmul.f32 %v2145_v5, %v5077_v0  ;;  %v2149_v10 = vmul.f32 %v2145_v5, %v5083_v6 }
 0x7aa   : > { %3949 = vmatprep.mubr.msk.f32.mxu1 %vm1558_vm7, %v2146_v8 }
 0x7ab   : > { %3950 = vmatmul.mubr.msk.f32.vlgmr.msra.gmra.mxu1 %vm1558_vm7, %v2147_v7 }
 0x7ac   : > { %3952 = vmatprep.mubr.msk.f32.mxu1 %vm1558_vm7, %v2148_v9  ;;  %3979 = vmatpush3.msk.msra.mxu1 %vm1465_vm5, %v4893_v56 }
 0x7ad   : > { %3998 = vmatprep.subr.mxu1 %v4235_v19 }
 0x7af   : > { %3953 = vmatmul.mubr.msk.f32.gmra.mxu1 %vm1558_vm7, %v2149_v10 }
 0x7b0   : > { %3980 = vmatprep.mubr.msk.f32.mxu1 %vm4236_vm1, %v4235_v19 }
 0x86b   : > { %v3951_v11 = vpop.f32.mrf.mxu1 }
 0x86c   : > { %v2248_v15 = vadd.f32 %v3951_v11, %v5142_v55 }
 0x86d   : > { %v2228_v12 = vpop.f32.mrf.mxu1 }
 0x86e   : > { %v2247_v13 = vadd.f32 %v2228_v12, %v5144_v57  ;;  %v2252_v24 = vsel %vm1461_vm2, %v2248_v15, -inf }
 0x86f   : > { %v3954_v14 = vpop.f32.mrf.mxu1 }
 0x870   : > { %v2250_v16 = vadd.f32 %v3954_v14, %v5146_v60  ;;  %v2251_v56 = vsel %vm1461_vm2, %v2247_v13, -inf }
 0x871   : > { %v2238_v18 = vpop.f32.mrf.mxu1  ;;  %v2255_v27 = vmax.f32 %v2251_v56, %v2252_v24 }
 0x872   : > { %v2249_v23 = vadd.f32 %v2238_v18, %v5150_v62  ;;  %v2254_v25 = vsel %vm1461_vm2, %v2250_v16, -inf }
 0x874   : > { %v2253_v26 = vsel %vm1461_vm2, %v2249_v23, -inf }
 0x875   : > { %v2256_v29 = vmax.f32 %v2253_v26, %v2254_v25 }
 0x877   : > { %v2257_v41 = vmax.f32 %v2255_v27, %v2256_v29 }
 0x879   : > { %v2258_v57 = vrot.slane %v2257_v41, 4 }
 0x87b   : > { %v2259_v42 = vmax.f32 %v2257_v41, %v2258_v57 }
 0x87d   : > { %v2260_v43 = vrot.slane %v2259_v42, 2 }
 0x87f   : > { %v2261_v55 = vmax.f32 %v2259_v42, %v2260_v43 }
 0x881   : > { %v2262_v44 = vrot.slane %v2261_v55, 1 }
 0x883   : > { %v2263_v60 = vmax.f32 %v2261_v55, %v2262_v44 }
 0x885   : > { %v2264_v45 = vsub.f32 %v2247_v13, %v2263_v60  ;;  %v2265_v46 = vsub.f32 %v2248_v15, %v2263_v60  ;;  %v2266_v47 = vsub.f32 %v2249_v23, %v2263_v60  ;;  %v2267_v48 = vsub.f32 %v2250_v16, %v2263_v60 }
 0x887   : > { %v2268_v62 = vmul.f32 1.442695, %v2264_v45  ;;  %v2270_v49 = vmul.f32 1.442695, %v2265_v46  ;;  %v2272_v53 = vmul.f32 1.442695, %v2266_v47 }
 0x888   : > { %v2274_v54 = vmul.f32 1.442695, %v2267_v48 }
 0x889   : > { %4131 = vpow2.f32 %v2268_v62 }
 0x88a   : > { %4133 = vpow2.f32 %v2270_v49 }
 0x88b   : > { %4135 = vpow2.f32 %v2272_v53 }
 0x88c   : > { %4137 = vpow2.f32 %v2274_v54 }
 0x896   : > { %v4132_v61 = vpop.eup %4131 }
 0x897   : > { %v4134_v63 = vpop.eup %4133  ;;  %v2276_v1 = vsel %vm1461_vm2, %v4132_v61, 0.0 }
 0x898   : > { %v4136_v2 = vpop.eup %4135  ;;  %v2277_v3 = vsel %vm1461_vm2, %v4134_v63, 0.0 }
 0x899   : > { %v4138_v4 = vpop.eup %4137  ;;  %v2278_v5 = vadd.f32 %v2277_v3, %v2276_v1  ;;  %v2279_v7 = vsel %vm1461_vm2, %v4136_v2, 0.0  ;;  %v2569_v1 = vmul.u32 24, %v4886_v52  ;;  %v2681_v3 = vld [vmem:[%s5643_s4 + $0x28] sm:$0xff]  ;;  %v2680_v52 = vld [vmem:[%s5643_s4 + $0x20] sm:$0xff] }
 0x89a   : > { %v2281_v9 = vsel %vm1461_vm2, %v4138_v4, 0.0 }
 0x89b   : > { %v2280_v8 = vadd.f32 %v2279_v7, %v2278_v5  ;;  %vm2575_vm5 = vcmp.ge.s32.totalorder %v4993_v28, %v2569_v1  ;;  %vm2573_vm9 = vcmp.ge.s32.totalorder %v5010_v33, %v2569_v1  ;;  %vm2572_vm14 = vcmp.ge.s32.totalorder %v5026_v35, %v2569_v1 }
 0x89d   : > { %v2282_v10 = vadd.f32 %v2281_v9, %v2280_v8 }
 0x89f   : > { %v2283_v11 = vrot.slane %v2282_v10, 4 }
 0x8a1   : > { %v2284_v12 = vadd.f32 %v2283_v11, %v2282_v10 }
 0x8a3   : > { %v2285_v13 = vrot.slane %v2284_v12, 2 }
 0x8a5   : > { %v2286_v14 = vadd.f32 %v2285_v13, %v2284_v12  ;;  %v2757_v13 = vld [vmem:[%s5645_s6 + $0x18] sm:$0xff] }
 0x8a7   : > { %v2287_v15 = vrot.slane %v2286_v14, 1 }
 0x8a9   : > { %v2288_v16 = vadd.f32 %v2287_v15, %v2286_v14  ;;  %v2755_v14 = vld [vmem:[%s5645_s6 + $0x8] sm:$0xff]  ;;  %v2754_v15 = vld [vmem:[%s5645_s6] sm:$0xff] }
 0x8ab   : > { %4139 = vrcp.f32 %v2288_v16  ;;  %v2883_v16 = vld [vmem:[%s5647_s8 + $0x190] sm:$0xff] }
 0x8b8   : > { %v4140_v18 = vpop.eup %4139 }
 0x8b9   : > { %v2290_v56 = vmul.f32 %v4140_v18, %v4132_v61  ;;  %v2291_v23 = vmul.f32 %v4140_v18, %v4134_v63  ;;  %v2292_v24 = vmul.f32 %v4140_v18, %v4136_v2  ;;  %v2293_v25 = vmul.f32 %v4140_v18, %v4138_v4  ;;  %v2885_v18 = vld [vmem:[%s5647_s8 + $0x1a0] sm:$0xff] }
 0x8ba   : > { %v2576_v2 = vadd.s32 24, %v2569_v1 }
 0x8bb   : > { %3957 = vmatprep.mubr.msk.f32.mxu0 %vm1461_vm2, %v2290_v56  ;;  %v2882_v56 = vld [vmem:[%s5647_s8 + $0x188] sm:$0xff] }
 0x8bc   : > { %3958 = vmatmul.mubr.msk.f32.vlgmr.msra.gmra.mxu0 %vm1461_vm2, %v2291_v23  ;;  %vm2580_vm11 = vcmp.lt.s32.totalorder %v5010_v33, %v2576_v2  ;;  %v2677_v33 = vld [vmem:[%s5643_s4 + $0x8] sm:$0xff]  ;;  %v2876_v23 = vld [vmem:[%s5647_s8 + $0x158] sm:$0xff] }
 0x8bd   : > { %3960 = vmatprep.mubr.msk.f32.mxu0 %vm1461_vm2, %v2292_v24  ;;  %3964 = vmatpush3.msk.msra.mxu0 %vm5000_vm13, %v4239_v32  ;;  %vm2582_vm13 = vcmp.lt.s32.totalorder %v4993_v28, %v2576_v2  ;;  %vm2586_vm12 = vmand %vm2573_vm9, %vm2580_vm11  ;;  %v2679_v28 = vld [vmem:[%s5643_s4 + $0x18] sm:$0xff]  ;;  %v2875_v24 = vld [vmem:[%s5647_s8 + $0x150] sm:$0xff] }
 0x8be   : > { %3965 = vmatprep.subr.mxu0 %v4235_v19 }
 0x8bf   : > { %3966 = vmatpush3.msk.msra.mxu0 %vm5016_vm0, %v4239_v32  ;;  %vm2588_vm0 = vmand %vm2575_vm5, %vm2582_vm13  ;;  %vm2578_vm5 = vcmp.lt.s32.totalorder %v5029_v36, %v2576_v2 }
 0x8c0   : > { %3961 = vmatmul.mubr.msk.f32.gmra.mxu0 %vm1461_vm2, %v2293_v25  ;;  %3967 = vmatprep.subr.mxu0 %v4235_v19  ;;  %v2869_v25 = vld [vmem:[%s5647_s8 + $0x120] sm:$0xff] }
 0x8c1   : > { %3968 = vmatpush3.msk.msra.mxu0 %vm5032_vm6, %v4239_v32  ;;  %3975 = vmatprep.mubr.msk.f32.mxu0 %vm4236_vm1, %v4235_v19  ;;  %vm2581_vm6 = vcmp.lt.s32.totalorder %v4998_v30, %v2576_v2 }
 0x8c2   : > { %3969 = vmatprep.subr.mxu0 %v4235_v19 }
 0x8c3   : > { %3970 = vmatpush3.msk.msra.mxu0 %vm5046_vm15, %v4239_v32  ;;  %vm2579_vm15 = vcmp.lt.s32.totalorder %v5026_v35, %v2576_v2  ;;  %v2676_v35 = vld [vmem:[%s5643_s4] sm:$0xff] }
 0x8c4   : > { %3971 = vmatprep.subr.mxu0 %v4235_v19 }
 0x8c5   : > { %3972 = vmatpush3.msk.msra.mxu0 %vm5053_vm3, %v4239_v32  ;;  %vm2585_vm3 = vmand %vm2572_vm14, %vm2579_vm15 }
 0x8c6   : > { %3973 = vmatprep.subr.mxu0 %v4235_v19 }
 0x8c7   : > { %3974 = vmatpush3.msk.msra.mxu0 %vm5058_vm4, %v4239_v32  ;;  %vm2571_vm4 = vcmp.ge.s32.totalorder %v5029_v36, %v2569_v1 }
 0x8c8   : > { %3983 = vmatprep.subr.mxu0 %v4235_v19  ;;  %vm2584_vm13 = vmand %vm2571_vm4, %vm2578_vm5 }
 0x97c   : > { %v3959_v31 = vpop.f32.mrf.mxu0 }
 0x97d   : > { %v2392_v37 = vmul.f32 %v3959_v31, %v5073_v59  ;;  %v2868_v31 = vld [vmem:[%s5647_s8 + $0x118] sm:$0xff] }
 0x97e   : > { %v2372_v34 = vpop.f32.mrf.mxu0 }
 0x97f   : > { %v2391_v38 = vmul.f32 %v2372_v34, %v5071_v58  ;;  %v2396_v39 = vsel %vm1558_vm7, %v2392_v37, 0.0  ;;  %v2862_v34 = vld [vmem:[%s5647_s8 + $0xe8] sm:$0xff]  ;;  %v2861_v37 = vld [vmem:[%s5647_s8 + $0xe0] sm:$0xff] }
 0x980   : > { %v3962_v26 = vpop.f32.mrf.mxu0 }
 0x981   : > { %v2395_v27 = vsel %vm1558_vm7, %v2391_v38, 0.0  ;;  %v2394_v41 = vmul.f32 %v3962_v26, %v5083_v6  ;;  %v2855_v38 = vld [vmem:[%s5647_s8 + $0xb0] sm:$0xff]  ;;  %v2854_v26 = vld [vmem:[%s5647_s8 + $0xa8] sm:$0xff] }
 0x982   : > { %v2382_v29 = vpop.f32.mrf.mxu0  ;;  %v2397_v40 = vadd.f32 %v2396_v39, %v2395_v27  ;;  %v2848_v27 = vld [vmem:[%s5647_s8 + $0x78] sm:$0xff]  ;;  %v2682_v39 = vld [vmem:[%s5644_s5] sm:$0x1] }
 0x983   : > { %v2393_v57 = vmul.f32 %v2382_v29, %v5077_v0  ;;  %v2400_v55 = vsel %vm1558_vm7, %v2394_v41, 0.0  ;;  %v2847_v29 = vld [vmem:[%s5647_s8 + $0x70] sm:$0xff] }
 0x985   : > { %v2398_v42 = vsel %vm1558_vm7, %v2393_v57, 0.0 }
 0x986   : > { %v2399_v43 = vadd.f32 %v2398_v42, %v2397_v40 }
 0x988   : > { %v2401_v44 = vadd.f32 %v2400_v55, %v2399_v43 }
 0x98a   : > { %v2402_v59 = vrot.slane %v2401_v44, 4 }
 0x98c   : > { %v2403_v60 = vadd.f32 %v2402_v59, %v2401_v44  ;;  %v2884_v44 = vld [vmem:[%s5647_s8 + $0x198] sm:$0xff]  ;;  %v2878_v59 = vld [vmem:[%s5647_s8 + $0x168] sm:$0xff] }
 0x98e   : > { %v2404_v58 = vrot.slane %v2403_v60, 2 }
 0x990   : > { %v2405_v45 = vadd.f32 %v2404_v58, %v2403_v60  ;;  %v2877_v60 = vld [vmem:[%s5647_s8 + $0x160] sm:$0xff]  ;;  %v2871_v58 = vld [vmem:[%s5647_s8 + $0x130] sm:$0xff] }
 0x992   : > { %v2406_v46 = vrot.slane %v2405_v45, 1 }
 0x994   : > { %v5308_v47 = vadd.f32 %v2406_v46, %v2405_v45  ;;  %v2870_v45 = vld [vmem:[%s5647_s8 + $0x128] sm:$0xff]  ;;  %v2864_v46 = vld [vmem:[%s5647_s8 + $0xf8] sm:$0xff] }
 0x996   : > { %v2408_v48 = vmul.f32 %v5308_v47, %v5308_v47 }
 0x998   : > { %3976 = vmatmul.mubr.msk.f32.vlgmr.msra.gmra.mxu0 %vm1558_vm7, %v2408_v48  ;;  %v2857_v48 = vld [vmem:[%s5647_s8 + $0xc0] sm:$0xff] }
 0x999   : > { %3995 = vmatprep.mubr.msk.f32.mxu0 %vm4236_vm1, %v4235_v19  ;;  %3984 = vmatpush3.msk.msra.mxu0 %vm2588_vm0, %v4239_v32  ;;  %vm2570_vm0 = vcmp.ge.s32.totalorder %v4883_v51, %v2569_v1 }
 0x99a   : > { %3985 = vmatprep.subr.mxu0 %v4235_v19 }
 0xa58   : > { %v2478_v0 = vpop.f32.mrf.mxu0 }
 0xa59   : > { %v2482_v6 = vadd.f32 1e-12, %v2478_v0  ;;  %v2485_v62 = vadd.f32 1.0, %v2478_v0 }
 0xa5a   : > { %v3977_v49 = vpop.f32.mrf.mxu0 }
 0xa5b   : > { %4141 = vrsqrt.f32 %v2482_v6  ;;  %v2850_v6 = vld [vmem:[%s5647_s8 + $0x88] sm:$0xff]  ;;  %v2841_v49 = vld [vmem:[%s5647_s8 + $0x40] sm:$0xff] }
 0xa5c   : > { %4143 = vrcp.f32 %v2485_v62  ;;  %v2849_v62 = vld [vmem:[%s5647_s8 + $0x80] sm:$0xff] }
 0xa68   : > { %v4142_v53 = vpop.eup %4141 }
 0xa69   : > { %v2484_v54 = vmul.f32 %v4142_v53, %v2478_v0  ;;  %v4144_v61 = vpop.eup %4143  ;;  %v2856_v0 = vld [vmem:[%s5647_s8 + $0xb8] sm:$0xff]  ;;  %v2843_v53 = vld [vmem:[%s5647_s8 + $0x50] sm:$0xff] }
 0xa6b   : > { %v2487_v63 = vmul.f32 %v4144_v61, %v2484_v54  ;;  %v2840_v54 = vld [vmem:[%s5647_s8 + $0x38] sm:$0xff]  ;;  %v2842_v61 = vld [vmem:[%s5647_s8 + $0x48] sm:$0xff] }
 0xa6d   : > { %3981 = vmatmul.mubr.msk.f32.vlgmr.msra.gmra.mxu1 %vm1461_vm2, %v2487_v63  ;;  %vm2574_vm2 = vcmp.ge.s32.totalorder %v4998_v30, %v2569_v1  ;;  %v2678_v30 = vld [vmem:[%s5643_s4 + $0x10] sm:$0xff]  ;;  %v2834_v63 = vld [vmem:[%s5647_s8 + $0x8] sm:$0xff]  ;;  %v2836_v1 = vld [vmem:[%s5647_s8 + $0x18] sm:$0xff] }
 0xa6e   : > { %4010 = vmatprep.mubr.msk.f32.mxu1 %vm4236_vm1, %v4235_v19  ;;  %3999 = vmatpush3.msra.mxu1 %v2681_v3  ;;  %vm2587_vm8 = vmand %vm2574_vm2, %vm2581_vm6  ;;  %vm2577_vm2 = vcmp.lt.s32.totalorder %v4883_v51, %v2576_v2  ;;  %v2833_v2 = vld [vmem:[%s5647_s8] sm:$0xff]  ;;  %v2835_v3 = vld [vmem:[%s5647_s8 + $0x10] sm:$0xff] }
 0xa6f   : > { %4000 = vmatprep.subr.mxu1 %v4235_v19  ;;  %3986 = vmatpush3.msk.msra.mxu0 %vm2587_vm8, %v4239_v32  ;;  %vm2583_vm6 = vmand %vm2570_vm0, %vm2577_vm2 }
 0xa70   : > { %4001 = vmatpush3.msra.mxu1 %v2680_v52  ;;  %3987 = vmatprep.subr.mxu0 %v4235_v19  ;;  %v2887_v52 = vld [vmem:[%s5647_s8 + $0x1b0] sm:$0xff] }
 0xa71   : > { %4002 = vmatprep.subr.mxu1 %v4235_v19  ;;  %3988 = vmatpush3.msk.msra.mxu0 %vm2586_vm12, %v4239_v32 }
 0xa72   : > { %4003 = vmatpush3.msra.mxu1 %v2679_v28  ;;  %3989 = vmatprep.subr.mxu0 %v4235_v19  ;;  %v2758_v28 = vld [vmem:[%s5646_s7] sm:$0x1] }
 0xa73   : > { %4004 = vmatprep.subr.mxu1 %v4235_v19  ;;  %3990 = vmatpush3.msk.msra.mxu0 %vm2585_vm3, %v4239_v32 }
 0xa74   : > { %4005 = vmatpush3.msra.mxu1 %v2678_v30  ;;  %3991 = vmatprep.subr.mxu0 %v4235_v19 }
 0xa75   : > { %4006 = vmatprep.subr.mxu1 %v4235_v19  ;;  %3992 = vmatpush3.msk.msra.mxu0 %vm2584_vm13, %v4239_v32 }
 0xa76   : > { %4007 = vmatpush3.msra.mxu1 %v2677_v33  ;;  %3993 = vmatprep.subr.mxu0 %v4235_v19 }
 0xa77   : > { %4008 = vmatprep.subr.mxu1 %v4235_v19  ;;  %3994 = vmatpush3.msk.msra.mxu0 %vm2583_vm6, %v4239_v32  ;;  %v2756_v32 = vld [vmem:[%s5645_s6 + $0x10] sm:$0xff] }
 0xa78   : > { %4009 = vmatpush3.msra.mxu1 %v2676_v35  ;;  %4013 = vmatprep.subr.mxu0 %v4235_v19 }
 0xa79   : > { %2946 = vmatprep.subr.mxu1 %v2883_v16  ;;  %v2858_v16 = vld [vmem:[%s5647_s8 + $0xc8] sm:$0xff] }
 0xb2d   : > { %v2557_v36 = vpop.f32.mrf.mxu1 }
 0xb2e   : > { %v2561_v4 = vmul.f32 %v2557_v36, %v5308_v47  ;;  %v2863_v47 = vld [vmem:[%s5647_s8 + $0xf0] sm:$0xff] }
 0xb2f   : > { %v3982_v5 = vpop.f32.mrf.mxu1 }
 0xb30   : > { %v3501_v7 = vadd.f32 -1.0, %v2561_v4  ;;  %v2563_v8 = vmul.f32 0.05, %v2561_v4  ;;  %vm2562_vm8 = vcmp.ge.f32.partialorder %v2561_v4, 0.0  ;;  %v2888_v5 = vld [vmem:[%s5647_s8 + $0x1b8] sm:$0xff] }
 0xb32   : > { %v2566_v9 = vmax.f32 %v3501_v7, 0.0  ;;  %v2564_v11 = vsel %vm2562_vm8, %v2561_v4, %v2563_v8  ;;  %v2886_v4 = vld [vmem:[%s5647_s8 + $0x1a8] sm:$0xff]  ;;  %v2880_v7 = vld [vmem:[%s5647_s8 + $0x178] sm:$0xff]  ;;  %v2879_v8 = vld [vmem:[%s5647_s8 + $0x170] sm:$0xff] }
 0xb34   : > { %v2567_v10 = vmul.f32 0.95, %v2566_v9  ;;  %v2881_v9 = vld [vmem:[%s5647_s8 + $0x180] sm:$0xff] }
 0xb36   : > { %v2568_v12 = vsub.f32 %v2564_v11, %v2567_v10  ;;  %v2873_v10 = vld [vmem:[%s5647_s8 + $0x140] sm:$0xff]  ;;  %v2872_v11 = vld [vmem:[%s5647_s8 + $0x138] sm:$0xff] }
 0xb38   : > { %3996 = vmatmul.mubr.msk.f32.vlgmr.msra.gmra.mxu0 %vm1558_vm7, %v2568_v12  ;;  %4011 = vmatmul.mubr.msk.f32.vlgmr.msra.gmra.mxu1 %vm1558_vm7, %v2568_v12  ;;  %vm2674_vm7 = vcmask 8192   ;;  %v2874_v12 = vld [vmem:[%s5647_s8 + $0x148] sm:$0xff] }
 0xb39   : > { %4014 = vmatpush3.msra.mxu0 %v2757_v13  ;;  %4021 = vmatprep.mubr.msk.f32.mxu0 %vm4236_vm1, %v4235_v19  ;;  %v2866_v13 = vld [vmem:[%s5647_s8 + $0x108] sm:$0xff] }
 0xb3a   : > { %4015 = vmatprep.subr.mxu0 %v4235_v19  ;;  %2994 = vmatprep.mubr.f32.mxu1 %v4235_v19 }
 0xb3b   : > { %4016 = vmatpush3.msra.mxu0 %v2756_v32  ;;  %2947 = vmatpush1.msra.mxu1 %v2882_v56  ;;  %v2865_v32 = vld [vmem:[%s5647_s8 + $0x100] sm:$0xff]  ;;  %v2852_v56 = vld [vmem:[%s5647_s8 + $0x98] sm:$0xff] }
 0xb3c   : > { %4017 = vmatprep.subr.mxu0 %v4235_v19  ;;  %2948 = vmatprep.subr.mxu1 %v2876_v23  ;;  %v2851_v23 = vld [vmem:[%s5647_s8 + $0x90] sm:$0xff] }
 0xb3d   : > { %4018 = vmatpush3.msra.mxu0 %v2755_v14  ;;  %2949 = vmatpush1.msra.mxu1 %v2875_v24  ;;  %v2867_v14 = vld [vmem:[%s5647_s8 + $0x110] sm:$0xff]  ;;  %v2853_v24 = vld [vmem:[%s5647_s8 + $0xa0] sm:$0xff] }
 0xb3e   : > { %4019 = vmatprep.subr.mxu0 %v4235_v19  ;;  %2950 = vmatprep.subr.mxu1 %v2869_v25  ;;  %v2845_v25 = vld [vmem:[%s5647_s8 + $0x60] sm:$0xff] }
 0xb3f   : > { %4020 = vmatpush3.msra.mxu0 %v2754_v15  ;;  %2951 = vmatpush1.msra.mxu1 %v2868_v31  ;;  %v2859_v15 = vld [vmem:[%s5647_s8 + $0xd0] sm:$0xff]  ;;  %v2844_v31 = vld [vmem:[%s5647_s8 + $0x58] sm:$0xff] }
 0xb40   : > { %3017 = vmatprep.subr.mxu0 %v2885_v18  ;;  %2952 = vmatprep.subr.mxu1 %v2862_v34  ;;  %v2860_v18 = vld [vmem:[%s5647_s8 + $0xd8] sm:$0xff]  ;;  %v2846_v34 = vld [vmem:[%s5647_s8 + $0x68] sm:$0xff] }
 0xb41   : > { %2953 = vmatpush1.msra.mxu1 %v2861_v37  ;;  %v2838_v37 = vld [vmem:[%s5647_s8 + $0x28] sm:$0xff] }
 0xb42   : > { %2954 = vmatprep.subr.mxu1 %v2855_v38  ;;  %v2837_v38 = vld [vmem:[%s5647_s8 + $0x20] sm:$0xff] }
 0xb43   : > { %2955 = vmatpush1.msra.mxu1 %v2854_v26  ;;  %v2839_v26 = vld [vmem:[%s5647_s8 + $0x30] sm:$0xff] }
 0xb44   : > { %2956 = vmatprep.subr.mxu1 %v2848_v27 }
 0xb45   : > { %2957 = vmatpush1.msra.mxu1 %v2847_v29 }
 0xb46   : > { %2958 = vmatprep.subr.mxu1 %v2841_v49 }
 0xb47   : > { %2959 = vmatpush1.msra.mxu1 %v2840_v54 }
 0xb48   : > { %2960 = vmatprep.subr.mxu1 %v2834_v63 }
 0xb49   : > { %2961 = vmatpush1.msra.mxu1 %v2833_v2 }
 0xb4a   : > { %3088 = vmatprep.subr.mxu1 %v2887_v52 }
 0xbf8   : > { %v2670_v41 = vpop.f32.mrf.mxu0  ;;  %v2749_v57 = vpop.f32.mrf.mxu1 }
 0xbf9   : > { %2675 = vst.msk [vmem:[%s5432_s24] sm:$0x1] %vm2674_vm7, %v2670_v41  ;;  %v2750_v40 = vadd.f32 %v2749_v57, %v2682_v39 }
 0xbfa   : > { %v3997_v42 = vpop.f32.mrf.mxu0  ;;  %v4012_v43 = vpop.f32.mrf.mxu1 }
 0xbfb   : > { %v2753_v55 = vmax.f32 %v2750_v40, 0.0 }
 0xbfd   : > { %4022 = vmatmul.mubr.msk.f32.vlgmr.msra.gmra.mxu0 %vm1029_vm10, %v2753_v55  ;;  %vm2926_vm10 = vcmask 523264  }
 0xbfe   : > { %3018 = vmatpush1.msra.mxu0 %v2884_v44  ;;  %3065 = vmatprep.mubr.f32.mxu0 %v4235_v19 }
 0xbff   : > { %3019 = vmatprep.subr.mxu0 %v2878_v59 }
 0xc00   : > { %3020 = vmatpush1.msra.mxu0 %v2877_v60 }
 0xc01   : > { %3021 = vmatprep.subr.mxu0 %v2871_v58 }
 0xc02   : > { %3022 = vmatpush1.msra.mxu0 %v2870_v45 }
 0xc03   : > { %3023 = vmatprep.subr.mxu0 %v2864_v46 }
 0xc04   : > { %3024 = vmatpush1.msra.mxu0 %v2863_v47 }
 0xc05   : > { %3025 = vmatprep.subr.mxu0 %v2857_v48 }
 0xc06   : > { %3026 = vmatpush1.msra.mxu0 %v2856_v0 }
 0xc07   : > { %3027 = vmatprep.subr.mxu0 %v2850_v6 }
 0xc08   : > { %3028 = vmatpush1.msra.mxu0 %v2849_v62 }
 0xc09   : > { %3029 = vmatprep.subr.mxu0 %v2843_v53 }
 0xc0a   : > { %3030 = vmatpush1.msra.mxu0 %v2842_v61 }
 0xc0b   : > { %3031 = vmatprep.subr.mxu0 %v2836_v1 }
 0xc0c   : > { %3032 = vmatpush1.msra.mxu0 %v2835_v3 }
 0xc0d   : > { %4024 = vmatprep.subr.mxu0 %v4235_v19 }
 0xcbd   : > { %v2828_v30 = vpop.f32.mrf.mxu0 }
 0xcbe   : > { %v2829_v33 = vadd.f32 %v2828_v30, %v2758_v28 }
 0xcbf   : > { %v4023_v35 = vpop.f32.mrf.mxu0 }
 0xcc0   : > { %v2832_v36 = vmax.f32 %v2829_v33, 0.0 }
 0xcc2   : > { %3517 = vmatmul.mubr.msk.f32.vlgmr.msra.gmra.mxu1 %vm2926_vm10, %v2832_v36  ;;  %3518 = vmatmul.mubr.msk.f32.vlgmr.msra.gmra.mxu0 %vm2926_vm10, %v2832_v36 }
 0xcc3   : > { %3089 = vmatpush1.msra.mxu1 %v2886_v4  ;;  %4025 = vmatpush3.msra.mxu0 %v2888_v5 }
 0xcc4   : > { %3090 = vmatprep.subr.mxu1 %v2880_v7  ;;  %4026 = vmatprep.subr.mxu0 %v4235_v19 }
 0xcc5   : > { %3091 = vmatpush1.msra.mxu1 %v2879_v8  ;;  %4027 = vmatpush3.msra.mxu0 %v2881_v9 }
 0xcc6   : > { %3092 = vmatprep.subr.mxu1 %v2873_v10  ;;  %4028 = vmatprep.subr.mxu0 %v4235_v19 }
 0xcc7   : > { %3093 = vmatpush1.msra.mxu1 %v2872_v11  ;;  %4029 = vmatpush3.msra.mxu0 %v2874_v12 }
 0xcc8   : > { %3094 = vmatprep.subr.mxu1 %v2866_v13  ;;  %4030 = vmatprep.subr.mxu0 %v4235_v19 }
 0xcc9   : > { %3095 = vmatpush1.msra.mxu1 %v2865_v32  ;;  %4031 = vmatpush3.msra.mxu0 %v2867_v14 }
 0xcca   : > { %3096 = vmatprep.subr.mxu1 %v2859_v15  ;;  %4032 = vmatprep.subr.mxu0 %v4235_v19 }
 0xccb   : > { %3097 = vmatpush1.msra.mxu1 %v2858_v16  ;;  %4033 = vmatpush3.msra.mxu0 %v2860_v18 }
 0xccc   : > { %3098 = vmatprep.subr.mxu1 %v2852_v56  ;;  %4034 = vmatprep.subr.mxu0 %v4235_v19 }
 0xccd   : > { %3099 = vmatpush1.msra.mxu1 %v2851_v23  ;;  %4035 = vmatpush3.msra.mxu0 %v2853_v24 }
 0xcce   : > { %3100 = vmatprep.subr.mxu1 %v2845_v25  ;;  %4036 = vmatprep.subr.mxu0 %v4235_v19 }
 0xccf   : > { %3101 = vmatpush1.msra.mxu1 %v2844_v31  ;;  %4037 = vmatpush3.msra.mxu0 %v2846_v34 }
 0xcd0   : > { %3102 = vmatprep.subr.mxu1 %v2838_v37  ;;  %4038 = vmatprep.subr.mxu0 %v4235_v19 }
 0xcd1   : > { %3103 = vmatpush1.msra.mxu1 %v2837_v38  ;;  %3136 = vmatprep.mubr.f32.mxu1 %v4235_v19 }
 0xcd2   : > { %4039 = vmatpush3.msra.mxu0 %v2839_v26  ;;  %4040 = vmatprep.mubr.msk.f32.mxu0 %vm4236_vm1, %v4235_v19 }
 0xcd3   : > { %3519 = vmatmul.mubr.msk.f32.vlgmr.msra.gmra.mxu1 %vm2926_vm10, %v2832_v36  ;;  %4041 = vmatmul.mubr.msk.f32.vlgmr.msra.gmra.mxu0 %vm2926_vm10, %v2832_v36 }
 0xcd4   : > { %4186 = shalt.err (!%p4183_p3)
}
 0xcd5   : > { %s4187_s21 = scalar_lea.hbm %s3324_s25, 16  ;;  %s4191_s16 = scalar_lea.hbm %s5649_s10, 32 }
 0xcd6   : > { %p4188_p4 = scmp.ne.s32.totalorder %s3324_s25, %s4187_s21  ;;  %p4192_p9 = scmp.lt.s32.totalorder %s3324_s25, %s5649_s10 }
 0xcd7   : > { %p4193_p10 = scmp.lt.s32.totalorder %s4191_s16, %s4187_s21 }
 0xcd8   : > { %p4189_p7 = pnand %p4188_p4, %p4340_p5 }
 0xcd9   : > { %p4194_p11 = por %p4193_p10, %p4192_p9 }
 0xcda   : > { %p4190_p8 = pneg %p4189_p7 }
 0xcdc   : > { %p4195_p12 = pnand %p4194_p11, %p4190_p8 }
 0xcde   : > { %4198 = shalt.err (!%p4195_p12)
}
 0xcdf   : > { %4045 = dma.vmem_to_hbm [thread:$0]  (%p4340_p5), %s3327_s23, 16, %s3324_s25, %s3310_s29   ;;  %v2889_v19 = vld [vmem:[%s5648_s9] sm:$0xff]  ;;  %v2909_v47 = vsub.s32 4, %v4883_v51  ;;  %v4241_v23 = vmov 1966171168   ;;  %vm3306_vm1 = vcmp.lt.s32.totalorder %v1009_v50, 896 }
 0xce0   : > { %v2898_v39 = vrot.slane %v2889_v19, %v1109_v22  ;;  %v2906_v41 = vrot.slane %v2889_v19, %v1283_v21  ;;  %v2894_v57 = vrot.slane %v2889_v19, %v4912_v17  ;;  %v2902_v43 = vrot.slane %v2889_v19, %v1196_v20  ;;  %s4044_s27 = smul.u32 7, %s4447_s22 }
 0xce1   : > { %v2917_v22 = vsub.s32 6, %v4883_v51  ;;  %v2913_v17 = vsub.s32 5, %v4883_v51  ;;  %v2910_v62 = vrot.slane %v2889_v19, %v2909_v47  ;;  %v3259_v24 = vunpack.c.l.s4 %v4241_v23 }
 0xce2   : > { %s394_s29 = scalar_lea.vmem %s5650_s11, %s4044_s27 }
 0xce3   : > { %v2918_v49 = vrot.slane %v2889_v19, %v2917_v22  ;;  %v2914_v53 = vrot.slane %v2889_v19, %v2913_v17  ;;  %v3260_v31 = vunpack.c.0.s8 %v3259_v24 }
 0xce5   : > { %v3263_v19 = vsub.s32 %v3260_v31, %v4883_v51 }
 0xd82   : > { %v2996_v27 = vpop.f32.mrf.mxu1  ;;  %v3067_v29 = vpop.f32.mrf.mxu0 }
 0xd83   : > { %v2997_v59 = vadd.f32 %v2996_v27, %v2894_v57  ;;  %v3068_v60 = vadd.f32 %v3067_v29, %v2902_v43 }
 0xd84   : > { %v2998_v40 = vpop.f32.mrf.mxu1  ;;  %v3069_v42 = vpop.f32.mrf.mxu0 }
 0xd85   : > { %v2999_v55 = vadd.f32 %v2998_v40, %v2898_v39  ;;  %v3070_v44 = vadd.f32 %v3069_v42, %v2906_v41  ;;  %v3213_v46 = vsub.f32 0.0, %v2997_v59  ;;  %v3215_v48 = vsub.f32 0.0, %v3068_v60 }
 0xd87   : > { %v3214_v58 = vsub.f32 0.0, %v2999_v55  ;;  %v3216_v45 = vsub.f32 0.0, %v3070_v44  ;;  %v3220_v6 = vmul.f32 1.442695, %v3213_v46  ;;  %v3224_v20 = vmul.f32 1.442695, %v3215_v48 }
 0xd89   : > { %v3222_v21 = vmul.f32 1.442695, %v3214_v58  ;;  %v3226_v0 = vmul.f32 1.442695, %v3216_v45 }
 0xd8b   : > { %4145 = vpow2.f32 %v3222_v21 }
 0xd8c   : > { %4147 = vpow2.f32 %v3226_v0 }
 0xd8d   : > { %4149 = vpow2.f32 %v3220_v6 }
 0xd8e   : > { %4151 = vpow2.f32 %v3224_v20 }
 0xd93   : > { %v3138_v54 = vpop.f32.mrf.mxu1  ;;  %v3209_v61 = vpop.f32.mrf.mxu0 }
 0xd94   : > { %v3139_v63 = vadd.f32 %v3138_v54, %v2910_v62  ;;  %v3210_v1 = vadd.f32 %v3209_v61, %v2918_v49 }
 0xd95   : > { %v3140_v2 = vpop.f32.mrf.mxu1  ;;  %v4042_v3 = vpop.f32.mrf.mxu0 }
 0xd96   : > { %v3217_v52 = vsub.f32 0.0, %v3139_v63  ;;  %v3219_v28 = vsub.f32 0.0, %v3210_v1  ;;  %v3141_v30 = vadd.f32 %v3140_v2, %v2914_v53 }
 0xd98   : > { %v3218_v33 = vsub.f32 0.0, %v3141_v30  ;;  %v3228_v35 = vmul.f32 1.442695, %v3217_v52  ;;  %v3232_v36 = vmul.f32 1.442695, %v3219_v28  ;;  %v4146_v5 = vpop.eup %4145 }
 0xd99   : > { %v4148_v7 = vpop.eup %4147  ;;  %v3235_v10 = vadd.f32 1.0, %v4146_v5 }
 0xd9a   : > { %v3230_v4 = vmul.f32 1.442695, %v3218_v33  ;;  %4153 = vpow2.f32 %v3228_v35  ;;  %v4150_v8 = vpop.eup %4149  ;;  %v3237_v11 = vadd.f32 1.0, %v4148_v7 }
 0xd9b   : > { %4155 = vpow2.f32 %v3232_v36  ;;  %v4152_v9 = vpop.eup %4151  ;;  %v3234_v12 = vadd.f32 1.0, %v4150_v8 }
 0xd9c   : > { %4157 = vpow2.f32 %v3230_v4  ;;  %v3236_v13 = vadd.f32 1.0, %v4152_v9 }
 0xd9d   : > { %4159 = vrcp.f32 %v3235_v10 }
 0xd9e   : > { %4161 = vrcp.f32 %v3237_v11 }
 0xd9f   : > { %4163 = vrcp.f32 %v3234_v12 }
 0xda0   : > { %4165 = vrcp.f32 %v3236_v13 }
 0xda7   : > { %v4154_v32 = vpop.eup %4153 }
 0xda8   : > { %v4156_v14 = vpop.eup %4155  ;;  %v3238_v15 = vadd.f32 1.0, %v4154_v32 }
 0xda9   : > { %v4158_v16 = vpop.eup %4157  ;;  %v3240_v18 = vadd.f32 1.0, %v4156_v14 }
 0xdaa   : > { %4167 = vrcp.f32 %v3238_v15  ;;  %v3239_v56 = vadd.f32 1.0, %v4158_v16  ;;  %v4160_v25 = vpop.eup %4159 }
 0xdab   : > { %4169 = vrcp.f32 %v3240_v18  ;;  %v4162_v34 = vpop.eup %4161 }
 0xdac   : > { %4171 = vrcp.f32 %v3239_v56  ;;  %v4164_v37 = vpop.eup %4163 }
 0xdad   : > { %v4166_v38 = vpop.eup %4165  ;;  %v3255_v26 = vcombine.low %v4164_v37, %v4160_v25 }
 0xdae   : > { %v3256_v27 = vcombine.low %v4166_v38, %v4162_v34 }
 0xdaf   : > { %v3264_v41 = vrot.slane %v3255_v26, %v3263_v19 }
 0xdb0   : > { %v3271_v57 = vrot.slane %v3256_v27, %v3263_v19 }
 0xdb2   : > { %v3286_v43 = vcombine.low %v3264_v41, %v3271_v57 }
 0xdb4   : > { %v3294_v60 = vrot.slane %v3286_v43, %v3263_v19 }
 0xdb7   : > { %v4168_v29 = vpop.eup %4167 }
 0xdb8   : > { %v4170_v39 = vpop.eup %4169 }
 0xdb9   : > { %v4172_v40 = vpop.eup %4171  ;;  %v3285_v55 = vrot.slane %v4170_v39, %v3263_v19 }
 0xdba   : > { %v3257_v42 = vcombine.low %v4168_v29, %v4172_v40 }
 0xdbc   : > { %v3278_v44 = vrot.slane %v3257_v42, %v3263_v19 }
 0xdbe   : > { %v3287_v59 = vcombine.low %v3278_v44, %v3285_v55 }
 0xdc0   : > { %v3301_v58 = vrot.slane %v3287_v59, %v3263_v19 }
 0xdc2   : > { %v3302_v51 = vcombine.low %v3294_v60, %v3301_v58 }
 0xdc4   : > { %3308 = vst.msk [vmem:[%s394_s29] sm:$0x7f] %vm3306_vm1, %v3302_v51 }
 0xdc5 PF: > { %p4051_p5 = scmp.ge.s32.totalorder %s4233_s20, 2  ;;  %s3341_s12 = sand.u32 1, %s4221_s17  }
 0xdc6   : > { %s3342_s22 = scalar_lea.sflag [#allocation3], %s3341_s12 }
 0xdc7   : > { %p4048_p13 = pnand %p4051_p5, %p4344_p6 }
 0xdc9   : > { %p4049_p0 = pneg %p4048_p13 }
 0xdcb   : > { %4216 = dma.done.wait (%p4049_p0), %s3342_s22, 16  }
 0xdcc   : > { %4218 = vsyncadd (%p4049_p0), %s3342_s22, 4294967280  ;;  %s5671_s20 = sld [smem:[#allocation6_spill]]  ;;  %s5674_s17 = smov %s4225_s18 }
 0xdcd   : > { %s5672_s14 = sld [smem:[#allocation5_spill]] }
 0xdce   : > { %s5673_s19 = sld [smem:[#allocation7_spill]] }
 0xdd2   : > { %p22_p1 = scmp.ge.s32.totalorder %s5671_s20, 4  }
 0xdd3   : > { %s5675_s18 = smov %s5672_s14 }
 0xdd4   :  { %24 = sbr.rel (!%p22_p1) target bundleno = 3 (0x3), region = 110 }
 0xdd9   :  { %3353 = vsyncpa [#allocation3], 1 }
 0xdda   :  { %3355 = vsyncpa [#allocation3 + $0x1], 1 }

</bundles_post_ra>
